<compile_context>
chip_gen: v7x
topology: tpu7x:2x2x1
jax: 0.10.0
libtpu: 0.0.40
codegen_flags: <defaults>
</compile_context>

<pallas_src>
import jax
import jax.numpy as jnp
from jax.experimental import pallas as pl
from jax.experimental.pallas import tpu as pltpu

BN_EPS = 1e-5


# ---------------------------------------------------------------------------
# Fused kernel: ResidualBlock + MaxPool + BiLSTM + Attention + MLP head.
# ---------------------------------------------------------------------------
def _fused_forward_kernel(emb_ref, bounds_ref,
                          wcat1_ref, scat1_ref, tcat1_ref,
                          w2_ref, s2_ref, t2_ref,
                          wlin_ref, blin_ref, whh_ref,
                          wa_ref, ba_ref,
                          wfc1_ref, sbn_ref, tbn_ref,
                          wfc2_ref, bfc2_ref,
                          out_ref, xp_ref, hs_ref):
    f32, bf16 = jnp.float32, jnp.bfloat16
    tb, T, E = emb_ref.shape
    _, Tp, H8 = xp_ref.shape
    H = hs_ref.shape[2] // 2
    C = w2_ref.shape[1]
    BT = tb * T

    # ---------------- ResidualBlock (k=3 convs as im2col matmuls) -----------
    x = emb_ref[...].astype(f32).reshape(BT, E)              # bf16 in, f32 math
    tmod = jax.lax.broadcasted_iota(jnp.int32, (BT, 1), 0) % T

    def taps(v):
        # [v(t-1) | v(t) | v(t+1)] with zeros outside the sequence.
        # pltpu.roll keeps the shift on the XLU; the flat (tb*T) roll wraps
        # across batch rows only at positions that are masked to zero anyway.
        prev = jnp.where(tmod == 0, 0.0, pltpu.roll(v, shift=1, axis=0))
        nxt = jnp.where(tmod == T - 1, 0.0, pltpu.roll(v, shift=BT - 1, axis=0))
        return jnp.concatenate([prev, v, nxt], axis=1)

    # conv1 + 1x1-shortcut in ONE matmul: cols [0:C]=conv1, [C:2C]=shortcut.
    # Conv biases are folded into the BN affine (h*scale + shift').
    h01 = jnp.dot(taps(x).astype(bf16), wcat1_ref[...],
                  preferred_element_type=f32)
    h01 = h01 * scat1_ref[...] + tcat1_ref[...]
    h1 = jnp.maximum(h01[:, :C], 0.0)                        # relu(bn1(conv1))
    res = h01[:, C:]                                         # bn_sc(conv_sc)

    h2 = jnp.dot(taps(h1).astype(bf16), w2_ref[...],
                 preferred_element_type=f32)
    y = jnp.maximum(h2 * s2_ref[...] + t2_ref[...] + res, 0.0)   # (BT, C)

    # MaxPool1d(kernel_size=2), vectorized.
    pooled = jnp.max(y.reshape(tb, Tp, 2, C), axis=2)        # (tb, Tp, C)

    # ---------------- BiLSTM (fwd+bwd fused, packed via masking) ------------
    # Hoisted input projection.  Column layout is gate-major, direction-minor:
    # [i_f i_b f_f f_b g_f g_b o_f o_b], each block of width H.
    xp = jnp.dot(pooled.reshape(tb * Tp, C).astype(bf16), wlin_ref[...],
                 preferred_element_type=f32) + blin_ref[...]
    xp_ref[...] = xp.reshape(tb, Tp, H8)

    lane = jax.lax.broadcasted_iota(jnp.int32, (1, H8), 1)
    fwd_lanes = (lane % (2 * H)) < H                          # forward-dir cols
    bounds = bounds_ref[...]                                  # (tb, 2, 2H) int32
    lo = bounds[:, 0, :]                                      # fwd: 0   | bwd: Tp-L
    hi = bounds[:, 1, :]                                      # fwd: L   | bwd: Tp
    whh = whh_ref[...]                                        # (2H, 8H) bf16 block-diag

    def step(s, carry):
        h_cat, c_cat = carry                                  # (tb, 2H) f32
        rs = Tp - 1 - s
        # TODO(synk): the direction select / reversed store stay per-step; a
        # hoisted time-reversal of xp / hs needs lax.rev which Mosaic lacks.
        gx = jnp.where(fwd_lanes, xp_ref[:, s, :], xp_ref[:, rs, :])
        gates = gx + jnp.dot(h_cat.astype(bf16), whh,
                             preferred_element_type=f32)
        i = jax.nn.sigmoid(gates[:, 0:2 * H])
        f = jax.nn.sigmoid(gates[:, 2 * H:4 * H])
        g = jnp.tanh(gates[:, 4 * H:6 * H])
        o = jax.nn.sigmoid(gates[:, 6 * H:8 * H])
        c_new = f * c_cat + i * g
        h_new = o * jnp.tanh(c_new)
        m = (s >= lo) & (s < hi)
        # Zeroing (not freezing) is exact here: forward states past L never
        # reach a live output; backward states before time L-1 must equal the
        # zero init, which zeroing preserves.
        c_cat = jnp.where(m, c_new, 0.0)
        h_cat = jnp.where(m, h_new, 0.0)
        hs_ref[:, s, 0:H] = h_cat[:, 0:H]                     # fwd out @ time s
        hs_ref[:, rs, H:2 * H] = h_cat[:, H:]                 # bwd out @ time Tp-1-s
        return h_cat, c_cat

    z = jnp.zeros((tb, 2 * H), f32)
    if Tp <= 32:                        # small Tp: fully unrolled (static idx)
        carry = (z, z)
        for s in range(Tp):
            carry = step(s, carry)
    else:                               # large Tp: bounded live ranges
        jax.lax.fori_loop(0, Tp, step, (z, z))

    # ---------------- Attention + fc1 + BN + ReLU + fc2 + sigmoid -----------
    lstm = hs_ref[...]                                        # (tb, Tp, 2H)
    sc = jnp.dot(lstm.reshape(tb * Tp, 2 * H), wa_ref[...],   # MXU matvec
                 preferred_element_type=f32).reshape(tb, Tp, 1) + ba_ref[...]
    mx = jnp.max(sc, axis=1, keepdims=True)
    e = jnp.exp(sc - mx)
    w = e * pl.reciprocal(jnp.sum(e, axis=1, keepdims=True), approx=True)
    attn = jnp.sum(w * lstm, axis=1)                          # (tb, 2H)

    hh = jnp.dot(attn.astype(bf16), wfc1_ref[...],
                 preferred_element_type=f32)
    hh = jnp.maximum(hh * sbn_ref[...] + tbn_ref[...], 0.0)   # folded bias+BN, ReLU
    logit = jnp.dot(hh, wfc2_ref[...],
                    preferred_element_type=f32) + bfc2_ref[...]
    out_ref[0] = jax.nn.sigmoid(logit)                        # (tb, 1)


# ---------------------------------------------------------------------------
# Parameters
# ---------------------------------------------------------------------------
def init_params(key, vocab_size, E, C, H, M):
    ks = jax.random.split(key, 20)

    def unif(k, shape, s=0.1):
        return jax.random.uniform(k, shape, jnp.float32, -s, s)

    emb = jax.random.uniform(ks[0], (vocab_size, E), jnp.float32, -1.0, 1.0)
    emb = emb.at[0].set(0.0)                                  # padding_idx = 0

    bn_scale_c = jnp.full((C,), 1.0 / jnp.sqrt(1.0 + BN_EPS), jnp.float32)
    bn_shift_c = jnp.zeros((C,), jnp.float32)
    bn_scale_m = jnp.full((M,), 1.0 / jnp.sqrt(1.0 + BN_EPS), jnp.float32)
    bn_shift_m = jnp.zeros((M,), jnp.float32)

    return dict(
        embedding=emb,
        w1=unif(ks[1], (3, E, C)), b1=unif(ks[2], (C,)),
        s1=bn_scale_c, t1=bn_shift_c,
        w2=unif(ks[3], (3, C, C)), b2=unif(ks[4], (C,)),
        s2=bn_scale_c, t2=bn_shift_c,
        wsc=unif(ks[5], (E, C)), bsc=unif(ks[6], (C,)),
        ssc=bn_scale_c, tsc=bn_shift_c,
        wih_f=unif(ks[7], (C, 4 * H)), whh_f=unif(ks[8], (H, 4 * H)),
        b_f=unif(ks[9], (4 * H,)),
        wih_b=unif(ks[10], (C, 4 * H)), whh_b=unif(ks[11], (H, 4 * H)),
        b_b=unif(ks[12], (4 * H,)),
        w_att=unif(ks[13], (2 * H,)), b_att=unif(ks[14], (1,)),
        wfc1=unif(ks[15], (2 * H, M)), bfc1=unif(ks[16], (M,)),
        s_bn=bn_scale_m, t_bn=bn_shift_m,
        wfc2=unif(ks[17], (M,)), bfc2=unif(ks[18], (1,)),
    )


def _pick_batch_tile(B, T, E, C, H):
    """tb so that tb*T >= 256 (MXU-sized im2col M-dim) within a VMEM budget."""
    Tp = T // 2
    per_row = 4 * (T * (4 * E + 8 * C) + Tp * (10 * H + C))   # rough f32 bytes
    cap = max(1, (24 * 1024 * 1024) // max(per_row, 1))       # activation budget
    want = max(1, -(-256 // T))                               # ceil(256 / T)
    tb = max(1, min(B, want, cap))
    while B % tb:
        tb -= 1
    return tb


# ---------------------------------------------------------------------------
# Forward wrapper
# ---------------------------------------------------------------------------
def optimized_net_forward(x_ids, lengths, p, *, batch_tile=None):
    # Packed-sequence precondition (matches the PyTorch module, which packs the
    # pooled activations with the ORIGINAL lengths): 1 <= lengths <= T//2 and
    # max(lengths) == T//2, so the padded LSTM output spans all Tp steps.
    B, T = x_ids.shape
    E = p['embedding'].shape[1]
    C = p['w1'].shape[2]
    H = p['whh_f'].shape[0]
    M = p['wfc1'].shape[1]
    assert T % 2 == 0
    Tp = T // 2
    tb = _pick_batch_tile(B, T, E, C, H) if batch_tile is None else batch_tile
    assert B % tb == 0
    nb = B // tb
    f32, bf16 = jnp.float32, jnp.bfloat16

    # Embedding gather as one XLA op (bf16 halves HBM->VMEM traffic).
    # TODO(synk): in-kernel embedding gather (DMA walk) not implemented; a
    # single XLA gather is cheaper here.
    emb = jnp.take(p['embedding'].astype(bf16), x_ids, axis=0)    # (B,T,E) bf16

    # conv1 + 1x1 shortcut fused weight (3E, 2C); bias folded into BN affine.
    w1f = p['w1'].reshape(3 * E, C)
    wsc_pad = jnp.zeros((3 * E, C), f32).at[E:2 * E, :].set(p['wsc'])
    wcat1 = jnp.concatenate([w1f, wsc_pad], axis=1).astype(bf16)
    s_cat = jnp.concatenate([p['s1'], p['ssc']])
    scat1 = s_cat.reshape(1, 2 * C)
    tcat1 = (jnp.concatenate([p['b1'], p['bsc']]) * s_cat
             + jnp.concatenate([p['t1'], p['tsc']])).reshape(1, 2 * C)
    w2f = p['w2'].reshape(3 * C, C).astype(bf16)
    s2 = p['s2'].reshape(1, C)
    t2f = (p['b2'] * p['s2'] + p['t2']).reshape(1, C)

    # LSTM weights rearranged gate-major / direction-minor:
    # columns [i_f i_b f_f f_b g_f g_b o_f o_b], each of width H.
    def place(wf, wb):
        cols = []
        for gi in range(4):
            cols.append(wf[:, gi * H:(gi + 1) * H])
            cols.append(wb[:, gi * H:(gi + 1) * H])
        return jnp.concatenate(cols, axis=1)

    wlin = place(p['wih_f'], p['wih_b']).astype(bf16)             # (C, 8H)
    blin = place(p['b_f'].reshape(1, -1), p['b_b'].reshape(1, -1))  # (1, 8H) f32
    zH = jnp.zeros((H, 4 * H), f32)
    whh = place(jnp.concatenate([p['whh_f'], zH], axis=0),
                jnp.concatenate([zH, p['whh_b']], axis=0)).astype(bf16)  # (2H,8H)

    # Per-row step-validity bounds (replaces the old (B,Tp,2H) float mask DMA):
    # fwd lanes valid for s in [0, L), bwd lanes valid for s in [Tp-L, Tp).
    L = lengths.astype(jnp.int32)
    lower = jnp.concatenate(
        [jnp.zeros((B, H), jnp.int32),
         jnp.broadcast_to((Tp - L)[:, None], (B, H))], axis=1)
    upper = jnp.concatenate(
        [jnp.broadcast_to(L[:, None], (B, H)),
         jnp.full((B, H), Tp, jnp.int32)], axis=1)
    bounds = jnp.stack([lower, upper], axis=1)                    # (B, 2, 2H)

    sbn = p['s_bn'].reshape(1, M)
    tbnf = (p['bfc1'] * p['s_bn'] + p['t_bn']).reshape(1, M)

    def bspec(shape):
        n = len(shape)
        return pl.BlockSpec(shape, lambda b, _n=n: (b,) + (0,) * (_n - 1))

    def rspec(shape):
        n = len(shape)
        return pl.BlockSpec(shape, lambda b, _n=n: (0,) * _n)

    in_specs = [
        bspec((tb, T, E)),                    # emb
        bspec((tb, 2, 2 * H)),                # bounds
        rspec((3 * E, 2 * C)), rspec((1, 2 * C)), rspec((1, 2 * C)),
        rspec((3 * C, C)), rspec((1, C)), rspec((1, C)),
        rspec((C, 8 * H)), rspec((1, 8 * H)), rspec((2 * H, 8 * H)),
        rspec((2 * H, 1)), rspec((1, 1, 1)),
        rspec((2 * H, M)), rspec((1, M)), rspec((1, M)),
        rspec((M, 1)), rspec((1, 1)),
    ]

    probs = pl.pallas_call(
        _fused_forward_kernel,
        out_shape=jax.ShapeDtypeStruct((nb, tb, 1), jnp.float32),
        grid=(nb,),
        in_specs=in_specs,
        out_specs=pl.BlockSpec((1, tb, 1), lambda b: (b, 0, 0)),
        scratch_shapes=[pltpu.VMEM((tb, Tp, 8 * H), jnp.float32),   # xp (hoisted proj)
                        pltpu.VMEM((tb, Tp, 2 * H), jnp.float32)],  # lstm outputs
        compiler_params=pltpu.CompilerParams(
            dimension_semantics=("parallel",),      # v7x: 2nd TC takes half the grid
            vmem_limit_bytes=64 * 1024 * 1024),
    )(emb, bounds,
      wcat1, scat1, tcat1,
      w2f, s2, t2f,
      wlin, blin, whh,
      p['w_att'].reshape(2 * H, 1), p['b_att'].reshape(1, 1, 1),
      p['wfc1'].astype(bf16), sbn, tbnf,
      p['wfc2'].reshape(M, 1), p['bfc2'].reshape(1, 1))

    return probs.reshape(B)


if __name__ == "__main__":
    V, E, C, H, M = 50, 8, 32, 32, 32     # vocab, embed, conv_ch, lstm_hidden, mlp_hidden
    B, T = 2, 16
    Tp = T // 2

    key = jax.random.PRNGKey(0)
    k_tok, k_par = jax.random.split(key, 2)

    # lengths must satisfy the pack_padded_sequence precondition of the
    # reference: 1 <= length <= Tp and max(length) == Tp.
    lengths = jnp.array([Tp, Tp - 3], dtype=jnp.int32)
    assert int(lengths.max()) == Tp and int(lengths.min()) >= 1

    x_ids = jax.random.randint(k_tok, (B, T), 1, V, dtype=jnp.int32)
    valid = jnp.arange(T)[None, :] < (2 * lengths)[:, None]
    x_ids = jnp.where(valid, x_ids, 0)                        # PAD_IDX = 0 beyond length

    params = init_params(k_par, V, E, C, H, M)

    fwd = jax.jit(optimized_net_forward)
    out = jax.block_until_ready(fwd(x_ids, lengths, params))
    assert out.shape == (B,) and bool(jnp.all((out >= 0.0) & (out <= 1.0)))
    print("KERNEL_OK")
</pallas_src>

<mosaic_0001>
module attributes {stable_mosaic.version = 11 : i64} {
  func.func @_fused_forward_kernel(%arg0: i32, %arg1: memref<2x16x8xbf16, #tpu.memory_space<vmem>>, %arg2: memref<2x2x64xi32, #tpu.memory_space<vmem>>, %arg3: memref<24x64xbf16, #tpu.memory_space<vmem>>, %arg4: memref<1x64xf32, #tpu.memory_space<vmem>>, %arg5: memref<1x64xf32, #tpu.memory_space<vmem>>, %arg6: memref<96x32xbf16, #tpu.memory_space<vmem>>, %arg7: memref<1x32xf32, #tpu.memory_space<vmem>>, %arg8: memref<1x32xf32, #tpu.memory_space<vmem>>, %arg9: memref<32x256xbf16, #tpu.memory_space<vmem>>, %arg10: memref<1x256xf32, #tpu.memory_space<vmem>>, %arg11: memref<64x256xbf16, #tpu.memory_space<vmem>>, %arg12: memref<64x1xf32, #tpu.memory_space<vmem>>, %arg13: memref<1x1x1xf32, #tpu.memory_space<vmem>>, %arg14: memref<64x32xbf16, #tpu.memory_space<vmem>>, %arg15: memref<1x32xf32, #tpu.memory_space<vmem>>, %arg16: memref<1x32xf32, #tpu.memory_space<vmem>>, %arg17: memref<32x1xf32, #tpu.memory_space<vmem>>, %arg18: memref<1x1xf32, #tpu.memory_space<vmem>>, %arg19: memref<1x2x1xf32, #tpu.memory_space<vmem>>, %arg20: memref<2x8x256xf32, #tpu.memory_space<vmem>>, %arg21: memref<2x8x64xf32, #tpu.memory_space<vmem>>) attributes {dimension_semantics = [#tpu.dimension_semantics<parallel>], iteration_bounds = array<i64: 1>, scalar_prefetch = 0 : i64, scratch_operands = 2 : i64, tpu.core_type = #tpu.core_type<tc>, window_params = [{transform_indices = @transform_0, window_bounds = array<i64: 2, 16, 8>}, {transform_indices = @transform_1, window_bounds = array<i64: 2, 2, 64>}, {pipeline_mode = #tpu.pipeline_mode<synchronous>, transform_indices = @transform_2, window_bounds = array<i64: 24, 64>}, {pipeline_mode = #tpu.pipeline_mode<synchronous>, transform_indices = @transform_3, window_bounds = array<i64: 1, 64>}, {pipeline_mode = #tpu.pipeline_mode<synchronous>, transform_indices = @transform_4, window_bounds = array<i64: 1, 64>}, {pipeline_mode = #tpu.pipeline_mode<synchronous>, transform_indices = @transform_5, window_bounds = array<i64: 96, 32>}, {pipeline_mode = #tpu.pipeline_mode<synchronous>, transform_indices = @transform_6, window_bounds = array<i64: 1, 32>}, {pipeline_mode = #tpu.pipeline_mode<synchronous>, transform_indices = @transform_7, window_bounds = array<i64: 1, 32>}, {pipeline_mode = #tpu.pipeline_mode<synchronous>, transform_indices = @transform_8, window_bounds = array<i64: 32, 256>}, {pipeline_mode = #tpu.pipeline_mode<synchronous>, transform_indices = @transform_9, window_bounds = array<i64: 1, 256>}, {pipeline_mode = #tpu.pipeline_mode<synchronous>, transform_indices = @transform_10, window_bounds = array<i64: 64, 256>}, {pipeline_mode = #tpu.pipeline_mode<synchronous>, transform_indices = @transform_11, window_bounds = array<i64: 64, 1>}, {pipeline_mode = #tpu.pipeline_mode<synchronous>, transform_indices = @transform_12, window_bounds = array<i64: 1, 1, 1>}, {pipeline_mode = #tpu.pipeline_mode<synchronous>, transform_indices = @transform_13, window_bounds = array<i64: 64, 32>}, {pipeline_mode = #tpu.pipeline_mode<synchronous>, transform_indices = @transform_14, window_bounds = array<i64: 1, 32>}, {pipeline_mode = #tpu.pipeline_mode<synchronous>, transform_indices = @transform_15, window_bounds = array<i64: 1, 32>}, {pipeline_mode = #tpu.pipeline_mode<synchronous>, transform_indices = @transform_16, window_bounds = array<i64: 32, 1>}, {pipeline_mode = #tpu.pipeline_mode<synchronous>, transform_indices = @transform_17, window_bounds = array<i64: 1, 1>}, {transform_indices = @transform_18, window_bounds = array<i64: 1, 2, 1>}]} {
    %c0 = arith.constant 0 : index
    %c0_0 = arith.constant 0 : index
    %c0_1 = arith.constant 0 : index
    %0 = vector.load %arg1[%c0, %c0_0, %c0_1] : memref<2x16x8xbf16, #tpu.memory_space<vmem>>, vector<2x16x8xbf16>
    %1 = arith.extf %0 : vector<2x16x8xbf16> to vector<2x16x8xf32>
    %2 = vector.shape_cast %1 : vector<2x16x8xf32> to vector<32x8xf32>
    %3 = tpu.iota {dimensions = array<i32: 0>} : vector<32x1xi32>
    %c16_i32 = arith.constant 16 : i32
    %c0_i32 = arith.constant 0 : i32
    %4 = arith.cmpi eq, %c16_i32, %c0_i32 : i32
    %c1_i32 = arith.constant 1 : i32
    %5 = arith.select %4, %c1_i32, %c16_i32 : i32
    %6 = vector.broadcast %5 : i32 to vector<32x1xi32>
    %7 = arith.remsi %3, %6 : vector<32x1xi32>
    %c0_i32_2 = arith.constant 0 : i32
    %8 = vector.broadcast %c0_i32_2 : i32 to vector<32x1xi32>
    %9 = arith.cmpi ne, %7, %8 : vector<32x1xi32>
    %c0_i32_3 = arith.constant 0 : i32
    %10 = vector.broadcast %c0_i32_3 : i32 to vector<32x1xi32>
    %11 = arith.cmpi slt, %7, %10 : vector<32x1xi32>
    %c0_i32_4 = arith.constant 0 : i32
    %12 = arith.cmpi slt, %5, %c0_i32_4 : i32
    %13 = vector.broadcast %12 : i1 to vector<32x1xi1>
    %14 = vector.broadcast %13 : vector<32x1xi1> to vector<32x1xi1>
    %15 = arith.xori %11, %14 : vector<32x1xi1>
    %16 = arith.andi %15, %9 : vector<32x1xi1>
    %17 = vector.broadcast %5 : i32 to vector<32x1xi32>
    %18 = arith.addi %7, %17 : vector<32x1xi32>
    %19 = arith.select %16, %18, %7 : vector<32x1xi1>, vector<32x1xi32>
    %c0_i32_5 = arith.constant 0 : i32
    %20 = vector.broadcast %c0_i32_5 : i32 to vector<32x1xi32>
    %21 = arith.cmpi eq, %19, %20 : vector<32x1xi32>
    %c1_i32_6 = arith.constant 1 : i32
    %22 = tpu.dynamic_rotate %2 by %c1_i32_6 dim 0 : vector<32x8xf32>, i32 -> vector<32x8xf32>
    %cst = arith.constant 0.000000e+00 : f32
    %23 = vector.shape_cast %21 : vector<32x1xi1> to vector<32x1xi1>
    %24 = vector.broadcast %23 : vector<32x1xi1> to vector<32x8xi1>
    %25 = vector.broadcast %cst : f32 to vector<32x8xf32>
    %26 = arith.select %24, %25, %22 : vector<32x8xi1>, vector<32x8xf32>
    %c15_i32 = arith.constant 15 : i32
    %27 = vector.broadcast %c15_i32 : i32 to vector<32x1xi32>
    %28 = arith.cmpi eq, %19, %27 : vector<32x1xi32>
    %c31_i32 = arith.constant 31 : i32
    %29 = tpu.dynamic_rotate %2 by %c31_i32 dim 0 : vector<32x8xf32>, i32 -> vector<32x8xf32>
    %cst_7 = arith.constant 0.000000e+00 : f32
    %30 = vector.shape_cast %28 : vector<32x1xi1> to vector<32x1xi1>
    %31 = vector.broadcast %30 : vector<32x1xi1> to vector<32x8xi1>
    %32 = vector.broadcast %cst_7 : f32 to vector<32x8xf32>
    %33 = arith.select %31, %32, %29 : vector<32x8xi1>, vector<32x8xf32>
    %34 = tpu.concatenate %26, %2, %33 in 1 : vector<32x8xf32>, vector<32x8xf32>, vector<32x8xf32> -> vector<32x24xf32>
    %35 = arith.truncf %34 : vector<32x24xf32> to vector<32x24xbf16>
    %c0_8 = arith.constant 0 : index
    %c0_9 = arith.constant 0 : index
    %36 = vector.load %arg3[%c0_8, %c0_9] : memref<24x64xbf16, #tpu.memory_space<vmem>>, vector<24x64xbf16>
    %cst_10 = arith.constant dense<0.000000e+00> : vector<32x64xf32>
    %37 = tpu.matmul %35, %36, %cst_10 {dimension_numbers = #tpu.dot_dimension_numbers<[1], [0], [0], [1], [0, 0, 1, 1], [], []>} : vector<32x24xbf16>, vector<24x64xbf16>, vector<32x64xf32> -> vector<32x64xf32>
    %c0_11 = arith.constant 0 : index
    %c0_12 = arith.constant 0 : index
    %38 = vector.load %arg4[%c0_11, %c0_12] : memref<1x64xf32, #tpu.memory_space<vmem>>, vector<1x64xf32>
    %39 = vector.broadcast %38 : vector<1x64xf32> to vector<32x64xf32>
    %40 = arith.mulf %37, %39 : vector<32x64xf32>
    %c0_13 = arith.constant 0 : index
    %c0_14 = arith.constant 0 : index
    %41 = vector.load %arg5[%c0_13, %c0_14] : memref<1x64xf32, #tpu.memory_space<vmem>>, vector<1x64xf32>
    %42 = vector.broadcast %41 : vector<1x64xf32> to vector<32x64xf32>
    %43 = arith.addf %40, %42 : vector<32x64xf32>
    %44 = vector.extract_strided_slice %43 {offsets = [0, 0], sizes = [32, 32], strides = [1, 1]} : vector<32x64xf32> to vector<32x32xf32>
    %cst_15 = arith.constant 0.000000e+00 : f32
    %45 = vector.broadcast %cst_15 : f32 to vector<32x32xf32>
    %46 = arith.maximumf %44, %45 : vector<32x32xf32>
    %47 = vector.extract_strided_slice %43 {offsets = [0, 32], sizes = [32, 32], strides = [1, 1]} : vector<32x64xf32> to vector<32x32xf32>
    %c0_i32_16 = arith.constant 0 : i32
    %48 = vector.broadcast %c0_i32_16 : i32 to vector<32x1xi32>
    %49 = arith.cmpi eq, %19, %48 : vector<32x1xi32>
    %c1_i32_17 = arith.constant 1 : i32
    %50 = tpu.dynamic_rotate %46 by %c1_i32_17 dim 0 : vector<32x32xf32>, i32 -> vector<32x32xf32>
    %cst_18 = arith.constant 0.000000e+00 : f32
    %51 = vector.shape_cast %49 : vector<32x1xi1> to vector<32x1xi1>
    %52 = vector.broadcast %51 : vector<32x1xi1> to vector<32x32xi1>
    %53 = vector.broadcast %cst_18 : f32 to vector<32x32xf32>
    %54 = arith.select %52, %53, %50 : vector<32x32xi1>, vector<32x32xf32>
    %c15_i32_19 = arith.constant 15 : i32
    %55 = vector.broadcast %c15_i32_19 : i32 to vector<32x1xi32>
    %56 = arith.cmpi eq, %19, %55 : vector<32x1xi32>
    %c31_i32_20 = arith.constant 31 : i32
    %57 = tpu.dynamic_rotate %46 by %c31_i32_20 dim 0 : vector<32x32xf32>, i32 -> vector<32x32xf32>
    %cst_21 = arith.constant 0.000000e+00 : f32
    %58 = vector.shape_cast %56 : vector<32x1xi1> to vector<32x1xi1>
    %59 = vector.broadcast %58 : vector<32x1xi1> to vector<32x32xi1>
    %60 = vector.broadcast %cst_21 : f32 to vector<32x32xf32>
    %61 = arith.select %59, %60, %57 : vector<32x32xi1>, vector<32x32xf32>
    %62 = tpu.concatenate %54, %46, %61 in 1 : vector<32x32xf32>, vector<32x32xf32>, vector<32x32xf32> -> vector<32x96xf32>
    %63 = arith.truncf %62 : vector<32x96xf32> to vector<32x96xbf16>
    %c0_22 = arith.constant 0 : index
    %c0_23 = arith.constant 0 : index
    %64 = vector.load %arg6[%c0_22, %c0_23] : memref<96x32xbf16, #tpu.memory_space<vmem>>, vector<96x32xbf16>
    %cst_24 = arith.constant dense<0.000000e+00> : vector<32x32xf32>
    %65 = tpu.matmul %63, %64, %cst_24 {dimension_numbers = #tpu.dot_dimension_numbers<[1], [0], [0], [1], [0, 0, 1, 1], [], []>} : vector<32x96xbf16>, vector<96x32xbf16>, vector<32x32xf32> -> vector<32x32xf32>
    %c0_25 = arith.constant 0 : index
    %c0_26 = arith.constant 0 : index
    %66 = vector.load %arg7[%c0_25, %c0_26] : memref<1x32xf32, #tpu.memory_space<vmem>>, vector<1x32xf32>
    %67 = vector.broadcast %66 : vector<1x32xf32> to vector<32x32xf32>
    %68 = arith.mulf %65, %67 : vector<32x32xf32>
    %c0_27 = arith.constant 0 : index
    %c0_28 = arith.constant 0 : index
    %69 = vector.load %arg8[%c0_27, %c0_28] : memref<1x32xf32, #tpu.memory_space<vmem>>, vector<1x32xf32>
    %70 = vector.broadcast %69 : vector<1x32xf32> to vector<32x32xf32>
    %71 = arith.addf %68, %70 : vector<32x32xf32>
    %72 = arith.addf %71, %47 : vector<32x32xf32>
    %cst_29 = arith.constant 0.000000e+00 : f32
    %73 = vector.broadcast %cst_29 : f32 to vector<32x32xf32>
    %74 = arith.maximumf %72, %73 : vector<32x32xf32>
    %75 = vector.shape_cast %74 : vector<32x32xf32> to vector<2x8x2x32xf32>
    %cst_30 = arith.constant dense<0xFF800000> : vector<2x8x32xf32>
    %76 = vector.multi_reduction <maximumf>, %75, %cst_30 [2] : vector<2x8x2x32xf32> to vector<2x8x32xf32>
    %77 = vector.shape_cast %76 : vector<2x8x32xf32> to vector<16x32xf32>
    %78 = arith.truncf %77 : vector<16x32xf32> to vector<16x32xbf16>
    %c0_31 = arith.constant 0 : index
    %c0_32 = arith.constant 0 : index
    %79 = vector.load %arg9[%c0_31, %c0_32] : memref<32x256xbf16, #tpu.memory_space<vmem>>, vector<32x256xbf16>
    %cst_33 = arith.constant dense<0.000000e+00> : vector<16x256xf32>
    %80 = tpu.matmul %78, %79, %cst_33 {dimension_numbers = #tpu.dot_dimension_numbers<[1], [0], [0], [1], [0, 0, 1, 1], [], []>} : vector<16x32xbf16>, vector<32x256xbf16>, vector<16x256xf32> -> vector<16x256xf32>
    %c0_34 = arith.constant 0 : index
    %c0_35 = arith.constant 0 : index
    %81 = vector.load %arg10[%c0_34, %c0_35] : memref<1x256xf32, #tpu.memory_space<vmem>>, vector<1x256xf32>
    %82 = vector.broadcast %81 : vector<1x256xf32> to vector<16x256xf32>
    %83 = arith.addf %80, %82 : vector<16x256xf32>
    %84 = vector.shape_cast %83 : vector<16x256xf32> to vector<2x8x256xf32>
    %c0_36 = arith.constant 0 : index
    %c0_37 = arith.constant 0 : index
    %c0_38 = arith.constant 0 : index
    %85 = vector.load %arg20[%c0_36, %c0_37, %c0_38] : memref<2x8x256xf32, #tpu.memory_space<vmem>>, vector<2x8x256xf32>
    tpu.vector_store %arg20[%c0_36, %c0_37, %c0_38], %84 {strides = array<i32>} : memref<2x8x256xf32, #tpu.memory_space<vmem>>, vector<2x8x256xf32>,
    %86 = tpu.iota {dimensions = array<i32: 1>} : vector<1x256xi32>
    %c64_i32 = arith.constant 64 : i32
    %c0_i32_39 = arith.constant 0 : i32
    %87 = arith.cmpi eq, %c64_i32, %c0_i32_39 : i32
    %c1_i32_40 = arith.constant 1 : i32
    %88 = arith.select %87, %c1_i32_40, %c64_i32 : i32
    %89 = vector.broadcast %88 : i32 to vector<1x256xi32>
    %90 = arith.remsi %86, %89 : vector<1x256xi32>
    %c0_i32_41 = arith.constant 0 : i32
    %91 = vector.broadcast %c0_i32_41 : i32 to vector<1x256xi32>
    %92 = arith.cmpi ne, %90, %91 : vector<1x256xi32>
    %c0_i32_42 = arith.constant 0 : i32
    %93 = vector.broadcast %c0_i32_42 : i32 to vector<1x256xi32>
    %94 = arith.cmpi slt, %90, %93 : vector<1x256xi32>
    %c0_i32_43 = arith.constant 0 : i32
    %95 = arith.cmpi slt, %88, %c0_i32_43 : i32
    %96 = vector.broadcast %95 : i1 to vector<1x256xi1>
    %97 = vector.broadcast %96 : vector<1x256xi1> to vector<1x256xi1>
    %98 = arith.xori %94, %97 : vector<1x256xi1>
    %99 = arith.andi %98, %92 : vector<1x256xi1>
    %100 = vector.broadcast %88 : i32 to vector<1x256xi32>
    %101 = arith.addi %90, %100 : vector<1x256xi32>
    %102 = arith.select %99, %101, %90 : vector<1x256xi1>, vector<1x256xi32>
    %c32_i32 = arith.constant 32 : i32
    %103 = vector.broadcast %c32_i32 : i32 to vector<1x256xi32>
    %104 = arith.cmpi slt, %102, %103 : vector<1x256xi32>
    %c0_44 = arith.constant 0 : index
    %c0_45 = arith.constant 0 : index
    %c0_46 = arith.constant 0 : index
    %105 = vector.load %arg2[%c0_44, %c0_45, %c0_46] : memref<2x2x64xi32, #tpu.memory_space<vmem>>, vector<2x2x64xi32>
    %106 = vector.extract_strided_slice %105 {offsets = [0, 0, 0], sizes = [2, 1, 64], strides = [1, 1, 1]} : vector<2x2x64xi32> to vector<2x1x64xi32>
    %107 = vector.shape_cast %106 : vector<2x1x64xi32> to vector<2x64xi32>
    %108 = vector.extract_strided_slice %105 {offsets = [0, 1, 0], sizes = [2, 1, 64], strides = [1, 1, 1]} : vector<2x2x64xi32> to vector<2x1x64xi32>
    %109 = vector.shape_cast %108 : vector<2x1x64xi32> to vector<2x64xi32>
    %c0_47 = arith.constant 0 : index
    %c0_48 = arith.constant 0 : index
    %110 = vector.load %arg11[%c0_47, %c0_48] : memref<64x256xbf16, #tpu.memory_space<vmem>>, vector<64x256xbf16>
    %cst_49 = arith.constant 0.000000e+00 : f32
    %111 = vector.broadcast %cst_49 : f32 to vector<2x64xf32>
    %c0_50 = arith.constant 0 : index
    %c0_51 = arith.constant 0 : index
    %c0_52 = arith.constant 0 : index
    %112 = vector.load %arg20[%c0_50, %c0_51, %c0_52] : memref<2x8x256xf32, #tpu.memory_space<vmem>>, vector<2x1x256xf32>
    %113 = vector.shape_cast %112 : vector<2x1x256xf32> to vector<2x256xf32>
    %c0_53 = arith.constant 0 : index
    %c7 = arith.constant 7 : index
    %c0_54 = arith.constant 0 : index
    %114 = vector.load %arg20[%c0_53, %c7, %c0_54] : memref<2x8x256xf32, #tpu.memory_space<vmem>>, vector<2x1x256xf32>
    %115 = vector.shape_cast %114 : vector<2x1x256xf32> to vector<2x256xf32>
    %116 = vector.shape_cast %104 : vector<1x256xi1> to vector<1x256xi1>
    %117 = vector.broadcast %116 : vector<1x256xi1> to vector<2x256xi1>
    %118 = arith.select %117, %113, %115 : vector<2x256xi1>, vector<2x256xf32>
    %119 = arith.truncf %111 : vector<2x64xf32> to vector<2x64xbf16>
    %cst_55 = arith.constant dense<0.000000e+00> : vector<2x256xf32>
    %120 = tpu.matmul %119, %110, %cst_55 {dimension_numbers = #tpu.dot_dimension_numbers<[1], [0], [0], [1], [0, 0, 1, 1], [], []>} : vector<2x64xbf16>, vector<64x256xbf16>, vector<2x256xf32> -> vector<2x256xf32>
    %121 = arith.addf %118, %120 : vector<2x256xf32>
    %122 = vector.extract_strided_slice %121 {offsets = [0, 0], sizes = [2, 64], strides = [1, 1]} : vector<2x256xf32> to vector<2x64xf32>
    %123 = arith.negf %122 : vector<2x64xf32>
    %124 = math.exp %123 : vector<2x64xf32>
    %cst_56 = arith.constant 1.000000e+00 : f32
    %125 = vector.broadcast %cst_56 : f32 to vector<2x64xf32>
    %126 = arith.addf %125, %124 : vector<2x64xf32>
    %127 = arith.divf %125, %126 : vector<2x64xf32>
    %128 = vector.extract_strided_slice %121 {offsets = [0, 64], sizes = [2, 64], strides = [1, 1]} : vector<2x256xf32> to vector<2x64xf32>
    %129 = arith.negf %128 : vector<2x64xf32>
    %130 = math.exp %129 : vector<2x64xf32>
    %cst_57 = arith.constant 1.000000e+00 : f32
    %131 = vector.broadcast %cst_57 : f32 to vector<2x64xf32>
    %132 = arith.addf %131, %130 : vector<2x64xf32>
    %133 = arith.divf %131, %132 : vector<2x64xf32>
    %134 = vector.extract_strided_slice %121 {offsets = [0, 128], sizes = [2, 64], strides = [1, 1]} : vector<2x256xf32> to vector<2x64xf32>
    %135 = math.tanh %134 : vector<2x64xf32>
    %136 = vector.extract_strided_slice %121 {offsets = [0, 192], sizes = [2, 64], strides = [1, 1]} : vector<2x256xf32> to vector<2x64xf32>
    %137 = arith.negf %136 : vector<2x64xf32>
    %138 = math.exp %137 : vector<2x64xf32>
    %cst_58 = arith.constant 1.000000e+00 : f32
    %139 = vector.broadcast %cst_58 : f32 to vector<2x64xf32>
    %140 = arith.addf %139, %138 : vector<2x64xf32>
    %141 = arith.divf %139, %140 : vector<2x64xf32>
    %142 = arith.mulf %133, %111 : vector<2x64xf32>
    %143 = arith.mulf %127, %135 : vector<2x64xf32>
    %144 = arith.addf %142, %143 : vector<2x64xf32>
    %145 = math.tanh %144 : vector<2x64xf32>
    %146 = arith.mulf %141, %145 : vector<2x64xf32>
    %c0_i32_59 = arith.constant 0 : i32
    %147 = vector.broadcast %c0_i32_59 : i32 to vector<2x64xi32>
    %148 = arith.cmpi sle, %107, %147 : vector<2x64xi32>
    %c0_i32_60 = arith.constant 0 : i32
    %149 = vector.broadcast %c0_i32_60 : i32 to vector<2x64xi32>
    %150 = arith.cmpi sgt, %109, %149 : vector<2x64xi32>
    %151 = arith.andi %148, %150 : vector<2x64xi1>
    %cst_61 = arith.constant 0.000000e+00 : f32
    %152 = vector.broadcast %cst_61 : f32 to vector<2x64xf32>
    %153 = arith.select %151, %144, %152 : vector<2x64xi1>, vector<2x64xf32>
    %cst_62 = arith.constant 0.000000e+00 : f32
    %154 = vector.broadcast %cst_62 : f32 to vector<2x64xf32>
    %155 = arith.select %151, %146, %154 : vector<2x64xi1>, vector<2x64xf32>
    %156 = vector.extract_strided_slice %155 {offsets = [0, 0], sizes = [2, 32], strides = [1, 1]} : vector<2x64xf32> to vector<2x32xf32>
    %c0_63 = arith.constant 0 : index
    %c0_64 = arith.constant 0 : index
    %c0_65 = arith.constant 0 : index
    %157 = vector.load %arg21[%c0_63, %c0_64, %c0_65] : memref<2x8x64xf32, #tpu.memory_space<vmem>>, vector<2x1x32xf32>
    %158 = vector.shape_cast %157 : vector<2x1x32xf32> to vector<2x32xf32>
    %159 = vector.shape_cast %156 : vector<2x32xf32> to vector<2x1x32xf32>
    tpu.vector_store %arg21[%c0_63, %c0_64, %c0_65], %159 {strides = array<i32>} : memref<2x8x64xf32, #tpu.memory_space<vmem>>, vector<2x1x32xf32>,
    %160 = vector.extract_strided_slice %155 {offsets = [0, 32], sizes = [2, 32], strides = [1, 1]} : vector<2x64xf32> to vector<2x32xf32>
    %c0_66 = arith.constant 0 : index
    %c7_67 = arith.constant 7 : index
    %c32 = arith.constant 32 : index
    %161 = vector.load %arg21[%c0_66, %c7_67, %c32] : memref<2x8x64xf32, #tpu.memory_space<vmem>>, vector<2x1x32xf32>
    %162 = vector.shape_cast %161 : vector<2x1x32xf32> to vector<2x32xf32>
    %163 = vector.shape_cast %160 : vector<2x32xf32> to vector<2x1x32xf32>
    tpu.vector_store %arg21[%c0_66, %c7_67, %c32], %163 {strides = array<i32>} : memref<2x8x64xf32, #tpu.memory_space<vmem>>, vector<2x1x32xf32>,
    %c0_68 = arith.constant 0 : index
    %c1 = arith.constant 1 : index
    %c0_69 = arith.constant 0 : index
    %164 = vector.load %arg20[%c0_68, %c1, %c0_69] : memref<2x8x256xf32, #tpu.memory_space<vmem>>, vector<2x1x256xf32>
    %165 = vector.shape_cast %164 : vector<2x1x256xf32> to vector<2x256xf32>
    %c0_70 = arith.constant 0 : index
    %c6 = arith.constant 6 : index
    %c0_71 = arith.constant 0 : index
    %166 = vector.load %arg20[%c0_70, %c6, %c0_71] : memref<2x8x256xf32, #tpu.memory_space<vmem>>, vector<2x1x256xf32>
    %167 = vector.shape_cast %166 : vector<2x1x256xf32> to vector<2x256xf32>
    %168 = vector.shape_cast %104 : vector<1x256xi1> to vector<1x256xi1>
    %169 = vector.broadcast %168 : vector<1x256xi1> to vector<2x256xi1>
    %170 = arith.select %169, %165, %167 : vector<2x256xi1>, vector<2x256xf32>
    %171 = arith.truncf %155 : vector<2x64xf32> to vector<2x64xbf16>
    %cst_72 = arith.constant dense<0.000000e+00> : vector<2x256xf32>
    %172 = tpu.matmul %171, %110, %cst_72 {dimension_numbers = #tpu.dot_dimension_numbers<[1], [0], [0], [1], [0, 0, 1, 1], [], []>} : vector<2x64xbf16>, vector<64x256xbf16>, vector<2x256xf32> -> vector<2x256xf32>
    %173 = arith.addf %170, %172 : vector<2x256xf32>
    %174 = vector.extract_strided_slice %173 {offsets = [0, 0], sizes = [2, 64], strides = [1, 1]} : vector<2x256xf32> to vector<2x64xf32>
    %175 = arith.negf %174 : vector<2x64xf32>
    %176 = math.exp %175 : vector<2x64xf32>
    %cst_73 = arith.constant 1.000000e+00 : f32
    %177 = vector.broadcast %cst_73 : f32 to vector<2x64xf32>
    %178 = arith.addf %177, %176 : vector<2x64xf32>
    %179 = arith.divf %177, %178 : vector<2x64xf32>
    %180 = vector.extract_strided_slice %173 {offsets = [0, 64], sizes = [2, 64], strides = [1, 1]} : vector<2x256xf32> to vector<2x64xf32>
    %181 = arith.negf %180 : vector<2x64xf32>
    %182 = math.exp %181 : vector<2x64xf32>
    %cst_74 = arith.constant 1.000000e+00 : f32
    %183 = vector.broadcast %cst_74 : f32 to vector<2x64xf32>
    %184 = arith.addf %183, %182 : vector<2x64xf32>
    %185 = arith.divf %183, %184 : vector<2x64xf32>
    %186 = vector.extract_strided_slice %173 {offsets = [0, 128], sizes = [2, 64], strides = [1, 1]} : vector<2x256xf32> to vector<2x64xf32>
    %187 = math.tanh %186 : vector<2x64xf32>
    %188 = vector.extract_strided_slice %173 {offsets = [0, 192], sizes = [2, 64], strides = [1, 1]} : vector<2x256xf32> to vector<2x64xf32>
    %189 = arith.negf %188 : vector<2x64xf32>
    %190 = math.exp %189 : vector<2x64xf32>
    %cst_75 = arith.constant 1.000000e+00 : f32
    %191 = vector.broadcast %cst_75 : f32 to vector<2x64xf32>
    %192 = arith.addf %191, %190 : vector<2x64xf32>
    %193 = arith.divf %191, %192 : vector<2x64xf32>
    %194 = arith.mulf %185, %153 : vector<2x64xf32>
    %195 = arith.mulf %179, %187 : vector<2x64xf32>
    %196 = arith.addf %194, %195 : vector<2x64xf32>
    %197 = math.tanh %196 : vector<2x64xf32>
    %198 = arith.mulf %193, %197 : vector<2x64xf32>
    %c1_i32_76 = arith.constant 1 : i32
    %199 = vector.broadcast %c1_i32_76 : i32 to vector<2x64xi32>
    %200 = arith.cmpi sle, %107, %199 : vector<2x64xi32>
    %c1_i32_77 = arith.constant 1 : i32
    %201 = vector.broadcast %c1_i32_77 : i32 to vector<2x64xi32>
    %202 = arith.cmpi sgt, %109, %201 : vector<2x64xi32>
    %203 = arith.andi %200, %202 : vector<2x64xi1>
    %cst_78 = arith.constant 0.000000e+00 : f32
    %204 = vector.broadcast %cst_78 : f32 to vector<2x64xf32>
    %205 = arith.select %203, %196, %204 : vector<2x64xi1>, vector<2x64xf32>
    %cst_79 = arith.constant 0.000000e+00 : f32
    %206 = vector.broadcast %cst_79 : f32 to vector<2x64xf32>
    %207 = arith.select %203, %198, %206 : vector<2x64xi1>, vector<2x64xf32>
    %208 = vector.extract_strided_slice %207 {offsets = [0, 0], sizes = [2, 32], strides = [1, 1]} : vector<2x64xf32> to vector<2x32xf32>
    %c0_80 = arith.constant 0 : index
    %c1_81 = arith.constant 1 : index
    %c0_82 = arith.constant 0 : index
    %209 = vector.load %arg21[%c0_80, %c1_81, %c0_82] : memref<2x8x64xf32, #tpu.memory_space<vmem>>, vector<2x1x32xf32>
    %210 = vector.shape_cast %209 : vector<2x1x32xf32> to vector<2x32xf32>
    %211 = vector.shape_cast %208 : vector<2x32xf32> to vector<2x1x32xf32>
    tpu.vector_store %arg21[%c0_80, %c1_81, %c0_82], %211 {strides = array<i32>} : memref<2x8x64xf32, #tpu.memory_space<vmem>>, vector<2x1x32xf32>,
    %212 = vector.extract_strided_slice %207 {offsets = [0, 32], sizes = [2, 32], strides = [1, 1]} : vector<2x64xf32> to vector<2x32xf32>
    %c0_83 = arith.constant 0 : index
    %c6_84 = arith.constant 6 : index
    %c32_85 = arith.constant 32 : index
    %213 = vector.load %arg21[%c0_83, %c6_84, %c32_85] : memref<2x8x64xf32, #tpu.memory_space<vmem>>, vector<2x1x32xf32>
    %214 = vector.shape_cast %213 : vector<2x1x32xf32> to vector<2x32xf32>
    %215 = vector.shape_cast %212 : vector<2x32xf32> to vector<2x1x32xf32>
    tpu.vector_store %arg21[%c0_83, %c6_84, %c32_85], %215 {strides = array<i32>} : memref<2x8x64xf32, #tpu.memory_space<vmem>>, vector<2x1x32xf32>,
    %c0_86 = arith.constant 0 : index
    %c2 = arith.constant 2 : index
    %c0_87 = arith.constant 0 : index
    %216 = vector.load %arg20[%c0_86, %c2, %c0_87] : memref<2x8x256xf32, #tpu.memory_space<vmem>>, vector<2x1x256xf32>
    %217 = vector.shape_cast %216 : vector<2x1x256xf32> to vector<2x256xf32>
    %c0_88 = arith.constant 0 : index
    %c5 = arith.constant 5 : index
    %c0_89 = arith.constant 0 : index
    %218 = vector.load %arg20[%c0_88, %c5, %c0_89] : memref<2x8x256xf32, #tpu.memory_space<vmem>>, vector<2x1x256xf32>
    %219 = vector.shape_cast %218 : vector<2x1x256xf32> to vector<2x256xf32>
    %220 = vector.shape_cast %104 : vector<1x256xi1> to vector<1x256xi1>
    %221 = vector.broadcast %220 : vector<1x256xi1> to vector<2x256xi1>
    %222 = arith.select %221, %217, %219 : vector<2x256xi1>, vector<2x256xf32>
    %223 = arith.truncf %207 : vector<2x64xf32> to vector<2x64xbf16>
    %cst_90 = arith.constant dense<0.000000e+00> : vector<2x256xf32>
    %224 = tpu.matmul %223, %110, %cst_90 {dimension_numbers = #tpu.dot_dimension_numbers<[1], [0], [0], [1], [0, 0, 1, 1], [], []>} : vector<2x64xbf16>, vector<64x256xbf16>, vector<2x256xf32> -> vector<2x256xf32>
    %225 = arith.addf %222, %224 : vector<2x256xf32>
    %226 = vector.extract_strided_slice %225 {offsets = [0, 0], sizes = [2, 64], strides = [1, 1]} : vector<2x256xf32> to vector<2x64xf32>
    %227 = arith.negf %226 : vector<2x64xf32>
    %228 = math.exp %227 : vector<2x64xf32>
    %cst_91 = arith.constant 1.000000e+00 : f32
    %229 = vector.broadcast %cst_91 : f32 to vector<2x64xf32>
    %230 = arith.addf %229, %228 : vector<2x64xf32>
    %231 = arith.divf %229, %230 : vector<2x64xf32>
    %232 = vector.extract_strided_slice %225 {offsets = [0, 64], sizes = [2, 64], strides = [1, 1]} : vector<2x256xf32> to vector<2x64xf32>
    %233 = arith.negf %232 : vector<2x64xf32>
    %234 = math.exp %233 : vector<2x64xf32>
    %cst_92 = arith.constant 1.000000e+00 : f32
    %235 = vector.broadcast %cst_92 : f32 to vector<2x64xf32>
    %236 = arith.addf %235, %234 : vector<2x64xf32>
    %237 = arith.divf %235, %236 : vector<2x64xf32>
    %238 = vector.extract_strided_slice %225 {offsets = [0, 128], sizes = [2, 64], strides = [1, 1]} : vector<2x256xf32> to vector<2x64xf32>
    %239 = math.tanh %238 : vector<2x64xf32>
    %240 = vector.extract_strided_slice %225 {offsets = [0, 192], sizes = [2, 64], strides = [1, 1]} : vector<2x256xf32> to vector<2x64xf32>
    %241 = arith.negf %240 : vector<2x64xf32>
    %242 = math.exp %241 : vector<2x64xf32>
    %cst_93 = arith.constant 1.000000e+00 : f32
    %243 = vector.broadcast %cst_93 : f32 to vector<2x64xf32>
    %244 = arith.addf %243, %242 : vector<2x64xf32>
    %245 = arith.divf %243, %244 : vector<2x64xf32>
    %246 = arith.mulf %237, %205 : vector<2x64xf32>
    %247 = arith.mulf %231, %239 : vector<2x64xf32>
    %248 = arith.addf %246, %247 : vector<2x64xf32>
    %249 = math.tanh %248 : vector<2x64xf32>
    %250 = arith.mulf %245, %249 : vector<2x64xf32>
    %c2_i32 = arith.constant 2 : i32
    %251 = vector.broadcast %c2_i32 : i32 to vector<2x64xi32>
    %252 = arith.cmpi sle, %107, %251 : vector<2x64xi32>
    %c2_i32_94 = arith.constant 2 : i32
    %253 = vector.broadcast %c2_i32_94 : i32 to vector<2x64xi32>
    %254 = arith.cmpi sgt, %109, %253 : vector<2x64xi32>
    %255 = arith.andi %252, %254 : vector<2x64xi1>
    %cst_95 = arith.constant 0.000000e+00 : f32
    %256 = vector.broadcast %cst_95 : f32 to vector<2x64xf32>
    %257 = arith.select %255, %248, %256 : vector<2x64xi1>, vector<2x64xf32>
    %cst_96 = arith.constant 0.000000e+00 : f32
    %258 = vector.broadcast %cst_96 : f32 to vector<2x64xf32>
    %259 = arith.select %255, %250, %258 : vector<2x64xi1>, vector<2x64xf32>
    %260 = vector.extract_strided_slice %259 {offsets = [0, 0], sizes = [2, 32], strides = [1, 1]} : vector<2x64xf32> to vector<2x32xf32>
    %c0_97 = arith.constant 0 : index
    %c2_98 = arith.constant 2 : index
    %c0_99 = arith.constant 0 : index
    %261 = vector.load %arg21[%c0_97, %c2_98, %c0_99] : memref<2x8x64xf32, #tpu.memory_space<vmem>>, vector<2x1x32xf32>
    %262 = vector.shape_cast %261 : vector<2x1x32xf32> to vector<2x32xf32>
    %263 = vector.shape_cast %260 : vector<2x32xf32> to vector<2x1x32xf32>
    tpu.vector_store %arg21[%c0_97, %c2_98, %c0_99], %263 {strides = array<i32>} : memref<2x8x64xf32, #tpu.memory_space<vmem>>, vector<2x1x32xf32>,
    %264 = vector.extract_strided_slice %259 {offsets = [0, 32], sizes = [2, 32], strides = [1, 1]} : vector<2x64xf32> to vector<2x32xf32>
    %c0_100 = arith.constant 0 : index
    %c5_101 = arith.constant 5 : index
    %c32_102 = arith.constant 32 : index
    %265 = vector.load %arg21[%c0_100, %c5_101, %c32_102] : memref<2x8x64xf32, #tpu.memory_space<vmem>>, vector<2x1x32xf32>
    %266 = vector.shape_cast %265 : vector<2x1x32xf32> to vector<2x32xf32>
    %267 = vector.shape_cast %264 : vector<2x32xf32> to vector<2x1x32xf32>
    tpu.vector_store %arg21[%c0_100, %c5_101, %c32_102], %267 {strides = array<i32>} : memref<2x8x64xf32, #tpu.memory_space<vmem>>, vector<2x1x32xf32>,
    %c0_103 = arith.constant 0 : index
    %c3 = arith.constant 3 : index
    %c0_104 = arith.constant 0 : index
    %268 = vector.load %arg20[%c0_103, %c3, %c0_104] : memref<2x8x256xf32, #tpu.memory_space<vmem>>, vector<2x1x256xf32>
    %269 = vector.shape_cast %268 : vector<2x1x256xf32> to vector<2x256xf32>
    %c0_105 = arith.constant 0 : index
    %c4 = arith.constant 4 : index
    %c0_106 = arith.constant 0 : index
    %270 = vector.load %arg20[%c0_105, %c4, %c0_106] : memref<2x8x256xf32, #tpu.memory_space<vmem>>, vector<2x1x256xf32>
    %271 = vector.shape_cast %270 : vector<2x1x256xf32> to vector<2x256xf32>
    %272 = vector.shape_cast %104 : vector<1x256xi1> to vector<1x256xi1>
    %273 = vector.broadcast %272 : vector<1x256xi1> to vector<2x256xi1>
    %274 = arith.select %273, %269, %271 : vector<2x256xi1>, vector<2x256xf32>
    %275 = arith.truncf %259 : vector<2x64xf32> to vector<2x64xbf16>
    %cst_107 = arith.constant dense<0.000000e+00> : vector<2x256xf32>
    %276 = tpu.matmul %275, %110, %cst_107 {dimension_numbers = #tpu.dot_dimension_numbers<[1], [0], [0], [1], [0, 0, 1, 1], [], []>} : vector<2x64xbf16>, vector<64x256xbf16>, vector<2x256xf32> -> vector<2x256xf32>
    %277 = arith.addf %274, %276 : vector<2x256xf32>
    %278 = vector.extract_strided_slice %277 {offsets = [0, 0], sizes = [2, 64], strides = [1, 1]} : vector<2x256xf32> to vector<2x64xf32>
    %279 = arith.negf %278 : vector<2x64xf32>
    %280 = math.exp %279 : vector<2x64xf32>
    %cst_108 = arith.constant 1.000000e+00 : f32
    %281 = vector.broadcast %cst_108 : f32 to vector<2x64xf32>
    %282 = arith.addf %281, %280 : vector<2x64xf32>
    %283 = arith.divf %281, %282 : vector<2x64xf32>
    %284 = vector.extract_strided_slice %277 {offsets = [0, 64], sizes = [2, 64], strides = [1, 1]} : vector<2x256xf32> to vector<2x64xf32>
    %285 = arith.negf %284 : vector<2x64xf32>
    %286 = math.exp %285 : vector<2x64xf32>
    %cst_109 = arith.constant 1.000000e+00 : f32
    %287 = vector.broadcast %cst_109 : f32 to vector<2x64xf32>
    %288 = arith.addf %287, %286 : vector<2x64xf32>
    %289 = arith.divf %287, %288 : vector<2x64xf32>
    %290 = vector.extract_strided_slice %277 {offsets = [0, 128], sizes = [2, 64], strides = [1, 1]} : vector<2x256xf32> to vector<2x64xf32>
    %291 = math.tanh %290 : vector<2x64xf32>
    %292 = vector.extract_strided_slice %277 {offsets = [0, 192], sizes = [2, 64], strides = [1, 1]} : vector<2x256xf32> to vector<2x64xf32>
    %293 = arith.negf %292 : vector<2x64xf32>
    %294 = math.exp %293 : vector<2x64xf32>
    %cst_110 = arith.constant 1.000000e+00 : f32
    %295 = vector.broadcast %cst_110 : f32 to vector<2x64xf32>
    %296 = arith.addf %295, %294 : vector<2x64xf32>
    %297 = arith.divf %295, %296 : vector<2x64xf32>
    %298 = arith.mulf %289, %257 : vector<2x64xf32>
    %299 = arith.mulf %283, %291 : vector<2x64xf32>
    %300 = arith.addf %298, %299 : vector<2x64xf32>
    %301 = math.tanh %300 : vector<2x64xf32>
    %302 = arith.mulf %297, %301 : vector<2x64xf32>
    %c3_i32 = arith.constant 3 : i32
    %303 = vector.broadcast %c3_i32 : i32 to vector<2x64xi32>
    %304 = arith.cmpi sle, %107, %303 : vector<2x64xi32>
    %c3_i32_111 = arith.constant 3 : i32
    %305 = vector.broadcast %c3_i32_111 : i32 to vector<2x64xi32>
    %306 = arith.cmpi sgt, %109, %305 : vector<2x64xi32>
    %307 = arith.andi %304, %306 : vector<2x64xi1>
    %cst_112 = arith.constant 0.000000e+00 : f32
    %308 = vector.broadcast %cst_112 : f32 to vector<2x64xf32>
    %309 = arith.select %307, %300, %308 : vector<2x64xi1>, vector<2x64xf32>
    %cst_113 = arith.constant 0.000000e+00 : f32
    %310 = vector.broadcast %cst_113 : f32 to vector<2x64xf32>
    %311 = arith.select %307, %302, %310 : vector<2x64xi1>, vector<2x64xf32>
    %312 = vector.extract_strided_slice %311 {offsets = [0, 0], sizes = [2, 32], strides = [1, 1]} : vector<2x64xf32> to vector<2x32xf32>
    %c0_114 = arith.constant 0 : index
    %c3_115 = arith.constant 3 : index
    %c0_116 = arith.constant 0 : index
    %313 = vector.load %arg21[%c0_114, %c3_115, %c0_116] : memref<2x8x64xf32, #tpu.memory_space<vmem>>, vector<2x1x32xf32>
    %314 = vector.shape_cast %313 : vector<2x1x32xf32> to vector<2x32xf32>
    %315 = vector.shape_cast %312 : vector<2x32xf32> to vector<2x1x32xf32>
    tpu.vector_store %arg21[%c0_114, %c3_115, %c0_116], %315 {strides = array<i32>} : memref<2x8x64xf32, #tpu.memory_space<vmem>>, vector<2x1x32xf32>,
    %316 = vector.extract_strided_slice %311 {offsets = [0, 32], sizes = [2, 32], strides = [1, 1]} : vector<2x64xf32> to vector<2x32xf32>
    %c0_117 = arith.constant 0 : index
    %c4_118 = arith.constant 4 : index
    %c32_119 = arith.constant 32 : index
    %317 = vector.load %arg21[%c0_117, %c4_118, %c32_119] : memref<2x8x64xf32, #tpu.memory_space<vmem>>, vector<2x1x32xf32>
    %318 = vector.shape_cast %317 : vector<2x1x32xf32> to vector<2x32xf32>
    %319 = vector.shape_cast %316 : vector<2x32xf32> to vector<2x1x32xf32>
    tpu.vector_store %arg21[%c0_117, %c4_118, %c32_119], %319 {strides = array<i32>} : memref<2x8x64xf32, #tpu.memory_space<vmem>>, vector<2x1x32xf32>,
    %c0_120 = arith.constant 0 : index
    %c4_121 = arith.constant 4 : index
    %c0_122 = arith.constant 0 : index
    %320 = vector.load %arg20[%c0_120, %c4_121, %c0_122] : memref<2x8x256xf32, #tpu.memory_space<vmem>>, vector<2x1x256xf32>
    %321 = vector.shape_cast %320 : vector<2x1x256xf32> to vector<2x256xf32>
    %c0_123 = arith.constant 0 : index
    %c3_124 = arith.constant 3 : index
    %c0_125 = arith.constant 0 : index
    %322 = vector.load %arg20[%c0_123, %c3_124, %c0_125] : memref<2x8x256xf32, #tpu.memory_space<vmem>>, vector<2x1x256xf32>
    %323 = vector.shape_cast %322 : vector<2x1x256xf32> to vector<2x256xf32>
    %324 = vector.shape_cast %104 : vector<1x256xi1> to vector<1x256xi1>
    %325 = vector.broadcast %324 : vector<1x256xi1> to vector<2x256xi1>
    %326 = arith.select %325, %321, %323 : vector<2x256xi1>, vector<2x256xf32>
    %327 = arith.truncf %311 : vector<2x64xf32> to vector<2x64xbf16>
    %cst_126 = arith.constant dense<0.000000e+00> : vector<2x256xf32>
    %328 = tpu.matmul %327, %110, %cst_126 {dimension_numbers = #tpu.dot_dimension_numbers<[1], [0], [0], [1], [0, 0, 1, 1], [], []>} : vector<2x64xbf16>, vector<64x256xbf16>, vector<2x256xf32> -> vector<2x256xf32>
    %329 = arith.addf %326, %328 : vector<2x256xf32>
    %330 = vector.extract_strided_slice %329 {offsets = [0, 0], sizes = [2, 64], strides = [1, 1]} : vector<2x256xf32> to vector<2x64xf32>
    %331 = arith.negf %330 : vector<2x64xf32>
    %332 = math.exp %331 : vector<2x64xf32>
    %cst_127 = arith.constant 1.000000e+00 : f32
    %333 = vector.broadcast %cst_127 : f32 to vector<2x64xf32>
    %334 = arith.addf %333, %332 : vector<2x64xf32>
    %335 = arith.divf %333, %334 : vector<2x64xf32>
    %336 = vector.extract_strided_slice %329 {offsets = [0, 64], sizes = [2, 64], strides = [1, 1]} : vector<2x256xf32> to vector<2x64xf32>
    %337 = arith.negf %336 : vector<2x64xf32>
    %338 = math.exp %337 : vector<2x64xf32>
    %cst_128 = arith.constant 1.000000e+00 : f32
    %339 = vector.broadcast %cst_128 : f32 to vector<2x64xf32>
    %340 = arith.addf %339, %338 : vector<2x64xf32>
    %341 = arith.divf %339, %340 : vector<2x64xf32>
    %342 = vector.extract_strided_slice %329 {offsets = [0, 128], sizes = [2, 64], strides = [1, 1]} : vector<2x256xf32> to vector<2x64xf32>
    %343 = math.tanh %342 : vector<2x64xf32>
    %344 = vector.extract_strided_slice %329 {offsets = [0, 192], sizes = [2, 64], strides = [1, 1]} : vector<2x256xf32> to vector<2x64xf32>
    %345 = arith.negf %344 : vector<2x64xf32>
    %346 = math.exp %345 : vector<2x64xf32>
    %cst_129 = arith.constant 1.000000e+00 : f32
    %347 = vector.broadcast %cst_129 : f32 to vector<2x64xf32>
    %348 = arith.addf %347, %346 : vector<2x64xf32>
    %349 = arith.divf %347, %348 : vector<2x64xf32>
    %350 = arith.mulf %341, %309 : vector<2x64xf32>
    %351 = arith.mulf %335, %343 : vector<2x64xf32>
    %352 = arith.addf %350, %351 : vector<2x64xf32>
    %353 = math.tanh %352 : vector<2x64xf32>
    %354 = arith.mulf %349, %353 : vector<2x64xf32>
    %c4_i32 = arith.constant 4 : i32
    %355 = vector.broadcast %c4_i32 : i32 to vector<2x64xi32>
    %356 = arith.cmpi sle, %107, %355 : vector<2x64xi32>
    %c4_i32_130 = arith.constant 4 : i32
    %357 = vector.broadcast %c4_i32_130 : i32 to vector<2x64xi32>
    %358 = arith.cmpi sgt, %109, %357 : vector<2x64xi32>
    %359 = arith.andi %356, %358 : vector<2x64xi1>
    %cst_131 = arith.constant 0.000000e+00 : f32
    %360 = vector.broadcast %cst_131 : f32 to vector<2x64xf32>
    %361 = arith.select %359, %352, %360 : vector<2x64xi1>, vector<2x64xf32>
    %cst_132 = arith.constant 0.000000e+00 : f32
    %362 = vector.broadcast %cst_132 : f32 to vector<2x64xf32>
    %363 = arith.select %359, %354, %362 : vector<2x64xi1>, vector<2x64xf32>
    %364 = vector.extract_strided_slice %363 {offsets = [0, 0], sizes = [2, 32], strides = [1, 1]} : vector<2x64xf32> to vector<2x32xf32>
    %c0_133 = arith.constant 0 : index
    %c4_134 = arith.constant 4 : index
    %c0_135 = arith.constant 0 : index
    %365 = vector.load %arg21[%c0_133, %c4_134, %c0_135] : memref<2x8x64xf32, #tpu.memory_space<vmem>>, vector<2x1x32xf32>
    %366 = vector.shape_cast %365 : vector<2x1x32xf32> to vector<2x32xf32>
    %367 = vector.shape_cast %364 : vector<2x32xf32> to vector<2x1x32xf32>
    tpu.vector_store %arg21[%c0_133, %c4_134, %c0_135], %367 {strides = array<i32>} : memref<2x8x64xf32, #tpu.memory_space<vmem>>, vector<2x1x32xf32>,
    %368 = vector.extract_strided_slice %363 {offsets = [0, 32], sizes = [2, 32], strides = [1, 1]} : vector<2x64xf32> to vector<2x32xf32>
    %c0_136 = arith.constant 0 : index
    %c3_137 = arith.constant 3 : index
    %c32_138 = arith.constant 32 : index
    %369 = vector.load %arg21[%c0_136, %c3_137, %c32_138] : memref<2x8x64xf32, #tpu.memory_space<vmem>>, vector<2x1x32xf32>
    %370 = vector.shape_cast %369 : vector<2x1x32xf32> to vector<2x32xf32>
    %371 = vector.shape_cast %368 : vector<2x32xf32> to vector<2x1x32xf32>
    tpu.vector_store %arg21[%c0_136, %c3_137, %c32_138], %371 {strides = array<i32>} : memref<2x8x64xf32, #tpu.memory_space<vmem>>, vector<2x1x32xf32>,
    %c0_139 = arith.constant 0 : index
    %c5_140 = arith.constant 5 : index
    %c0_141 = arith.constant 0 : index
    %372 = vector.load %arg20[%c0_139, %c5_140, %c0_141] : memref<2x8x256xf32, #tpu.memory_space<vmem>>, vector<2x1x256xf32>
    %373 = vector.shape_cast %372 : vector<2x1x256xf32> to vector<2x256xf32>
    %c0_142 = arith.constant 0 : index
    %c2_143 = arith.constant 2 : index
    %c0_144 = arith.constant 0 : index
    %374 = vector.load %arg20[%c0_142, %c2_143, %c0_144] : memref<2x8x256xf32, #tpu.memory_space<vmem>>, vector<2x1x256xf32>
    %375 = vector.shape_cast %374 : vector<2x1x256xf32> to vector<2x256xf32>
    %376 = vector.shape_cast %104 : vector<1x256xi1> to vector<1x256xi1>
    %377 = vector.broadcast %376 : vector<1x256xi1> to vector<2x256xi1>
    %378 = arith.select %377, %373, %375 : vector<2x256xi1>, vector<2x256xf32>
    %379 = arith.truncf %363 : vector<2x64xf32> to vector<2x64xbf16>
    %cst_145 = arith.constant dense<0.000000e+00> : vector<2x256xf32>
    %380 = tpu.matmul %379, %110, %cst_145 {dimension_numbers = #tpu.dot_dimension_numbers<[1], [0], [0], [1], [0, 0, 1, 1], [], []>} : vector<2x64xbf16>, vector<64x256xbf16>, vector<2x256xf32> -> vector<2x256xf32>
    %381 = arith.addf %378, %380 : vector<2x256xf32>
    %382 = vector.extract_strided_slice %381 {offsets = [0, 0], sizes = [2, 64], strides = [1, 1]} : vector<2x256xf32> to vector<2x64xf32>
    %383 = arith.negf %382 : vector<2x64xf32>
    %384 = math.exp %383 : vector<2x64xf32>
    %cst_146 = arith.constant 1.000000e+00 : f32
    %385 = vector.broadcast %cst_146 : f32 to vector<2x64xf32>
    %386 = arith.addf %385, %384 : vector<2x64xf32>
    %387 = arith.divf %385, %386 : vector<2x64xf32>
    %388 = vector.extract_strided_slice %381 {offsets = [0, 64], sizes = [2, 64], strides = [1, 1]} : vector<2x256xf32> to vector<2x64xf32>
    %389 = arith.negf %388 : vector<2x64xf32>
    %390 = math.exp %389 : vector<2x64xf32>
    %cst_147 = arith.constant 1.000000e+00 : f32
    %391 = vector.broadcast %cst_147 : f32 to vector<2x64xf32>
    %392 = arith.addf %391, %390 : vector<2x64xf32>
    %393 = arith.divf %391, %392 : vector<2x64xf32>
    %394 = vector.extract_strided_slice %381 {offsets = [0, 128], sizes = [2, 64], strides = [1, 1]} : vector<2x256xf32> to vector<2x64xf32>
    %395 = math.tanh %394 : vector<2x64xf32>
    %396 = vector.extract_strided_slice %381 {offsets = [0, 192], sizes = [2, 64], strides = [1, 1]} : vector<2x256xf32> to vector<2x64xf32>
    %397 = arith.negf %396 : vector<2x64xf32>
    %398 = math.exp %397 : vector<2x64xf32>
    %cst_148 = arith.constant 1.000000e+00 : f32
    %399 = vector.broadcast %cst_148 : f32 to vector<2x64xf32>
    %400 = arith.addf %399, %398 : vector<2x64xf32>
    %401 = arith.divf %399, %400 : vector<2x64xf32>
    %402 = arith.mulf %393, %361 : vector<2x64xf32>
    %403 = arith.mulf %387, %395 : vector<2x64xf32>
    %404 = arith.addf %402, %403 : vector<2x64xf32>
    %405 = math.tanh %404 : vector<2x64xf32>
    %406 = arith.mulf %401, %405 : vector<2x64xf32>
    %c5_i32 = arith.constant 5 : i32
    %407 = vector.broadcast %c5_i32 : i32 to vector<2x64xi32>
    %408 = arith.cmpi sle, %107, %407 : vector<2x64xi32>
    %c5_i32_149 = arith.constant 5 : i32
    %409 = vector.broadcast %c5_i32_149 : i32 to vector<2x64xi32>
    %410 = arith.cmpi sgt, %109, %409 : vector<2x64xi32>
    %411 = arith.andi %408, %410 : vector<2x64xi1>
    %cst_150 = arith.constant 0.000000e+00 : f32
    %412 = vector.broadcast %cst_150 : f32 to vector<2x64xf32>
    %413 = arith.select %411, %404, %412 : vector<2x64xi1>, vector<2x64xf32>
    %cst_151 = arith.constant 0.000000e+00 : f32
    %414 = vector.broadcast %cst_151 : f32 to vector<2x64xf32>
    %415 = arith.select %411, %406, %414 : vector<2x64xi1>, vector<2x64xf32>
    %416 = vector.extract_strided_slice %415 {offsets = [0, 0], sizes = [2, 32], strides = [1, 1]} : vector<2x64xf32> to vector<2x32xf32>
    %c0_152 = arith.constant 0 : index
    %c5_153 = arith.constant 5 : index
    %c0_154 = arith.constant 0 : index
    %417 = vector.load %arg21[%c0_152, %c5_153, %c0_154] : memref<2x8x64xf32, #tpu.memory_space<vmem>>, vector<2x1x32xf32>
    %418 = vector.shape_cast %417 : vector<2x1x32xf32> to vector<2x32xf32>
    %419 = vector.shape_cast %416 : vector<2x32xf32> to vector<2x1x32xf32>
    tpu.vector_store %arg21[%c0_152, %c5_153, %c0_154], %419 {strides = array<i32>} : memref<2x8x64xf32, #tpu.memory_space<vmem>>, vector<2x1x32xf32>,
    %420 = vector.extract_strided_slice %415 {offsets = [0, 32], sizes = [2, 32], strides = [1, 1]} : vector<2x64xf32> to vector<2x32xf32>
    %c0_155 = arith.constant 0 : index
    %c2_156 = arith.constant 2 : index
    %c32_157 = arith.constant 32 : index
    %421 = vector.load %arg21[%c0_155, %c2_156, %c32_157] : memref<2x8x64xf32, #tpu.memory_space<vmem>>, vector<2x1x32xf32>
    %422 = vector.shape_cast %421 : vector<2x1x32xf32> to vector<2x32xf32>
    %423 = vector.shape_cast %420 : vector<2x32xf32> to vector<2x1x32xf32>
    tpu.vector_store %arg21[%c0_155, %c2_156, %c32_157], %423 {strides = array<i32>} : memref<2x8x64xf32, #tpu.memory_space<vmem>>, vector<2x1x32xf32>,
    %c0_158 = arith.constant 0 : index
    %c6_159 = arith.constant 6 : index
    %c0_160 = arith.constant 0 : index
    %424 = vector.load %arg20[%c0_158, %c6_159, %c0_160] : memref<2x8x256xf32, #tpu.memory_space<vmem>>, vector<2x1x256xf32>
    %425 = vector.shape_cast %424 : vector<2x1x256xf32> to vector<2x256xf32>
    %c0_161 = arith.constant 0 : index
    %c1_162 = arith.constant 1 : index
    %c0_163 = arith.constant 0 : index
    %426 = vector.load %arg20[%c0_161, %c1_162, %c0_163] : memref<2x8x256xf32, #tpu.memory_space<vmem>>, vector<2x1x256xf32>
    %427 = vector.shape_cast %426 : vector<2x1x256xf32> to vector<2x256xf32>
    %428 = vector.shape_cast %104 : vector<1x256xi1> to vector<1x256xi1>
    %429 = vector.broadcast %428 : vector<1x256xi1> to vector<2x256xi1>
    %430 = arith.select %429, %425, %427 : vector<2x256xi1>, vector<2x256xf32>
    %431 = arith.truncf %415 : vector<2x64xf32> to vector<2x64xbf16>
    %cst_164 = arith.constant dense<0.000000e+00> : vector<2x256xf32>
    %432 = tpu.matmul %431, %110, %cst_164 {dimension_numbers = #tpu.dot_dimension_numbers<[1], [0], [0], [1], [0, 0, 1, 1], [], []>} : vector<2x64xbf16>, vector<64x256xbf16>, vector<2x256xf32> -> vector<2x256xf32>
    %433 = arith.addf %430, %432 : vector<2x256xf32>
    %434 = vector.extract_strided_slice %433 {offsets = [0, 0], sizes = [2, 64], strides = [1, 1]} : vector<2x256xf32> to vector<2x64xf32>
    %435 = arith.negf %434 : vector<2x64xf32>
    %436 = math.exp %435 : vector<2x64xf32>
    %cst_165 = arith.constant 1.000000e+00 : f32
    %437 = vector.broadcast %cst_165 : f32 to vector<2x64xf32>
    %438 = arith.addf %437, %436 : vector<2x64xf32>
    %439 = arith.divf %437, %438 : vector<2x64xf32>
    %440 = vector.extract_strided_slice %433 {offsets = [0, 64], sizes = [2, 64], strides = [1, 1]} : vector<2x256xf32> to vector<2x64xf32>
    %441 = arith.negf %440 : vector<2x64xf32>
    %442 = math.exp %441 : vector<2x64xf32>
    %cst_166 = arith.constant 1.000000e+00 : f32
    %443 = vector.broadcast %cst_166 : f32 to vector<2x64xf32>
    %444 = arith.addf %443, %442 : vector<2x64xf32>
    %445 = arith.divf %443, %444 : vector<2x64xf32>
    %446 = vector.extract_strided_slice %433 {offsets = [0, 128], sizes = [2, 64], strides = [1, 1]} : vector<2x256xf32> to vector<2x64xf32>
    %447 = math.tanh %446 : vector<2x64xf32>
    %448 = vector.extract_strided_slice %433 {offsets = [0, 192], sizes = [2, 64], strides = [1, 1]} : vector<2x256xf32> to vector<2x64xf32>
    %449 = arith.negf %448 : vector<2x64xf32>
    %450 = math.exp %449 : vector<2x64xf32>
    %cst_167 = arith.constant 1.000000e+00 : f32
    %451 = vector.broadcast %cst_167 : f32 to vector<2x64xf32>
    %452 = arith.addf %451, %450 : vector<2x64xf32>
    %453 = arith.divf %451, %452 : vector<2x64xf32>
    %454 = arith.mulf %445, %413 : vector<2x64xf32>
    %455 = arith.mulf %439, %447 : vector<2x64xf32>
    %456 = arith.addf %454, %455 : vector<2x64xf32>
    %457 = math.tanh %456 : vector<2x64xf32>
    %458 = arith.mulf %453, %457 : vector<2x64xf32>
    %c6_i32 = arith.constant 6 : i32
    %459 = vector.broadcast %c6_i32 : i32 to vector<2x64xi32>
    %460 = arith.cmpi sle, %107, %459 : vector<2x64xi32>
    %c6_i32_168 = arith.constant 6 : i32
    %461 = vector.broadcast %c6_i32_168 : i32 to vector<2x64xi32>
    %462 = arith.cmpi sgt, %109, %461 : vector<2x64xi32>
    %463 = arith.andi %460, %462 : vector<2x64xi1>
    %cst_169 = arith.constant 0.000000e+00 : f32
    %464 = vector.broadcast %cst_169 : f32 to vector<2x64xf32>
    %465 = arith.select %463, %456, %464 : vector<2x64xi1>, vector<2x64xf32>
    %cst_170 = arith.constant 0.000000e+00 : f32
    %466 = vector.broadcast %cst_170 : f32 to vector<2x64xf32>
    %467 = arith.select %463, %458, %466 : vector<2x64xi1>, vector<2x64xf32>
    %468 = vector.extract_strided_slice %467 {offsets = [0, 0], sizes = [2, 32], strides = [1, 1]} : vector<2x64xf32> to vector<2x32xf32>
    %c0_171 = arith.constant 0 : index
    %c6_172 = arith.constant 6 : index
    %c0_173 = arith.constant 0 : index
    %469 = vector.load %arg21[%c0_171, %c6_172, %c0_173] : memref<2x8x64xf32, #tpu.memory_space<vmem>>, vector<2x1x32xf32>
    %470 = vector.shape_cast %469 : vector<2x1x32xf32> to vector<2x32xf32>
    %471 = vector.shape_cast %468 : vector<2x32xf32> to vector<2x1x32xf32>
    tpu.vector_store %arg21[%c0_171, %c6_172, %c0_173], %471 {strides = array<i32>} : memref<2x8x64xf32, #tpu.memory_space<vmem>>, vector<2x1x32xf32>,
    %472 = vector.extract_strided_slice %467 {offsets = [0, 32], sizes = [2, 32], strides = [1, 1]} : vector<2x64xf32> to vector<2x32xf32>
    %c0_174 = arith.constant 0 : index
    %c1_175 = arith.constant 1 : index
    %c32_176 = arith.constant 32 : index
    %473 = vector.load %arg21[%c0_174, %c1_175, %c32_176] : memref<2x8x64xf32, #tpu.memory_space<vmem>>, vector<2x1x32xf32>
    %474 = vector.shape_cast %473 : vector<2x1x32xf32> to vector<2x32xf32>
    %475 = vector.shape_cast %472 : vector<2x32xf32> to vector<2x1x32xf32>
    tpu.vector_store %arg21[%c0_174, %c1_175, %c32_176], %475 {strides = array<i32>} : memref<2x8x64xf32, #tpu.memory_space<vmem>>, vector<2x1x32xf32>,
    %c0_177 = arith.constant 0 : index
    %c7_178 = arith.constant 7 : index
    %c0_179 = arith.constant 0 : index
    %476 = vector.load %arg20[%c0_177, %c7_178, %c0_179] : memref<2x8x256xf32, #tpu.memory_space<vmem>>, vector<2x1x256xf32>
    %477 = vector.shape_cast %476 : vector<2x1x256xf32> to vector<2x256xf32>
    %c0_180 = arith.constant 0 : index
    %c0_181 = arith.constant 0 : index
    %c0_182 = arith.constant 0 : index
    %478 = vector.load %arg20[%c0_180, %c0_181, %c0_182] : memref<2x8x256xf32, #tpu.memory_space<vmem>>, vector<2x1x256xf32>
    %479 = vector.shape_cast %478 : vector<2x1x256xf32> to vector<2x256xf32>
    %480 = vector.shape_cast %104 : vector<1x256xi1> to vector<1x256xi1>
    %481 = vector.broadcast %480 : vector<1x256xi1> to vector<2x256xi1>
    %482 = arith.select %481, %477, %479 : vector<2x256xi1>, vector<2x256xf32>
    %483 = arith.truncf %467 : vector<2x64xf32> to vector<2x64xbf16>
    %cst_183 = arith.constant dense<0.000000e+00> : vector<2x256xf32>
    %484 = tpu.matmul %483, %110, %cst_183 {dimension_numbers = #tpu.dot_dimension_numbers<[1], [0], [0], [1], [0, 0, 1, 1], [], []>} : vector<2x64xbf16>, vector<64x256xbf16>, vector<2x256xf32> -> vector<2x256xf32>
    %485 = arith.addf %482, %484 : vector<2x256xf32>
    %486 = vector.extract_strided_slice %485 {offsets = [0, 0], sizes = [2, 64], strides = [1, 1]} : vector<2x256xf32> to vector<2x64xf32>
    %487 = arith.negf %486 : vector<2x64xf32>
    %488 = math.exp %487 : vector<2x64xf32>
    %cst_184 = arith.constant 1.000000e+00 : f32
    %489 = vector.broadcast %cst_184 : f32 to vector<2x64xf32>
    %490 = arith.addf %489, %488 : vector<2x64xf32>
    %491 = arith.divf %489, %490 : vector<2x64xf32>
    %492 = vector.extract_strided_slice %485 {offsets = [0, 64], sizes = [2, 64], strides = [1, 1]} : vector<2x256xf32> to vector<2x64xf32>
    %493 = arith.negf %492 : vector<2x64xf32>
    %494 = math.exp %493 : vector<2x64xf32>
    %cst_185 = arith.constant 1.000000e+00 : f32
    %495 = vector.broadcast %cst_185 : f32 to vector<2x64xf32>
    %496 = arith.addf %495, %494 : vector<2x64xf32>
    %497 = arith.divf %495, %496 : vector<2x64xf32>
    %498 = vector.extract_strided_slice %485 {offsets = [0, 128], sizes = [2, 64], strides = [1, 1]} : vector<2x256xf32> to vector<2x64xf32>
    %499 = math.tanh %498 : vector<2x64xf32>
    %500 = vector.extract_strided_slice %485 {offsets = [0, 192], sizes = [2, 64], strides = [1, 1]} : vector<2x256xf32> to vector<2x64xf32>
    %501 = arith.negf %500 : vector<2x64xf32>
    %502 = math.exp %501 : vector<2x64xf32>
    %cst_186 = arith.constant 1.000000e+00 : f32
    %503 = vector.broadcast %cst_186 : f32 to vector<2x64xf32>
    %504 = arith.addf %503, %502 : vector<2x64xf32>
    %505 = arith.divf %503, %504 : vector<2x64xf32>
    %506 = arith.mulf %497, %465 : vector<2x64xf32>
    %507 = arith.mulf %491, %499 : vector<2x64xf32>
    %508 = arith.addf %506, %507 : vector<2x64xf32>
    %509 = math.tanh %508 : vector<2x64xf32>
    %510 = arith.mulf %505, %509 : vector<2x64xf32>
    %c7_i32 = arith.constant 7 : i32
    %511 = vector.broadcast %c7_i32 : i32 to vector<2x64xi32>
    %512 = arith.cmpi sle, %107, %511 : vector<2x64xi32>
    %c7_i32_187 = arith.constant 7 : i32
    %513 = vector.broadcast %c7_i32_187 : i32 to vector<2x64xi32>
    %514 = arith.cmpi sgt, %109, %513 : vector<2x64xi32>
    %515 = arith.andi %512, %514 : vector<2x64xi1>
    %cst_188 = arith.constant 0.000000e+00 : f32
    %516 = vector.broadcast %cst_188 : f32 to vector<2x64xf32>
    %517 = arith.select %515, %510, %516 : vector<2x64xi1>, vector<2x64xf32>
    %518 = vector.extract_strided_slice %517 {offsets = [0, 0], sizes = [2, 32], strides = [1, 1]} : vector<2x64xf32> to vector<2x32xf32>
    %c0_189 = arith.constant 0 : index
    %c7_190 = arith.constant 7 : index
    %c0_191 = arith.constant 0 : index
    %519 = vector.load %arg21[%c0_189, %c7_190, %c0_191] : memref<2x8x64xf32, #tpu.memory_space<vmem>>, vector<2x1x32xf32>
    %520 = vector.shape_cast %519 : vector<2x1x32xf32> to vector<2x32xf32>
    %521 = vector.shape_cast %518 : vector<2x32xf32> to vector<2x1x32xf32>
    tpu.vector_store %arg21[%c0_189, %c7_190, %c0_191], %521 {strides = array<i32>} : memref<2x8x64xf32, #tpu.memory_space<vmem>>, vector<2x1x32xf32>,
    %522 = vector.extract_strided_slice %517 {offsets = [0, 32], sizes = [2, 32], strides = [1, 1]} : vector<2x64xf32> to vector<2x32xf32>
    %c0_192 = arith.constant 0 : index
    %c0_193 = arith.constant 0 : index
    %c32_194 = arith.constant 32 : index
    %523 = vector.load %arg21[%c0_192, %c0_193, %c32_194] : memref<2x8x64xf32, #tpu.memory_space<vmem>>, vector<2x1x32xf32>
    %524 = vector.shape_cast %523 : vector<2x1x32xf32> to vector<2x32xf32>
    %525 = vector.shape_cast %522 : vector<2x32xf32> to vector<2x1x32xf32>
    tpu.vector_store %arg21[%c0_192, %c0_193, %c32_194], %525 {strides = array<i32>} : memref<2x8x64xf32, #tpu.memory_space<vmem>>, vector<2x1x32xf32>,
    %c0_195 = arith.constant 0 : index
    %c0_196 = arith.constant 0 : index
    %c0_197 = arith.constant 0 : index
    %526 = vector.load %arg21[%c0_195, %c0_196, %c0_197] : memref<2x8x64xf32, #tpu.memory_space<vmem>>, vector<2x8x64xf32>
    %527 = vector.shape_cast %526 : vector<2x8x64xf32> to vector<16x64xf32>
    %c0_198 = arith.constant 0 : index
    %c0_199 = arith.constant 0 : index
    %528 = vector.load %arg12[%c0_198, %c0_199] : memref<64x1xf32, #tpu.memory_space<vmem>>, vector<64x1xf32>
    %cst_200 = arith.constant dense<0.000000e+00> : vector<16x1xf32>
    %529 = tpu.matmul %527, %528, %cst_200 {dimension_numbers = #tpu.dot_dimension_numbers<[1], [0], [0], [1], [0, 0, 1, 1], [], []>} : vector<16x64xf32>, vector<64x1xf32>, vector<16x1xf32> -> vector<16x1xf32>
    %530 = vector.shape_cast %529 : vector<16x1xf32> to vector<2x8x1xf32>
    %c0_201 = arith.constant 0 : index
    %c0_202 = arith.constant 0 : index
    %c0_203 = arith.constant 0 : index
    %531 = vector.load %arg13[%c0_201, %c0_202, %c0_203] : memref<1x1x1xf32, #tpu.memory_space<vmem>>, vector<1x1x1xf32>
    %532 = vector.broadcast %531 : vector<1x1x1xf32> to vector<2x8x1xf32>
    %533 = arith.addf %530, %532 : vector<2x8x1xf32>
    %cst_204 = arith.constant dense<0xFF800000> : vector<2x1xf32>
    %534 = vector.multi_reduction <maximumf>, %533, %cst_204 [1] : vector<2x8x1xf32> to vector<2x1xf32>
    %535 = vector.shape_cast %534 : vector<2x1xf32> to vector<2x1x1xf32>
    %536 = vector.broadcast %535 : vector<2x1x1xf32> to vector<2x8x1xf32>
    %537 = arith.subf %533, %536 : vector<2x8x1xf32>
    %538 = math.exp %537 : vector<2x8x1xf32>
    %cst_205 = arith.constant dense<0.000000e+00> : vector<2x1xf32>
    %539 = vector.multi_reduction <add>, %538, %cst_205 [1] : vector<2x8x1xf32> to vector<2x1xf32>
    %540 = vector.shape_cast %539 : vector<2x1xf32> to vector<2x1x1xf32>
    %541 = tpu.reciprocal %540 {approx = true} : vector<2x1x1xf32> -> vector<2x1x1xf32>
    %542 = vector.broadcast %541 : vector<2x1x1xf32> to vector<2x8x1xf32>
    %543 = arith.mulf %538, %542 : vector<2x8x1xf32>
    %544 = vector.broadcast %543 : vector<2x8x1xf32> to vector<2x8x64xf32>
    %545 = arith.mulf %544, %526 : vector<2x8x64xf32>
    %cst_206 = arith.constant dense<0.000000e+00> : vector<2x64xf32>
    %546 = vector.multi_reduction <add>, %545, %cst_206 [1] : vector<2x8x64xf32> to vector<2x64xf32>
    %547 = arith.truncf %546 : vector<2x64xf32> to vector<2x64xbf16>
    %c0_207 = arith.constant 0 : index
    %c0_208 = arith.constant 0 : index
    %548 = vector.load %arg14[%c0_207, %c0_208] : memref<64x32xbf16, #tpu.memory_space<vmem>>, vector<64x32xbf16>
    %cst_209 = arith.constant dense<0.000000e+00> : vector<2x32xf32>
    %549 = tpu.matmul %547, %548, %cst_209 {dimension_numbers = #tpu.dot_dimension_numbers<[1], [0], [0], [1], [0, 0, 1, 1], [], []>} : vector<2x64xbf16>, vector<64x32xbf16>, vector<2x32xf32> -> vector<2x32xf32>
    %c0_210 = arith.constant 0 : index
    %c0_211 = arith.constant 0 : index
    %550 = vector.load %arg15[%c0_210, %c0_211] : memref<1x32xf32, #tpu.memory_space<vmem>>, vector<1x32xf32>
    %551 = vector.broadcast %550 : vector<1x32xf32> to vector<2x32xf32>
    %552 = arith.mulf %549, %551 : vector<2x32xf32>
    %c0_212 = arith.constant 0 : index
    %c0_213 = arith.constant 0 : index
    %553 = vector.load %arg16[%c0_212, %c0_213] : memref<1x32xf32, #tpu.memory_space<vmem>>, vector<1x32xf32>
    %554 = vector.broadcast %553 : vector<1x32xf32> to vector<2x32xf32>
    %555 = arith.addf %552, %554 : vector<2x32xf32>
    %cst_214 = arith.constant 0.000000e+00 : f32
    %556 = vector.broadcast %cst_214 : f32 to vector<2x32xf32>
    %557 = arith.maximumf %555, %556 : vector<2x32xf32>
    %c0_215 = arith.constant 0 : index
    %c0_216 = arith.constant 0 : index
    %558 = vector.load %arg17[%c0_215, %c0_216] : memref<32x1xf32, #tpu.memory_space<vmem>>, vector<32x1xf32>
    %cst_217 = arith.constant dense<0.000000e+00> : vector<2x1xf32>
    %559 = tpu.matmul %557, %558, %cst_217 {dimension_numbers = #tpu.dot_dimension_numbers<[1], [0], [0], [1], [0, 0, 1, 1], [], []>} : vector<2x32xf32>, vector<32x1xf32>, vector<2x1xf32> -> vector<2x1xf32>
    %c0_218 = arith.constant 0 : index
    %c0_219 = arith.constant 0 : index
    %560 = vector.load %arg18[%c0_218, %c0_219] : memref<1x1xf32, #tpu.memory_space<vmem>>, vector<1x1xf32>
    %561 = vector.broadcast %560 : vector<1x1xf32> to vector<2x1xf32>
    %562 = arith.addf %559, %561 : vector<2x1xf32>
    %563 = arith.negf %562 : vector<2x1xf32>
    %564 = math.exp %563 : vector<2x1xf32>
    %cst_220 = arith.constant 1.000000e+00 : f32
    %565 = vector.broadcast %cst_220 : f32 to vector<2x1xf32>
    %566 = arith.addf %565, %564 : vector<2x1xf32>
    %567 = arith.divf %565, %566 : vector<2x1xf32>
    %c0_221 = arith.constant 0 : index
    %c0_222 = arith.constant 0 : index
    %c0_223 = arith.constant 0 : index
    %568 = vector.load %arg19[%c0_221, %c0_222, %c0_223] : memref<1x2x1xf32, #tpu.memory_space<vmem>>, vector<1x2x1xf32>
    %569 = vector.shape_cast %568 : vector<1x2x1xf32> to vector<2x1xf32>
    %570 = vector.shape_cast %567 : vector<2x1xf32> to vector<1x2x1xf32>
    tpu.vector_store %arg19[%c0_221, %c0_222, %c0_223], %570 {strides = array<i32>} : memref<1x2x1xf32, #tpu.memory_space<vmem>>, vector<1x2x1xf32>,
    return
  }
  func.func @transform_0(%arg0: i32) -> (i32, i32, i32) {
    %c0_i32 = arith.constant 0 : i32
    %c0_i32_0 = arith.constant 0 : i32
    %c0_i32_1 = arith.constant 0 : i32
    return %arg0, %c0_i32, %c0_i32_0 : i32, i32, i32
  }
  func.func @transform_1(%arg0: i32) -> (i32, i32, i32) {
    %c0_i32 = arith.constant 0 : i32
    %c0_i32_0 = arith.constant 0 : i32
    %c0_i32_1 = arith.constant 0 : i32
    return %arg0, %c0_i32, %c0_i32_0 : i32, i32, i32
  }
  func.func @transform_2(%arg0: i32) -> (i32, i32) {
    %c0_i32 = arith.constant 0 : i32
    %c0_i32_0 = arith.constant 0 : i32
    %c0_i32_1 = arith.constant 0 : i32
    return %c0_i32, %c0_i32_0 : i32, i32
  }
  func.func @transform_3(%arg0: i32) -> (i32, i32) {
    %c0_i32 = arith.constant 0 : i32
    %c0_i32_0 = arith.constant 0 : i32
    %c0_i32_1 = arith.constant 0 : i32
    return %c0_i32, %c0_i32_0 : i32, i32
  }
  func.func @transform_4(%arg0: i32) -> (i32, i32) {
    %c0_i32 = arith.constant 0 : i32
    %c0_i32_0 = arith.constant 0 : i32
    %c0_i32_1 = arith.constant 0 : i32
    return %c0_i32, %c0_i32_0 : i32, i32
  }
  func.func @transform_5(%arg0: i32) -> (i32, i32) {
    %c0_i32 = arith.constant 0 : i32
    %c0_i32_0 = arith.constant 0 : i32
    %c0_i32_1 = arith.constant 0 : i32
    return %c0_i32, %c0_i32_0 : i32, i32
  }
  func.func @transform_6(%arg0: i32) -> (i32, i32) {
    %c0_i32 = arith.constant 0 : i32
    %c0_i32_0 = arith.constant 0 : i32
    %c0_i32_1 = arith.constant 0 : i32
    return %c0_i32, %c0_i32_0 : i32, i32
  }
  func.func @transform_7(%arg0: i32) -> (i32, i32) {
    %c0_i32 = arith.constant 0 : i32
    %c0_i32_0 = arith.constant 0 : i32
    %c0_i32_1 = arith.constant 0 : i32
    return %c0_i32, %c0_i32_0 : i32, i32
  }
  func.func @transform_8(%arg0: i32) -> (i32, i32) {
    %c0_i32 = arith.constant 0 : i32
    %c0_i32_0 = arith.constant 0 : i32
    %c0_i32_1 = arith.constant 0 : i32
    return %c0_i32, %c0_i32_0 : i32, i32
  }
  func.func @transform_9(%arg0: i32) -> (i32, i32) {
    %c0_i32 = arith.constant 0 : i32
    %c0_i32_0 = arith.constant 0 : i32
    %c0_i32_1 = arith.constant 0 : i32
    return %c0_i32, %c0_i32_0 : i32, i32
  }
  func.func @transform_10(%arg0: i32) -> (i32, i32) {
    %c0_i32 = arith.constant 0 : i32
    %c0_i32_0 = arith.constant 0 : i32
    %c0_i32_1 = arith.constant 0 : i32
    return %c0_i32, %c0_i32_0 : i32, i32
  }
  func.func @transform_11(%arg0: i32) -> (i32, i32) {
    %c0_i32 = arith.constant 0 : i32
    %c0_i32_0 = arith.constant 0 : i32
    %c0_i32_1 = arith.constant 0 : i32
    return %c0_i32, %c0_i32_0 : i32, i32
  }
  func.func @transform_12(%arg0: i32) -> (i32, i32, i32) {
    %c0_i32 = arith.constant 0 : i32
    %c0_i32_0 = arith.constant 0 : i32
    %c0_i32_1 = arith.constant 0 : i32
    %c0_i32_2 = arith.constant 0 : i32
    return %c0_i32, %c0_i32_0, %c0_i32_1 : i32, i32, i32
  }
  func.func @transform_13(%arg0: i32) -> (i32, i32) {
    %c0_i32 = arith.constant 0 : i32
    %c0_i32_0 = arith.constant 0 : i32
    %c0_i32_1 = arith.constant 0 : i32
    return %c0_i32, %c0_i32_0 : i32, i32
  }
  func.func @transform_14(%arg0: i32) -> (i32, i32) {
    %c0_i32 = arith.constant 0 : i32
    %c0_i32_0 = arith.constant 0 : i32
    %c0_i32_1 = arith.constant 0 : i32
    return %c0_i32, %c0_i32_0 : i32, i32
  }
  func.func @transform_15(%arg0: i32) -> (i32, i32) {
    %c0_i32 = arith.constant 0 : i32
    %c0_i32_0 = arith.constant 0 : i32
    %c0_i32_1 = arith.constant 0 : i32
    return %c0_i32, %c0_i32_0 : i32, i32
  }
  func.func @transform_16(%arg0: i32) -> (i32, i32) {
    %c0_i32 = arith.constant 0 : i32
    %c0_i32_0 = arith.constant 0 : i32
    %c0_i32_1 = arith.constant 0 : i32
    return %c0_i32, %c0_i32_0 : i32, i32
  }
  func.func @transform_17(%arg0: i32) -> (i32, i32) {
    %c0_i32 = arith.constant 0 : i32
    %c0_i32_0 = arith.constant 0 : i32
    %c0_i32_1 = arith.constant 0 : i32
    return %c0_i32, %c0_i32_0 : i32, i32
  }
  func.func @transform_18(%arg0: i32) -> (i32, i32, i32) {
    %c0_i32 = arith.constant 0 : i32
    %c0_i32_0 = arith.constant 0 : i32
    %c0_i32_1 = arith.constant 0 : i32
    return %arg0, %c0_i32, %c0_i32_0 : i32, i32, i32
  }
}

</mosaic_0001>

<bundles_post_ra>
// kernel: optimized_net_forward.1
= control target key start
LH: loop header
LB: loop body
LE: loop exit
PB: predicated region body
PF: predicated region fallthrough
CT: control target
= control target key end

     0   :  { %s4904_s0 = inlined_call_operand.hbm [shape: bf16[2,16,8], index: 0, kind: input, shape index: {}]   ;;  %s4905_s1 = inlined_call_operand.hbm [shape: s32[2,2,64], index: 1, kind: input, shape index: {}]   ;;  %s4906_s2 = inlined_call_operand.hbm [shape: bf16[24,64], index: 2, kind: input, shape index: {}]   ;;  %s4907_s3 = inlined_call_operand.hbm [shape: f32[1,64], index: 3, kind: input, shape index: {}]   ;;  %s4908_s4 = inlined_call_operand.hbm [shape: f32[1,64], index: 4, kind: input, shape index: {}]   ;;  %s4909_s5 = inlined_call_operand.hbm [shape: bf16[96,32], index: 5, kind: input, shape index: {}]   ;;  %s4910_s6 = inlined_call_operand.hbm [shape: f32[1,32], index: 6, kind: input, shape index: {}]   ;;  %s4911_s7 = inlined_call_operand.hbm [shape: f32[1,32], index: 7, kind: input, shape index: {}]   ;;  %s4912_s8 = inlined_call_operand.hbm [shape: bf16[32,256], index: 8, kind: input, shape index: {}]   ;;  %s4913_s9 = inlined_call_operand.hbm [shape: f32[1,256], index: 9, kind: input, shape index: {}]   ;;  %s4914_s10 = inlined_call_operand.hbm [shape: bf16[64,256], index: 10, kind: input, shape index: {}]   ;;  %s4915_s11 = inlined_call_operand.hbm [shape: f32[64,1], index: 11, kind: input, shape index: {}]   ;;  %s4916_s12 = inlined_call_operand.<no memory space> [shape: f32[1,1,1], index: 12, kind: input, shape index: {}]   ;;  %s4917_s13 = inlined_call_operand.hbm [shape: bf16[64,32], index: 13, kind: input, shape index: {}]   ;;  %s4918_s14 = inlined_call_operand.hbm [shape: f32[1,32], index: 14, kind: input, shape index: {}]   ;;  %s4919_s15 = inlined_call_operand.hbm [shape: f32[1,32], index: 15, kind: input, shape index: {}]   ;;  %s4920_s16 = inlined_call_operand.hbm [shape: f32[32,1], index: 16, kind: input, shape index: {}]   ;;  %s4921_s18 = inlined_call_operand.hbm [shape: f32[1,2,1], index: 18, kind: output, shape index: {}]   ;;  %s4922_s17 = inlined_call_operand.<no memory space> [shape: f32[1,1], index: 17, kind: input, shape index: {}]  }
   0x1   :  { %4926 = sst [smem:[#allocation43_spill]] %s4904_s0  ;;  %v23_v0 = vstv %s4916_s12  ;;  %v25_v1 = vstv %s4922_s17 }
   0x2   :  { %4927 = sst [smem:[#allocation44_spill]] %s4905_s1  ;;  %24 = vst [vmem:[#allocation4] sm:$0x1] %v23_v0  ;;  %26 = vst [vmem:[#allocation5] sm:$0x1] %v25_v1 }
   0x3   :  { %4928 = sst [smem:[#allocation45_spill]] %s4906_s2 }
   0x4   :  { %27 = vsyncpa [#allocation7], 0 }
   0x5   :  { %28 = vsyncpa [#allocation10], 0 }
   0x6   :  { %29 = vsyncpa [#allocation13], 0 }
   0x7   :  { %30 = vsyncpa [#allocation16], 0 }
   0x8   :  { %31 = vsyncpa [#allocation19], 0 }
   0x9   :  { %32 = vsyncpa [#allocation22], 0 }
   0xa   :  { %33 = vsyncpa [#allocation25], 0 }
   0xb   :  { %34 = vsyncpa [#allocation28], 0 }
   0xc   :  { %35 = vsyncpa [#allocation31], 0 }
   0xd   :  { %36 = vsyncpa [#allocation8], 0  ;;  %s3800_s0 = smov [#allocation9]   ;;  %s4929_s20 = sld [smem:[#allocation44_spill]] }
   0xe   :  { %s54_s19 = sshll.u32 %s3800_s0, 4  ;;  %s55_s19 = int_to_ptr.vmem [resolvable:$true] %s54_s19 }
  0x13   :  { %s3406_s21 = scalar_lea.hbm %s4929_s20, 64 }
  0x14   :  { %p3407_p0 = scmp.ne.s32.totalorder %s4929_s20, %s3406_s21  ;;  %p3410_p1 = scmp.lt.u32.totalorder %s3406_s21, %s4929_s20 }
  0x16   :  { %p3412_p2 = pnand %p3410_p1, %p3407_p0 }
  0x18   :  { %3415 = shalt.err (!%p3412_p2)
}
  0x19   :  { %s3416_s24 = scalar_lea.vmem %s55_s19, 64  ;;  %p3421_p4 = scmp.lt.s32.totalorder %s55_s19, %s55_s19 }
  0x1a   :  { %p3417_p3 = scmp.ne.s32.totalorder %s55_s19, %s3416_s24  ;;  %p3422_p5 = scmp.lt.s32.totalorder %s3416_s24, %s3416_s24 }
  0x1c   :  { %p3423_p6 = por %p3422_p5, %p3421_p4 }
  0x1e   :  { %p3424_p7 = pnand %p3423_p6, %p3417_p3 }
  0x20   :  { %3427 = shalt.err (!%p3424_p7)
}
  0x21   :  { %s3801_s25 = smov 32   ;;  %s3802_s26 = smov 2  }
  0x22   :  { %60 = dma.hbm_to_vmem [thread:$0]  %s4929_s20, 64, %s55_s19, [#allocation10], %s3801_s25, %s3801_s25, %s3802_s26  }
  0x23   :  { %s3803_s29 = smov [#allocation12]   ;;  %s3428_s1 = scalar_lea.hbm %s4907_s3, 16 }
  0x24   :  { %s79_s30 = sshll.u32 %s3803_s29, 4  ;;  %p3429_p8 = scmp.ne.s32.totalorder %s4907_s3, %s3428_s1  ;;  %s80_s30 = int_to_ptr.vmem [resolvable:$true] %s79_s30 }
  0x25   :  { %p3432_p9 = scmp.lt.u32.totalorder %s3428_s1, %s4907_s3 }
  0x27   :  { %p3434_p10 = pnand %p3432_p9, %p3429_p8 }
  0x29   :  { %3437 = shalt.err (!%p3434_p10)
}
  0x2a   :  { %s3438_s23 = scalar_lea.vmem %s80_s30, 16  ;;  %s3442_s19 = scalar_lea.vmem %s80_s30, 32 }
  0x2b   :  { %p3439_p11 = scmp.ne.s32.totalorder %s80_s30, %s3438_s23  ;;  %p3443_p12 = scmp.lt.s32.totalorder %s80_s30, %s80_s30 }
  0x2c   :  { %p3444_p13 = scmp.lt.s32.totalorder %s3442_s19, %s3438_s23 }
  0x2e   :  { %p3445_p0 = por %p3444_p13, %p3443_p12 }
  0x30   :  { %p3446_p1 = pnand %p3445_p0, %p3439_p11 }
  0x32   :  { %3449 = shalt.err (!%p3446_p1)
}
  0x33   :  { %82 = dma.hbm_to_vmem [thread:$0]  %s4907_s3, 16, %s80_s30, [#allocation13]  }
  0x34   :  { %s3804_s26 = smov [#allocation15]   ;;  %s3805_s28 = smov [#allocation18]  }
  0x35   :  { %s98_s27 = sshll.u32 %s3804_s26, 4  ;;  %s121_s29 = sshll.u32 %s3805_s28, 4  ;;  %s99_s27 = int_to_ptr.vmem [resolvable:$true] %s98_s27  ;;  %s3958_s29 = int_to_ptr.vmem [resolvable:$true] %s121_s29 }
  0x36   :  { %s3450_s1 = scalar_lea.hbm %s4909_s5, 768 }
  0x37   :  { %p3451_p2 = scmp.ne.s32.totalorder %s4909_s5, %s3450_s1  ;;  %p3454_p3 = scmp.lt.u32.totalorder %s3450_s1, %s4909_s5 }
  0x39   :  { %p3456_p4 = pnand %p3454_p3, %p3451_p2 }
  0x3b   :  { %3459 = shalt.err (!%p3456_p4)
}
  0x3c   :  { %s3460_s3 = scalar_lea.vmem %s99_s27, 768  ;;  %p3465_p6 = scmp.lt.s32.totalorder %s99_s27, %s99_s27 }
  0x3d   :  { %p3461_p5 = scmp.ne.s32.totalorder %s99_s27, %s3460_s3  ;;  %p3466_p7 = scmp.lt.s32.totalorder %s3460_s3, %s3460_s3 }
  0x3f   :  { %p3467_p8 = por %p3466_p7, %p3465_p6 }
  0x41   :  { %p3468_p9 = pnand %p3467_p8, %p3461_p5 }
  0x43   :  { %3471 = shalt.err (!%p3468_p9)
}
  0x44   :  { %s3806_s30 = smov 64   ;;  %s3807_s23 = smov 4  }
  0x45   :  { %104 = dma.hbm_to_vmem [thread:$0]  %s4909_s5, 768, %s99_s27, [#allocation16], %s3806_s30, %s3806_s30, %s3807_s23  }
  0x46   :  { %s3472_s28 = scalar_lea.hbm %s4911_s7, 16 }
  0x47   :  { %p3473_p10 = scmp.ne.s32.totalorder %s4911_s7, %s3472_s28  ;;  %p3476_p11 = scmp.lt.u32.totalorder %s3472_s28, %s4911_s7 }
  0x49   :  { %p3478_p12 = pnand %p3476_p11, %p3473_p10 }
  0x4b   :  { %3481 = shalt.err (!%p3478_p12)
}
  0x4c   :  { %s3482_s17 = scalar_lea.vmem %s3958_s29, 16  ;;  %s3486_s5 = scalar_lea.vmem %s3958_s29, 32 }
  0x4d   :  { %p3483_p13 = scmp.ne.s32.totalorder %s3958_s29, %s3482_s17  ;;  %p3487_p0 = scmp.lt.s32.totalorder %s3958_s29, %s3958_s29 }
  0x4e   :  { %p3488_p1 = scmp.lt.s32.totalorder %s3486_s5, %s3482_s17 }
  0x50   :  { %p3489_p2 = por %p3488_p1, %p3487_p0 }
  0x52   :  { %p3490_p3 = pnand %p3489_p2, %p3483_p13 }
  0x54   :  { %3493 = shalt.err (!%p3490_p3)
}
  0x55   :  { %124 = dma.hbm_to_vmem [thread:$0]  %s4911_s7, 16, %s3958_s29, [#allocation19]  }
  0x56   :  { %s3808_s2 = smov [#allocation21]   ;;  %s3494_s24 = scalar_lea.hbm %s4913_s9, 32 }
  0x57   :  { %s143_s3 = sshll.u32 %s3808_s2, 4  ;;  %p3495_p4 = scmp.ne.s32.totalorder %s4913_s9, %s3494_s24  ;;  %s144_s3 = int_to_ptr.vmem [resolvable:$true] %s143_s3 }
  0x58   :  { %p3498_p5 = scmp.lt.u32.totalorder %s3494_s24, %s4913_s9 }
  0x5a   :  { %p3500_p6 = pnand %p3498_p5, %p3495_p4 }
  0x5c   :  { %3503 = shalt.err (!%p3500_p6)
}
  0x5d   :  { %s3504_s1 = scalar_lea.vmem %s144_s3, 32  ;;  %p3509_p8 = scmp.lt.s32.totalorder %s144_s3, %s144_s3 }
  0x5e   :  { %p3505_p7 = scmp.ne.s32.totalorder %s144_s3, %s3504_s1  ;;  %p3510_p9 = scmp.lt.s32.totalorder %s3504_s1, %s3504_s1 }
  0x60   :  { %p3511_p10 = por %p3510_p9, %p3509_p8 }
  0x62   :  { %p3512_p11 = pnand %p3511_p10, %p3505_p7 }
  0x64   :  { %3515 = shalt.err (!%p3512_p11)
}
  0x65   :  { %146 = dma.hbm_to_vmem [thread:$0]  %s4913_s9, 32, %s144_s3, [#allocation22]  }
  0x66   :  { %s3809_s21 = smov [#allocation24]   ;;  %s3810_s5 = smov [#allocation27]  }
  0x67   :  { %s164_s17 = sshll.u32 %s3809_s21, 4  ;;  %s191_s27 = sshll.u32 %s3810_s5, 4  ;;  %s165_s17 = int_to_ptr.vmem [resolvable:$true] %s164_s17  ;;  %s192_s27 = int_to_ptr.vmem [resolvable:$true] %s191_s27 }
  0x68   :  { %s3516_s19 = scalar_lea.hbm %s4915_s11, 1024 }
  0x69   :  { %p3517_p12 = scmp.ne.s32.totalorder %s4915_s11, %s3516_s19  ;;  %p3520_p13 = scmp.lt.u32.totalorder %s3516_s19, %s4915_s11 }
  0x6b   :  { %p3522_p0 = pnand %p3520_p13, %p3517_p12 }
  0x6d   :  { %3525 = shalt.err (!%p3522_p0)
}
  0x6e   :  { %s3526_s9 = scalar_lea.vmem %s165_s17, 1024  ;;  %p3531_p2 = scmp.lt.s32.totalorder %s165_s17, %s165_s17 }
  0x6f   :  { %p3527_p1 = scmp.ne.s32.totalorder %s165_s17, %s3526_s9  ;;  %p3532_p3 = scmp.lt.s32.totalorder %s3526_s9, %s3526_s9 }
  0x71   :  { %p3533_p4 = por %p3532_p3, %p3531_p2 }
  0x73   :  { %p3534_p5 = pnand %p3533_p4, %p3527_p1 }
  0x75   :  { %3537 = shalt.err (!%p3534_p5)
}
  0x76   :  { %s3811_s3 = smov 128   ;;  %s3812_s0 = smov 8  }
  0x77   :  { %170 = dma.hbm_to_vmem [thread:$0]  %s4915_s11, 1024, %s165_s17, [#allocation25], %s3811_s3, %s3811_s3, %s3812_s0  }
  0x78   :  { %s3538_s21 = scalar_lea.hbm %s4918_s14, 16 }
  0x79   :  { %p3539_p6 = scmp.ne.s32.totalorder %s4918_s14, %s3538_s21  ;;  %p3542_p7 = scmp.lt.u32.totalorder %s3538_s21, %s4918_s14 }
  0x7b   :  { %p3544_p8 = pnand %p3542_p7, %p3539_p6 }
  0x7d   :  { %3547 = shalt.err (!%p3544_p8)
}
  0x7e   :  { %s3548_s20 = scalar_lea.vmem %s192_s27, 16  ;;  %s3552_s24 = scalar_lea.vmem %s192_s27, 32 }
  0x7f   :  { %p3549_p9 = scmp.ne.s32.totalorder %s192_s27, %s3548_s20  ;;  %p3553_p10 = scmp.lt.s32.totalorder %s192_s27, %s192_s27 }
  0x80   :  { %p3554_p11 = scmp.lt.s32.totalorder %s3552_s24, %s3548_s20 }
  0x82   :  { %p3555_p12 = por %p3554_p11, %p3553_p10 }
  0x84   :  { %p3556_p13 = pnand %p3555_p12, %p3549_p9 }
  0x86   :  { %3559 = shalt.err (!%p3556_p13)
}
  0x87   :  { %194 = dma.hbm_to_vmem [thread:$0]  %s4918_s14, 16, %s192_s27, [#allocation28]  }
  0x88   :  { %s3813_s26 = smov [#allocation6]   ;;  %s3814_s9 = smov [#allocation11]  }
  0x89   :  { %s42_s28 = sshll.u32 %s3813_s26, 4  ;;  %s66_s12 = sshll.u32 %s3814_s9, 4  ;;  %s43_s28 = int_to_ptr.vmem [resolvable:$true] %s42_s28  ;;  %s67_s12 = int_to_ptr.vmem [resolvable:$true] %s66_s12 }
  0x8a   :  { %s4930_s29 = sld [smem:[#allocation43_spill]] }
  0x90   :  { %s3560_s21 = scalar_lea.hbm %s4930_s29, 256 }
  0x91   :  { %p3561_p0 = scmp.ne.s32.totalorder %s4930_s29, %s3560_s21  ;;  %p3564_p1 = scmp.lt.u32.totalorder %s3560_s21, %s4930_s29 }
  0x93   :  { %p3566_p2 = pnand %p3564_p1, %p3561_p0 }
  0x95   :  { %3569 = shalt.err (!%p3566_p2)
}
  0x96   :  { %s3570_s14 = scalar_lea.vmem %s43_s28, 256  ;;  %p3575_p4 = scmp.lt.s32.totalorder %s43_s28, %s43_s28 }
  0x97   :  { %p3571_p3 = scmp.ne.s32.totalorder %s43_s28, %s3570_s14  ;;  %p3576_p5 = scmp.lt.s32.totalorder %s3570_s14, %s3570_s14 }
  0x99   :  { %p3577_p6 = por %p3576_p5, %p3575_p4 }
  0x9b   :  { %p3578_p7 = pnand %p3577_p6, %p3571_p3 }
  0x9d   :  { %3581 = shalt.err (!%p3578_p7)
}
  0x9e   :  { %48 = dma.hbm_to_vmem [thread:$0]  %s4930_s29, 256, %s43_s28, [#allocation7], %s3806_s30, %s3806_s30, %s3807_s23  }
  0x9f   :  { %s4931_s17 = sld [smem:[#allocation45_spill]] }
  0xa5   :  { %s3582_s26 = scalar_lea.hbm %s4931_s17, 192 }
  0xa6   :  { %p3583_p8 = scmp.ne.s32.totalorder %s4931_s17, %s3582_s26  ;;  %p3586_p9 = scmp.lt.u32.totalorder %s3582_s26, %s4931_s17 }
  0xa8   :  { %p3588_p10 = pnand %p3586_p9, %p3583_p8 }
  0xaa   :  { %3591 = shalt.err (!%p3588_p10)
}
  0xab   :  { %s3592_s5 = scalar_lea.vmem %s67_s12, 192  ;;  %p3597_p12 = scmp.lt.s32.totalorder %s67_s12, %s67_s12 }
  0xac   :  { %p3593_p11 = scmp.ne.s32.totalorder %s67_s12, %s3592_s5  ;;  %p3598_p13 = scmp.lt.s32.totalorder %s3592_s5, %s3592_s5 }
  0xae   :  { %p3599_p0 = por %p3598_p13, %p3597_p12 }
  0xb0   :  { %p3600_p1 = pnand %p3599_p0, %p3593_p11 }
  0xb2   :  { %3603 = shalt.err (!%p3600_p1)
}
  0xb3   :  { %72 = dma.hbm_to_vmem [thread:$0]  %s4931_s17, 192, %s67_s12, [#allocation10], %s3806_s30, %s3806_s30, %s3807_s23  }
  0xb4   :  { %s3815_s22 = smov [#allocation14]   ;;  %s3816_s19 = smov [#allocation17]  }
  0xb5   :  { %s89_s2 = sshll.u32 %s3815_s22, 4  ;;  %s111_s14 = sshll.u32 %s3816_s19, 4  ;;  %s90_s2 = int_to_ptr.vmem [resolvable:$true] %s89_s2  ;;  %s112_s14 = int_to_ptr.vmem [resolvable:$true] %s111_s14 }
  0xb6   :  { %s3604_s24 = scalar_lea.hbm %s4908_s4, 16 }
  0xb7   :  { %p3605_p2 = scmp.ne.s32.totalorder %s4908_s4, %s3604_s24  ;;  %p3608_p3 = scmp.lt.u32.totalorder %s3604_s24, %s4908_s4 }
  0xb9   :  { %p3610_p4 = pnand %p3608_p3, %p3605_p2 }
  0xbb   :  { %3613 = shalt.err (!%p3610_p4)
}
  0xbc   :  { %s3614_s12 = scalar_lea.vmem %s90_s2, 16  ;;  %s3618_s17 = scalar_lea.vmem %s90_s2, 32 }
  0xbd   :  { %p3615_p5 = scmp.ne.s32.totalorder %s90_s2, %s3614_s12  ;;  %p3619_p6 = scmp.lt.s32.totalorder %s90_s2, %s90_s2 }
  0xbe   :  { %p3620_p7 = scmp.lt.s32.totalorder %s3618_s17, %s3614_s12 }
  0xc0   :  { %p3621_p8 = por %p3620_p7, %p3619_p6 }
  0xc2   :  { %p3622_p9 = pnand %p3621_p8, %p3615_p5 }
  0xc4   :  { %3625 = shalt.err (!%p3622_p9)
}
  0xc5   :  { %92 = dma.hbm_to_vmem [thread:$0]  %s4908_s4, 16, %s90_s2, [#allocation13]  }
  0xc6   :  { %s3626_s29 = scalar_lea.hbm %s4910_s6, 16 }
  0xc7   :  { %p3627_p10 = scmp.ne.s32.totalorder %s4910_s6, %s3626_s29  ;;  %p3630_p11 = scmp.lt.u32.totalorder %s3626_s29, %s4910_s6 }
  0xc9   :  { %p3632_p12 = pnand %p3630_p11, %p3627_p10 }
  0xcb   :  { %3635 = shalt.err (!%p3632_p12)
}
  0xcc   :  { %s3636_s24 = scalar_lea.vmem %s112_s14, 16  ;;  %s3640_s11 = scalar_lea.vmem %s112_s14, 32 }
  0xcd   :  { %p3637_p13 = scmp.ne.s32.totalorder %s112_s14, %s3636_s24  ;;  %p3641_p0 = scmp.lt.s32.totalorder %s112_s14, %s112_s14 }
  0xce   :  { %p3642_p1 = scmp.lt.s32.totalorder %s3640_s11, %s3636_s24 }
  0xd0   :  { %p3643_p2 = por %p3642_p1, %p3641_p0 }
  0xd2   :  { %p3644_p3 = pnand %p3643_p2, %p3637_p13 }
  0xd4   :  { %3647 = shalt.err (!%p3644_p3)
}
  0xd5   :  { %114 = dma.hbm_to_vmem [thread:$0]  %s4910_s6, 16, %s112_s14, [#allocation16]  }
  0xd6   :  { %s3817_s26 = smov [#allocation20]   ;;  %s3818_s1 = smov [#allocation23]  }
  0xd7   :  { %s130_s9 = sshll.u32 %s3817_s26, 4  ;;  %s152_s12 = sshll.u32 %s3818_s1, 4  ;;  %s131_s9 = int_to_ptr.vmem [resolvable:$true] %s130_s9  ;;  %s153_s12 = int_to_ptr.vmem [resolvable:$true] %s152_s12 }
  0xd8   :  { %s3648_s21 = scalar_lea.hbm %s4912_s8, 512 }
  0xd9   :  { %p3649_p4 = scmp.ne.s32.totalorder %s4912_s8, %s3648_s21  ;;  %p3652_p5 = scmp.lt.u32.totalorder %s3648_s21, %s4912_s8 }
  0xdb   :  { %p3654_p6 = pnand %p3652_p5, %p3649_p4 }
  0xdd   :  { %3657 = shalt.err (!%p3654_p6)
}
  0xde   :  { %s3658_s6 = scalar_lea.vmem %s131_s9, 512  ;;  %p3663_p8 = scmp.lt.s32.totalorder %s131_s9, %s131_s9 }
  0xdf   :  { %p3659_p7 = scmp.ne.s32.totalorder %s131_s9, %s3658_s6  ;;  %p3664_p9 = scmp.lt.s32.totalorder %s3658_s6, %s3658_s6 }
  0xe1   :  { %p3665_p10 = por %p3664_p9, %p3663_p8 }
  0xe3   :  { %p3666_p11 = pnand %p3665_p10, %p3659_p7 }
  0xe5   :  { %3669 = shalt.err (!%p3666_p11)
}
  0xe6   :  { %136 = dma.hbm_to_vmem [thread:$0]  %s4912_s8, 512, %s131_s9, [#allocation19], %s3811_s3, %s3811_s3, %s3812_s0  }
  0xe7   :  { %s3670_s24 = scalar_lea.hbm %s4914_s10, 1024 }
  0xe8   :  { %p3671_p12 = scmp.ne.s32.totalorder %s4914_s10, %s3670_s24  ;;  %p3674_p13 = scmp.lt.u32.totalorder %s3670_s24, %s4914_s10 }
  0xea   :  { %p3676_p0 = pnand %p3674_p13, %p3671_p12 }
  0xec   :  { %3679 = shalt.err (!%p3676_p0)
}
  0xed   :  { %s3680_s1 = scalar_lea.vmem %s153_s12, 1024  ;;  %p3685_p2 = scmp.lt.s32.totalorder %s153_s12, %s153_s12 }
  0xee   :  { %p3681_p1 = scmp.ne.s32.totalorder %s153_s12, %s3680_s1  ;;  %p3686_p3 = scmp.lt.s32.totalorder %s3680_s1, %s3680_s1 }
  0xf0   :  { %p3687_p4 = por %p3686_p3, %p3685_p2 }
  0xf2   :  { %p3688_p5 = pnand %p3687_p4, %p3681_p1 }
  0xf4   :  { %3691 = shalt.err (!%p3688_p5)
}
  0xf5   :  { %158 = dma.hbm_to_vmem [thread:$0]  %s4914_s10, 1024, %s153_s12, [#allocation22], %s3811_s3, %s3811_s3, %s3812_s0  }
  0xf6   :  { %s3819_s17 = smov [#allocation26]   ;;  %s3820_s21 = smov [#allocation29]  }
  0xf7   :  { %s178_s7 = sshll.u32 %s3819_s17, 4  ;;  %s201_s5 = sshll.u32 %s3820_s21, 4  ;;  %s179_s7 = int_to_ptr.vmem [resolvable:$true] %s178_s7  ;;  %s202_s5 = int_to_ptr.vmem [resolvable:$true] %s201_s5 }
  0xf8   :  { %s3692_s22 = scalar_lea.hbm %s4917_s13, 512 }
  0xf9   :  { %p3693_p6 = scmp.ne.s32.totalorder %s4917_s13, %s3692_s22  ;;  %p3696_p7 = scmp.lt.u32.totalorder %s3692_s22, %s4917_s13 }
  0xfb   :  { %p3698_p8 = pnand %p3696_p7, %p3693_p6 }
  0xfd   :  { %3701 = shalt.err (!%p3698_p8)
}
  0xfe   :  { %s3702_s10 = scalar_lea.vmem %s179_s7, 512  ;;  %p3707_p10 = scmp.lt.s32.totalorder %s179_s7, %s179_s7 }
  0xff   :  { %p3703_p9 = scmp.ne.s32.totalorder %s179_s7, %s3702_s10  ;;  %p3708_p11 = scmp.lt.s32.totalorder %s3702_s10, %s3702_s10 }
 0x101   :  { %p3709_p12 = por %p3708_p11, %p3707_p10 }
 0x103   :  { %p3710_p13 = pnand %p3709_p12, %p3703_p9 }
 0x105   :  { %3713 = shalt.err (!%p3710_p13)
}
 0x106   :  { %184 = dma.hbm_to_vmem [thread:$0]  %s4917_s13, 512, %s179_s7, [#allocation25], %s3806_s30, %s3806_s30, %s3807_s23  }
 0x107   :  { %s3714_s4 = scalar_lea.hbm %s4919_s15, 16 }
 0x108   :  { %p3715_p0 = scmp.ne.s32.totalorder %s4919_s15, %s3714_s4  ;;  %p3718_p1 = scmp.lt.u32.totalorder %s3714_s4, %s4919_s15 }
 0x10a   :  { %p3720_p2 = pnand %p3718_p1, %p3715_p0 }
 0x10c   :  { %3723 = shalt.err (!%p3720_p2)
}
 0x10d   :  { %s3724_s9 = scalar_lea.vmem %s202_s5, 16  ;;  %s3728_s17 = scalar_lea.vmem %s202_s5, 32 }
 0x10e   :  { %p3725_p3 = scmp.ne.s32.totalorder %s202_s5, %s3724_s9  ;;  %p3729_p4 = scmp.lt.s32.totalorder %s202_s5, %s202_s5 }
 0x10f   :  { %p3730_p5 = scmp.lt.s32.totalorder %s3728_s17, %s3724_s9 }
 0x111   :  { %p3731_p6 = por %p3730_p5, %p3729_p4 }
 0x113   :  { %p3732_p7 = pnand %p3731_p6, %p3725_p3 }
 0x115   :  { %3735 = shalt.err (!%p3732_p7)
}
 0x116   :  { %204 = dma.hbm_to_vmem [thread:$0]  %s4919_s15, 16, %s202_s5, [#allocation28]  }
 0x117   :  { %s3821_s7 = smov [#allocation30]   ;;  %s3736_s22 = scalar_lea.hbm %s4920_s16, 512 }
 0x118   :  { %s210_s21 = sshll.u32 %s3821_s7, 4  ;;  %p3737_p8 = scmp.ne.s32.totalorder %s4920_s16, %s3736_s22  ;;  %s211_s21 = int_to_ptr.vmem [resolvable:$true] %s210_s21 }
 0x119   :  { %p3740_p9 = scmp.lt.u32.totalorder %s3736_s22, %s4920_s16 }
 0x11b   :  { %p3742_p10 = pnand %p3740_p9, %p3737_p8 }
 0x11d   :  { %3745 = shalt.err (!%p3742_p10)
}
 0x11e   :  { %s3746_s10 = scalar_lea.vmem %s211_s21, 512  ;;  %p3751_p12 = scmp.lt.s32.totalorder %s211_s21, %s211_s21 }
 0x11f   :  { %p3747_p11 = scmp.ne.s32.totalorder %s211_s21, %s3746_s10  ;;  %p3752_p13 = scmp.lt.s32.totalorder %s3746_s10, %s3746_s10 }
 0x121   :  { %p3753_p0 = por %p3752_p13, %p3751_p12 }
 0x123   :  { %p3754_p1 = pnand %p3753_p0, %p3747_p11 }
 0x125   :  { %3757 = shalt.err (!%p3754_p1)
}
 0x126   :  { %216 = dma.hbm_to_vmem [thread:$0]  %s4920_s16, 512, %s211_s21, [#allocation31], %s3811_s3, %s3811_s3, %s3812_s0  }
 0x127   :  { %3780 = dma.done.wait [#allocation7], 256  }
 0x128   :  { %3781 = vsyncadd [#allocation7], 4294967040 }
 0x129   :  { %3782 = dma.done.wait [#allocation10], 256  }
 0x12a   :  { %3783 = vsyncadd [#allocation10], 4294967040 }
 0x12b   :  { %3784 = dma.done.wait [#allocation13], 32  }
 0x12c   :  { %3785 = vsyncadd [#allocation13], 4294967264 }
 0x12d   :  { %3786 = dma.done.wait [#allocation16], 784  }
 0x12e   :  { %3787 = vsyncadd [#allocation16], 4294966512 }
 0x12f   :  { %3788 = dma.done.wait [#allocation19], 528  }
 0x130   :  { %3789 = vsyncadd [#allocation19], 4294966768 }
 0x131   :  { %3790 = dma.done.wait [#allocation22], 1056  }
 0x132   :  { %3791 = vsyncadd [#allocation22], 4294966240 }
 0x133   :  { %3792 = dma.done.wait [#allocation25], 1536  }
 0x134   :  { %3793 = vsyncadd [#allocation25], 4294965760 }
 0x135   :  { %3794 = dma.done.wait [#allocation28], 32  }
 0x136   :  { %3795 = vsyncadd [#allocation28], 4294967264 }
 0x137   :  { %3796 = dma.done.wait [#allocation31], 512  }
 0x138   :  { %3797 = vsyncadd [#allocation31], 4294966784  ;;  %v276_v2 = vlaneseq  ;;  %v3056_v8 = vld [vmem:[#allocation6] sm:$0xff]   ;;  %v3063_v9 = vld [vmem:[#allocation6 + $0x8] sm:$0xff]   ;;  %vm442_vm4 = vcmask 1043456   ;;  %s3822_s16 = smov 16  }
 0x139   :  { %v3057_v10 = vunpack.c.l.bf16 %v3056_v8  ;;  %v3058_v11 = vunpack.c.h.bf16 %v3056_v8  ;;  %v3061_v12 = vunpack.c.l.bf16 %v3063_v9  ;;  %v3258_v13 = vld [vmem:[#allocation11] sm:$0xff]   ;;  %v3062_v15 = vunpack.c.h.bf16 %v3063_v9  ;;  %v3259_v17 = vld [vmem:[#allocation11 + $0x8] ss:$0 sps:$4 sm:$0xff]   ;;  %v3260_v8 = vld [vmem:[#allocation15] sm:$0xff]  }
 0x13a   :  { %v4159_v3 = vshrl.u32 %v276_v2, 7  ;;  %3096 = vmatprep.subr.bf16.mxu0 %v3258_v13  ;;  %v444_v39 = vsel %vm442_vm4, %v3259_v17, 0  ;;  %vm411_vm6 = vcmask 64512   ;;  %vm416_vm8 = vcmask 130048   ;;  %v3261_v9 = vld [vmem:[#allocation15 + $0x8] sm:$0xff]   ;;  %3104 = vmatprep.subr.bf16.mxu1 %v3260_v8 }
 0x13b   :  { %v334_v18 = vrot.slane %v3058_v11, 7  ;;  %v3216_v19 = vpack.i.bf16 %v3058_v11, %v3057_v10  ;;  %v333_v20 = vrot.slane %v3057_v10, 7  ;;  %v358_v21 = vrot.slane %v3057_v10, 1  ;;  %3097 = vmatpush3.bf16.msra.mxu0 %v3258_v13  ;;  %3105 = vmatpush3.bf16.msra.mxu1 %v3260_v8  ;;  %v3262_v10 = vld [vmem:[#allocation15 + $0x10] sm:$0xff]   ;;  %v3264_v13 = vld [vmem:[#allocation15 + $0x20] sm:$0xff]  }
 0x13c   :  { %v278_v4 = vadd.s32 8, %v4159_v3  ;;  %v280_v5 = vadd.s32 24, %v4159_v3  ;;  %vm362_vm0 = vcmp.lt.s32.totalorder %v4159_v3, 7  ;;  %vm337_vm1 = vcmp.lt.s32.totalorder %v4159_v3, 1  ;;  %3184 = vmatprep.subr.msk.bf16.mxu0 %vm442_vm4, %v3259_v17  ;;  %3106 = vmatprep.subr.bf16.mxu1 %v3261_v9  ;;  %v2995_v17 = vld [vmem:[#allocation14] ss:$0 sm:$0xff] }
 0x13d   :  { %v359_v22 = vrot.slane %v3058_v11, 1  ;;  %v360_v23 = vrot.slane %v3061_v12, 1  ;;  %v336_v24 = vrot.slane %v3062_v15, 7  ;;  %3217 = vrot.lane.b32.xlu0 %v3216_v19, %s3812_s0  ;;  %v3221_v25 = vpack.i.bf16 %v3062_v15, %v3061_v12  ;;  %v3263_v11 = vld [vmem:[#allocation15 + $0x18] sm:$0xff]  }
 0x13e   :  { %v292_v6 = vand.u32 15, %v278_v4  ;;  %v306_v7 = vand.u32 15, %v280_v5  ;;  %v361_v26 = vrot.slane %v3062_v15, 1  ;;  %v335_v27 = vrot.slane %v3061_v12, 7  ;;  %v2994_v12 = vld [vmem:[#allocation12] ss:$0 sm:$0xff] }
 0x13f   :  { %v340_v28 = vsel %vm337_vm1, %v333_v20, %v334_v18  ;;  %v364_v29 = vsel %vm362_vm0, %v359_v22, %v360_v23  ;;  %v365_v30 = vsel %vm362_vm0, %v358_v21, %v359_v22  ;;  %v341_v31 = vsel %vm337_vm1, %v336_v24, %v333_v20  ;;  %3099 = vmatpush3.bf16.msra.mxu0 %v444_v39 }
 0x140   :  { %vm4165_vm2 = vcmp.eq.s32.totalorder %v292_v6, 15  ;;  %vm4169_vm3 = vcmp.eq.s32.totalorder %v306_v7, 15  ;;  %v363_v33 = vsel %vm362_vm0, %v360_v23, %v361_v26  ;;  %v366_v34 = vsel %vm362_vm0, %v361_v26, %v358_v21  ;;  %3107 = vmatpush3.bf16.msra.mxu1 %v3261_v9 }
 0x141   :  { %v376_v32 = vsel %vm4165_vm2, 0.0, %v364_v29  ;;  %v338_v35 = vsel %vm337_vm1, %v335_v27, %v336_v24  ;;  %v378_v37 = vsel %vm4169_vm3, 0.0, %v366_v34  ;;  %v339_v38 = vsel %vm337_vm1, %v334_v18, %v335_v27  ;;  %3222 = vrot.lane.b32.xlu0 %v3221_v25, %s3812_s0  ;;  %3108 = vmatprep.subr.bf16.mxu1 %v3262_v10  ;;  %v3265_v25 = vld [vmem:[#allocation15 + $0x28] sm:$0xff]  }
 0x142   :  { %v3226_v36 = vpack.i.bf16 %v376_v32, %v365_v30  ;;  %v3231_v40 = vpack.i.bf16 %v378_v37, %v363_v33  ;;  %v279_v41 = vadd.s32 16, %v4159_v3  ;;  %v285_v42 = vand.u32 15, %v4159_v3 }
 0x143   :  { %vm435_vm9 = vcmask 195584   ;;  %vm577_vm10 = vcmask 261120   ;;  %vm582_vm11 = vcmask 523264   ;;  %vm637_vm12 = vcmask 785408  }
 0x144   :  { %3227 = vrot.lane.b32.xlu1 %v3226_v36, %s3822_s16  ;;  %v299_v43 = vand.u32 15, %v279_v41  ;;  %vm4199_vm5 = vcmp.eq.s32.totalorder %v285_v42, 0  ;;  %3109 = vmatpush3.bf16.msra.mxu1 %v3262_v10  ;;  %vm827_vm13 = vcmask 254976   ;;  %vm1004_vm14 = vcmask 1041409  }
 0x145   :  { %v350_v48 = vsel %vm4199_vm5, 0.0, %v341_v31  ;;  %3110 = vmatprep.subr.bf16.mxu1 %v3263_v11  ;;  %vm1006_vm15 = vcmask 1042434   ;;  %vm1016_vm4 = vcmask 1047559  }
 0x146   :  { %vm4205_vm7 = vcmp.eq.s32.totalorder %v299_v43, 0 }
 0x147   :  { %v352_v58 = vsel %vm4205_vm7, 0.0, %v339_v38 }
 0x148   :  { %3232 = vrot.lane.b32.xlu1 %v3231_v40, %s3822_s16  ;;  %3111 = vmatpush3.bf16.msra.mxu1 %v3263_v11 }
 0x149   :  { %3112 = vmatprep.subr.bf16.mxu1 %v3264_v13 }
 0x14c   :  { %3113 = vmatpush3.bf16.msra.mxu1 %v3264_v13 }
 0x14d   :  { %3114 = vmatprep.subr.bf16.mxu1 %v3265_v25 }
 0x150   :  { %3115 = vmatpush3.bf16.msra.mxu1 %v3265_v25  ;;  %v4264_v25 = vld [vmem:[#allocation23 + $0x14] ss:$8 sps:$4 sm:$0xff]  }
 0x1af   :  { %v3218_v45 = vpop.permute.xlu0 %3217 }
 0x1b0   :  { %v3220_v46 = vunpack.i.h.bf16 %v3218_v45  ;;  %v3219_v47 = vunpack.i.l.bf16 %v3218_v45 }
 0x1b2   :  { %v412_v54 = vsel %vm411_vm6, %v350_v48, %v3219_v47  ;;  %v413_v55 = vsel %vm411_vm6, %v340_v28, %v3220_v46 }
 0x1b3   :  { %v3223_v50 = vpop.permute.xlu0 %3222 }
 0x1b4   :  { %v3225_v52 = vunpack.i.h.bf16 %v3223_v50  ;;  %v3224_v53 = vunpack.i.l.bf16 %v3223_v50 }
 0x1b6   :  { %v3228_v51 = vpop.permute.xlu1 %3227  ;;  %v415_v61 = vsel %vm411_vm6, %v338_v35, %v3225_v52  ;;  %v414_v62 = vsel %vm411_vm6, %v352_v58, %v3224_v53 }
 0x1b7   :  { %v3230_v56 = vunpack.i.h.bf16 %v3228_v51  ;;  %v3229_v57 = vunpack.i.l.bf16 %v3228_v51 }
 0x1b9   :  { %v417_v59 = vsel %vm416_vm8, %v412_v54, %v3229_v57  ;;  %v418_v60 = vsel %vm416_vm8, %v413_v55, %v3230_v56 }
 0x1ba   :  { %v3233_v63 = vpop.permute.xlu1 %3232  ;;  %v421_v0 = vpack.c.bf16 %v418_v60, %v417_v59 }
 0x1bb   :  { %v3235_v1 = vunpack.i.h.bf16 %v3233_v63  ;;  %v3234_v4 = vunpack.i.l.bf16 %v3233_v63 }
 0x1bc   :  { %3100 = vmatprep.mubr.msk.bf16.mxu0 %vm435_vm9, %v421_v0 }
 0x1bd   :  { %v420_v5 = vsel %vm416_vm8, %v415_v61, %v3235_v1  ;;  %v419_v6 = vsel %vm416_vm8, %v414_v62, %v3234_v4 }
 0x1be   :  { %v422_v7 = vpack.c.bf16 %v420_v5, %v419_v6 }
 0x1c0   :  { %3101 = vmatmul.mubr.msk.bf16.vlgmr.msra.gmra.mrb[0].mxu0 %vm435_vm9, %v422_v7 }
 0x293   :  { %v3102_v15 = vpop.f32.mrb[0].mxu0 }
 0x294   :  { %v504_v18 = vmul.f32 %v3102_v15, %v2994_v12  ;;  %v480_v19 = vpop.f32.mrb[1].mxu0 }
 0x295   :  { %v502_v20 = vmul.f32 %v2994_v12, %v480_v19  ;;  %v3103_v21 = vpop.f32.mrb[2].mxu0  ;;  %v3266_v19 = vld [vmem:[#allocation20] ss:$8 sps:$4 sm:$0xff]  }
 0x296   :  { %v515_v22 = vadd.f32 %v2995_v17, %v504_v18  ;;  %v505_v23 = vmul.f32 %v3103_v21, %v2994_v12  ;;  %v483_v24 = vpop.f32.mrb[3].mxu0  ;;  %v3268_v18 = vld [vmem:[#allocation20 + $0x4] ss:$8 sps:$4 sm:$0xff]   ;;  %v3269_v21 = vld [vmem:[#allocation20 + $0x10] ss:$8 sps:$4 sm:$0xff]  }
 0x297   :  { %v513_v26 = vadd.f32 %v2995_v17, %v502_v20  ;;  %v503_v27 = vmul.f32 %v2994_v12, %v483_v24  ;;  %v3271_v20 = vld [vmem:[#allocation20 + $0x14] ss:$8 sps:$4 sm:$0xff]   ;;  %1049 = vmatprep.subr.bf16.mxu0 %v3268_v18  ;;  %v4261_v24 = vld [vmem:[#allocation23] ss:$8 sps:$4 sm:$0xff]  }
 0x298   :  { %v519_v28 = vmax.f32 %v515_v22, 0.0  ;;  %v516_v29 = vadd.f32 %v2995_v17, %v505_v23  ;;  %1050 = vmatpush1.bf16.msra.mxu0 %v3266_v19  ;;  %v4259_v23 = vld [vmem:[#allocation23 + $0x4] ss:$8 sps:$4 sm:$0xff]  }
 0x299   :  { %v517_v30 = vmax.f32 %v513_v26, 0.0  ;;  %v514_v31 = vadd.f32 %v2995_v17, %v503_v27  ;;  %1051 = vmatprep.subr.bf16.mxu0 %v3271_v20  ;;  %1424 = vmatprep.subr.bf16.mxu1 %v4259_v23  ;;  %v4271_v27 = vld [vmem:[#allocation23 + $0x24] ss:$8 sps:$4 sm:$0xff]  }
 0x29a   :  { %v520_v32 = vmax.f32 %v516_v29, 0.0  ;;  %v523_v33 = vrot.slane %v519_v28, 7  ;;  %v535_v39 = vrot.slane %v519_v28, 1 }
 0x29b   :  { %v521_v34 = vrot.slane %v517_v30, 7  ;;  %v518_v35 = vmax.f32 %v514_v31, 0.0  ;;  %v533_v36 = vrot.slane %v517_v30, 1 }
 0x29c   :  { %v524_v37 = vrot.slane %v520_v32, 7  ;;  %v3236_v38 = vpack.i.bf16 %v520_v32, %v519_v28  ;;  %v536_v40 = vrot.slane %v520_v32, 1  ;;  %1052 = vmatpush1.bf16.msra.mxu0 %v3269_v21  ;;  %v4275_v28 = vld [vmem:[#allocation23 + $0x20] ss:$8 sps:$4 sm:$0xff]  }
 0x29d   :  { %v522_v41 = vrot.slane %v518_v35, 7  ;;  %v3241_v42 = vpack.i.bf16 %v518_v35, %v517_v30  ;;  %v534_v43 = vrot.slane %v518_v35, 1  ;;  %1245 = vmatprep.subr.bf16.mxu0 %v4259_v23  ;;  %v4281_v30 = vld [vmem:[#allocation23 + $0x30] ss:$8 sps:$4 sm:$0xff]  }
 0x29e   :  { %3237 = vrot.lane.b32.xlu1 %v3236_v38, %s3801_s25  ;;  %v537_v45 = vsel %vm362_vm0, %v535_v39, %v536_v40  ;;  %v540_v46 = vsel %vm362_vm0, %v536_v40, %v533_v36  ;;  %v525_v47 = vsel %vm337_vm1, %v523_v33, %v524_v37  ;;  %v528_v48 = vsel %vm337_vm1, %v524_v37, %v521_v34 }
 0x29f   :  { %3242 = vrot.lane.b32.xlu0 %v3241_v42, %s3801_s25  ;;  %v544_v50 = vsel %vm4169_vm3, 0.0, %v540_v46  ;;  %v538_v51 = vsel %vm362_vm0, %v534_v43, %v535_v39  ;;  %v539_v52 = vsel %vm362_vm0, %v533_v36, %v534_v43  ;;  %v526_v53 = vsel %vm337_vm1, %v522_v41, %v523_v33  ;;  %s3823_s25 = smov 96   ;;  %v3004_v33 = vld [vmem:[#allocation17] ss:$0 sm:$0xff]  ;;  %v3005_v36 = vld [vmem:[#allocation18] ss:$0 sm:$0xff] }
 0x2a0   :  { %v3251_v54 = vpack.i.bf16 %v544_v50, %v537_v45  ;;  %v542_v55 = vsel %vm4165_vm2, 0.0, %v538_v51  ;;  %v527_v56 = vsel %vm337_vm1, %v521_v34, %v522_v41  ;;  %v531_v63 = vsel %vm4205_vm7, 0.0, %v526_v53 }
 0x2a1   :  { %v3246_v57 = vpack.i.bf16 %v542_v55, %v539_v52  ;;  %v529_v5 = vsel %vm4199_vm5, 0.0, %v528_v48  ;;  %vm1008_vm0 = vcmask 1043459   ;;  %vm1010_vm1 = vcmask 1044484  }
 0x2a2   :  { %3252 = vrot.lane.b32.xlu1 %v3251_v54, %s3806_s30  ;;  %vm1012_vm2 = vcmask 1045509   ;;  %vm1014_vm3 = vcmask 1046534  }
 0x2a3   :  { %3247 = vrot.lane.b32.xlu0 %v3246_v57, %s3806_s30 }
 0x2a6   :  { %723 = vrot.lane.b32.xlu1 %v515_v22, %s3823_s25  ;;  %v3824_v22 = vmov 0  }
 0x2a7   :  { %719 = vrot.lane.b32.xlu0 %v513_v26, %s3823_s25  ;;  %1081 = vmatprep.mubr.bf16.mxu0 %v3824_v22  ;;  %v4269_v26 = vld [vmem:[#allocation23 + $0x10] ss:$8 sps:$4 sm:$0xff]  }
 0x2a8   :  { %3257 = vset.pattern.permute.xlu0 %v3824_v22  ;;  %3256 = vset.pattern.permute.xlu1 %v3824_v22 }
 0x2aa   :  { %725 = vrot.lane.b32.xlu1 %v516_v29, %s3823_s25  ;;  %v4277_v29 = vld [vmem:[#allocation23 + $0x34] ss:$8 sps:$4 sm:$0xff]  }
 0x2ab   :  { %721 = vrot.lane.b32.xlu0 %v514_v31, %s3823_s25  ;;  %v3825_v31 = vmov 1983009808  }
 0x2ac   :  { %v745_v32 = vunpack.c.l.s4 %v3825_v31 }
 0x2ae   :  { %v746_v38 = vunpack.c.0.s8 %v745_v32 }
 0x2b0   :  { %v4286_v50 = vsub.s32 %v746_v38, %v4159_v3 }
 0x310   :  { %v3238_v16 = vpop.permute.xlu1 %3237 }
 0x311   :  { %v3243_v58 = vpop.permute.xlu0 %3242  ;;  %v3240_v59 = vunpack.i.h.bf16 %v3238_v16  ;;  %v3239_v60 = vunpack.i.l.bf16 %v3238_v16 }
 0x312   :  { %v3245_v14 = vunpack.i.h.bf16 %v3243_v58  ;;  %v3244_v61 = vunpack.i.l.bf16 %v3243_v58 }
 0x313   :  { %v580_v6 = vsel %vm577_vm10, %v531_v63, %v3239_v60  ;;  %v581_v7 = vsel %vm577_vm10, %v525_v47, %v3240_v59 }
 0x314   :  { %v3253_v62 = vpop.permute.xlu1 %3252  ;;  %v578_v12 = vsel %vm577_vm10, %v529_v5, %v3244_v61  ;;  %v579_v49 = vsel %vm577_vm10, %v527_v56, %v3245_v14 }
 0x315   :  { %v3255_v0 = vunpack.i.h.bf16 %v3253_v62  ;;  %v3254_v1 = vunpack.i.l.bf16 %v3253_v62  ;;  %v3248_v4 = vpop.permute.xlu0 %3247 }
 0x316   :  { %v3250_v8 = vunpack.i.h.bf16 %v3248_v4  ;;  %v3249_v9 = vunpack.i.l.bf16 %v3248_v4 }
 0x317   :  { %v585_v10 = vsel %vm582_vm11, %v580_v6, %v3254_v1  ;;  %v586_v11 = vsel %vm582_vm11, %v581_v7, %v3255_v0 }
 0x318   :  { %v588_v13 = vpack.c.bf16 %v586_v11, %v585_v10  ;;  %v583_v15 = vsel %vm582_vm11, %v578_v12, %v3249_v9  ;;  %v584_v44 = vsel %vm582_vm11, %v579_v49, %v3250_v8  ;;  %v724_v34 = vpop.permute.xlu1 %723 }
 0x319   :  { %v587_v17 = vpack.c.bf16 %v584_v44, %v583_v15  ;;  %v720_v47 = vpop.permute.xlu0 %719 }
 0x31b   :  { %3116 = vmatprep.mubr.msk.bf16.mxu1 %vm637_vm12, %v587_v17 }
 0x31c   :  { %3117 = vmatmul.mubr.msk.bf16.vlgmr.msra.gmra.mrb[0].mxu1 %vm637_vm12, %v588_v13  ;;  %v726_v52 = vpop.permute.xlu1 %725 }
 0x31d   :  { %1456 = vmatprep.mubr.bf16.mxu1 %v3824_v22  ;;  %1425 = vmatpush1.bf16.msra.mxu1 %v4261_v24 }
 0x31e   :  { %1426 = vmatprep.subr.bf16.mxu1 %v4264_v25 }
 0x321   :  { %1427 = vmatpush1.bf16.msra.mxu1 %v4269_v26 }
 0x322   :  { %1428 = vmatprep.subr.bf16.mxu1 %v4271_v27 }
 0x325   :  { %1429 = vmatpush1.bf16.msra.mxu1 %v4275_v28 }
 0x326   :  { %1430 = vmatprep.subr.bf16.mxu1 %v4277_v29 }
 0x329   :  { %1431 = vmatpush1.bf16.msra.mxu1 %v4281_v30 }
 0x32a   :  { %1792 = vmatprep.subr.bf16.mxu1 %v4259_v23 }
 0x3ef   :  { %v3118_v35 = vpop.f32.mrb[0].mxu1 }
 0x3f0   :  { %v702_v37 = vmul.f32 %v3118_v35, %v3004_v33  ;;  %v678_v39 = vpop.f32.mrb[1].mxu1 }
 0x3f1   :  { %v700_v40 = vmul.f32 %v3004_v33, %v678_v39  ;;  %v3119_v41 = vpop.f32.mrb[2].mxu1 }
 0x3f2   :  { %v713_v42 = vadd.f32 %v3005_v36, %v702_v37  ;;  %v703_v43 = vmul.f32 %v3119_v41, %v3004_v33  ;;  %v681_v45 = vpop.f32.mrb[3].mxu1 }
 0x3f3   :  { %v711_v46 = vadd.f32 %v3005_v36, %v700_v40  ;;  %v701_v54 = vmul.f32 %v3004_v33, %v681_v45 }
 0x3f4   :  { %v733_v48 = vadd.f32 %v724_v34, %v713_v42  ;;  %v714_v51 = vadd.f32 %v3005_v36, %v703_v43 }
 0x3f5   :  { %v731_v53 = vadd.f32 %v720_v47, %v711_v46  ;;  %v4290_v14 = vadd.f32 %v3005_v36, %v701_v54 }
 0x3f6   :  { %v737_v55 = vmax.f32 %v733_v48, 0.0  ;;  %v734_v56 = vadd.f32 %v726_v52, %v714_v51 }
 0x3f7   :  { %v735_v57 = vmax.f32 %v731_v53, 0.0 }
 0x3f8   :  { %v777_v16 = vcombine.high %v737_v55, %v737_v55  ;;  %v784_v58 = vrot.slane %v737_v55, %v4286_v50  ;;  %v4294_v0 = vmax.f32 %v734_v56, 0.0 }
 0x3f9   :  { %v743_v59 = vcombine.high %v735_v57, %v735_v57  ;;  %v750_v60 = vrot.slane %v735_v57, %v4286_v50 }
 0x3fa   :  { %v791_v61 = vrot.slane %v777_v16, %v4286_v50  ;;  %v792_v62 = vcombine.high %v784_v58, %v784_v58  ;;  %v884_v63 = vsel %vm827_vm13, %v784_v58, -inf }
 0x3fb   :  { %v885_v1 = vrot.slane %v884_v63, 4  ;;  %v757_v4 = vrot.slane %v743_v59, %v4286_v50  ;;  %v758_v5 = vcombine.high %v750_v60, %v750_v60  ;;  %v828_v6 = vsel %vm827_vm13, %v750_v60, -inf }
 0x3fc   :  { %v793_v7 = vcombine.high %v791_v61, %v791_v61  ;;  %v891_v8 = vsel %vm827_vm13, %v792_v62, -inf  ;;  %v898_v9 = vsel %vm827_vm13, %v791_v61, -inf  ;;  %v829_v10 = vrot.slane %v828_v6, 4 }
 0x3fd   :  { %v886_v11 = vmax.f32 %v884_v63, %v885_v1  ;;  %v892_v12 = vrot.slane %v891_v8, 4  ;;  %v899_v49 = vrot.slane %v898_v9, 4  ;;  %v759_v13 = vcombine.high %v757_v4, %v757_v4 }
 0x3fe   :  { %v905_v15 = vsel %vm827_vm13, %v793_v7, -inf  ;;  %v830_v44 = vmax.f32 %v828_v6, %v829_v10  ;;  %v835_v17 = vsel %vm827_vm13, %v758_v5, -inf  ;;  %v842_v18 = vsel %vm827_vm13, %v757_v4, -inf }
 0x3ff   :  { %v887_v19 = vrot.slane %v886_v11, 2  ;;  %v893_v20 = vmax.f32 %v891_v8, %v892_v12  ;;  %v900_v21 = vmax.f32 %v898_v9, %v899_v49  ;;  %v906_v31 = vrot.slane %v905_v15, 4  ;;  %v722_v9 = vpop.permute.xlu0 %721 }
 0x400   :  { %v831_v32 = vrot.slane %v830_v44, 2  ;;  %v836_v33 = vrot.slane %v835_v17, 4  ;;  %v843_v34 = vrot.slane %v842_v18, 4  ;;  %v849_v35 = vsel %vm827_vm13, %v759_v13, -inf }
 0x401   :  { %v888_v36 = vmax.f32 %v886_v11, %v887_v19  ;;  %v894_v37 = vrot.slane %v893_v20, 2  ;;  %v901_v38 = vrot.slane %v900_v21, 2  ;;  %v907_v39 = vmax.f32 %v905_v15, %v906_v31 }
 0x402   :  { %v832_v40 = vmax.f32 %v830_v44, %v831_v32  ;;  %v837_v41 = vmax.f32 %v835_v17, %v836_v33  ;;  %v844_v42 = vmax.f32 %v842_v18, %v843_v34  ;;  %v850_v43 = vrot.slane %v849_v35, 4 }
 0x403   :  { %v889_v45 = vrot.slane %v888_v36, 1  ;;  %v895_v46 = vmax.f32 %v893_v20, %v894_v37  ;;  %v902_v47 = vmax.f32 %v900_v21, %v901_v38  ;;  %v908_v48 = vrot.slane %v907_v39, 2 }
 0x404   :  { %v833_v51 = vrot.slane %v832_v40, 1  ;;  %v838_v52 = vrot.slane %v837_v41, 2  ;;  %v845_v53 = vrot.slane %v844_v42, 2  ;;  %v851_v54 = vmax.f32 %v849_v35, %v850_v43 }
 0x405   :  { %v890_v55 = vmax.f32 %v888_v36, %v889_v45  ;;  %v896_v56 = vrot.slane %v895_v46, 1  ;;  %v903_v57 = vrot.slane %v902_v47, 1  ;;  %v909_v16 = vmax.f32 %v907_v39, %v908_v48 }
 0x406   :  { %v834_v58 = vmax.f32 %v832_v40, %v833_v51  ;;  %v839_v59 = vmax.f32 %v837_v41, %v838_v52  ;;  %v846_v60 = vmax.f32 %v844_v42, %v845_v53  ;;  %v852_v61 = vrot.slane %v851_v54, 2 }
 0x407   :  { %v897_v62 = vmax.f32 %v895_v46, %v896_v56  ;;  %v904_v63 = vmax.f32 %v902_v47, %v903_v57  ;;  %v910_v1 = vrot.slane %v909_v16, 1  ;;  %v948_v4 = vpack.c.bf16 %v890_v55, %v890_v55 }
 0x408   :  { %v840_v5 = vrot.slane %v839_v59, 1  ;;  %v847_v6 = vrot.slane %v846_v60, 1  ;;  %v853_v7 = vmax.f32 %v851_v54, %v852_v61  ;;  %v794_v8 = vcombine.high %v4294_v0, %v4294_v0 }
 0x409   :  { %v911_v10 = vmax.f32 %v909_v16, %v910_v1  ;;  %v949_v11 = vpack.c.bf16 %v897_v62, %v897_v62  ;;  %v950_v12 = vpack.c.bf16 %v904_v63, %v904_v63  ;;  %v732_v44 = vadd.f32 %v722_v9, %v4290_v14 }
 0x40a   :  { %v841_v49 = vmax.f32 %v839_v59, %v840_v5  ;;  %v848_v13 = vmax.f32 %v846_v60, %v847_v6  ;;  %v854_v15 = vrot.slane %v853_v7, 1  ;;  %v996_v17 = vunpack.c.l.b16 %v948_v4 }
 0x40b   :  { %v997_v18 = vunpack.c.l.b16 %v949_v11  ;;  %v940_v19 = vpack.c.bf16 %v834_v58, %v834_v58  ;;  %v801_v20 = vrot.slane %v4294_v0, %v4286_v50  ;;  %v951_v21 = vpack.c.bf16 %v911_v10, %v911_v10 }
 0x40c   :  { %v855_v31 = vmax.f32 %v853_v7, %v854_v15  ;;  %v941_v32 = vpack.c.bf16 %v841_v49, %v841_v49  ;;  %v808_v33 = vrot.slane %v794_v8, %v4286_v50  ;;  %v998_v34 = vunpack.c.l.b16 %v950_v12 }
 0x40d   :  { %v942_v35 = vpack.c.bf16 %v848_v13, %v848_v13  ;;  %v809_v36 = vcombine.high %v801_v20, %v801_v20  ;;  %v912_v37 = vsel %vm827_vm13, %v801_v20, -inf  ;;  %v1018_v38 = vsel %vm1004_vm14, %v997_v18, %v996_v17 }
 0x40e   :  { %v943_v39 = vpack.c.bf16 %v855_v31, %v855_v31  ;;  %v989_v14 = vunpack.c.l.b16 %v941_v32  ;;  %v736_v40 = vmax.f32 %v732_v44, 0.0  ;;  %v810_v41 = vcombine.high %v808_v33, %v808_v33 }
 0x40f   :  { %v913_v42 = vrot.slane %v912_v37, 4  ;;  %v919_v43 = vsel %vm827_vm13, %v809_v36, -inf  ;;  %v926_v0 = vsel %vm827_vm13, %v808_v33, -inf  ;;  %v999_v45 = vunpack.c.l.b16 %v951_v21 }
 0x410   :  { %v988_v46 = vunpack.c.l.b16 %v940_v19  ;;  %v920_v47 = vrot.slane %v919_v43, 4  ;;  %v927_v48 = vrot.slane %v926_v0, 4  ;;  %v1019_v51 = vsel %vm1006_vm15, %v998_v34, %v1018_v38 }
 0x411   :  { %v4315_v52 = vunpack.c.l.b16 %v942_v35  ;;  %v914_v53 = vmax.f32 %v912_v37, %v913_v42  ;;  %v933_v54 = vsel %vm827_vm13, %v810_v41, -inf  ;;  %v760_v16 = vcombine.high %v736_v40, %v736_v40 }
 0x412   :  { %v921_v55 = vmax.f32 %v919_v43, %v920_v47  ;;  %v928_v56 = vmax.f32 %v926_v0, %v927_v48  ;;  %v934_v57 = vrot.slane %v933_v54, 4  ;;  %v4318_v58 = vunpack.c.l.b16 %v943_v39 }
 0x413   :  { %v1005_v59 = vsel %vm1004_vm14, %v989_v14, %v988_v46  ;;  %v915_v60 = vrot.slane %v914_v53, 2  ;;  %v767_v61 = vrot.slane %v736_v40, %v4286_v50  ;;  %v774_v4 = vrot.slane %v760_v16, %v4286_v50 }
 0x414   :  { %v922_v62 = vrot.slane %v921_v55, 2  ;;  %v929_v63 = vrot.slane %v928_v56, 2  ;;  %v935_v1 = vmax.f32 %v933_v54, %v934_v57  ;;  %v1020_v6 = vsel %vm1008_vm0, %v999_v45, %v1019_v51 }
 0x415   :  { %v916_v5 = vmax.f32 %v914_v53, %v915_v60  ;;  %v775_v7 = vcombine.high %v767_v61, %v767_v61  ;;  %v856_v8 = vsel %vm827_vm13, %v767_v61, -inf  ;;  %v776_v12 = vcombine.high %v774_v4, %v774_v4 }
 0x416   :  { %v923_v9 = vmax.f32 %v921_v55, %v922_v62  ;;  %v930_v10 = vmax.f32 %v928_v56, %v929_v63  ;;  %v936_v11 = vrot.slane %v935_v1, 2  ;;  %v857_v13 = vrot.slane %v856_v8, 4 }
 0x417   :  { %v917_v49 = vrot.slane %v916_v5, 1  ;;  %v863_v15 = vsel %vm827_vm13, %v775_v7, -inf  ;;  %v870_v44 = vsel %vm827_vm13, %v774_v4, -inf  ;;  %v877_v32 = vsel %vm827_vm13, %v776_v12, -inf }
 0x418   :  { %v924_v50 = vrot.slane %v923_v9, 1  ;;  %v931_v17 = vrot.slane %v930_v10, 1  ;;  %v937_v18 = vmax.f32 %v935_v1, %v936_v11  ;;  %v864_v19 = vrot.slane %v863_v15, 4 }
 0x419   :  { %v918_v20 = vmax.f32 %v916_v5, %v917_v49  ;;  %v858_v21 = vmax.f32 %v856_v8, %v857_v13  ;;  %v871_v31 = vrot.slane %v870_v44, 4  ;;  %v878_v14 = vrot.slane %v877_v32, 4 }
 0x41a   :  { %v925_v33 = vmax.f32 %v923_v9, %v924_v50  ;;  %v932_v34 = vmax.f32 %v930_v10, %v931_v17  ;;  %v938_v35 = vrot.slane %v937_v18, 1  ;;  %v865_v36 = vmax.f32 %v863_v15, %v864_v19 }
 0x41b   :  { %v952_v37 = vpack.c.bf16 %v918_v20, %v918_v20  ;;  %v859_v38 = vrot.slane %v858_v21, 2  ;;  %v872_v39 = vmax.f32 %v870_v44, %v871_v31  ;;  %v879_v47 = vmax.f32 %v877_v32, %v878_v14  ;;  %v960_v32 = vld [vmem:[#allocation21] sm:$0x3] }
 0x41c   :  { %v939_v40 = vmax.f32 %v937_v18, %v938_v35  ;;  %v953_v41 = vpack.c.bf16 %v925_v33, %v925_v33  ;;  %v954_v42 = vpack.c.bf16 %v932_v34, %v932_v34  ;;  %v866_v43 = vrot.slane %v865_v36, 2 }
 0x41d   :  { %v1000_v0 = vunpack.c.l.b16 %v952_v37  ;;  %v860_v45 = vmax.f32 %v858_v21, %v859_v38  ;;  %v873_v46 = vrot.slane %v872_v39, 2  ;;  %v880_v16 = vrot.slane %v879_v47, 2 }
 0x41e   :  { %v1001_v48 = vunpack.c.l.b16 %v953_v41  ;;  %v1002_v51 = vunpack.c.l.b16 %v954_v42  ;;  %v867_v53 = vmax.f32 %v865_v36, %v866_v43  ;;  %v955_v54 = vpack.c.bf16 %v939_v40, %v939_v40 }
 0x41f   :  { %v1021_v55 = vsel %vm1010_vm1, %v1000_v0, %v1020_v6  ;;  %v861_v56 = vrot.slane %v860_v45, 1  ;;  %v874_v57 = vmax.f32 %v872_v39, %v873_v46  ;;  %v1007_v60 = vsel %vm1006_vm15, %v4315_v52, %v1005_v59 }
 0x420   :  { %v868_v61 = vrot.slane %v867_v53, 1  ;;  %v1003_v62 = vunpack.c.l.b16 %v955_v54  ;;  %v1022_v63 = vsel %vm1012_vm2, %v1001_v48, %v1021_v55  ;;  %v881_v5 = vmax.f32 %v879_v47, %v880_v16 }
 0x421   :  { %v862_v1 = vmax.f32 %v860_v45, %v861_v56  ;;  %v875_v4 = vrot.slane %v874_v57, 1  ;;  %v1023_v7 = vsel %vm1014_vm3, %v1002_v51, %v1022_v63  ;;  %v1009_v49 = vsel %vm1008_vm0, %v4318_v58, %v1007_v60 }
 0x422   :  { %v869_v8 = vmax.f32 %v867_v53, %v868_v61  ;;  %v1024_v9 = vsel %vm1016_vm4, %v1003_v62, %v1023_v7  ;;  %v882_v6 = vrot.slane %v881_v5, 1  ;;  %v964_v58 = vsub.s32 0, %v4159_v3 }
 0x423   :  { %v876_v10 = vmax.f32 %v874_v57, %v875_v4  ;;  %v944_v11 = vpack.c.bf16 %v862_v1, %v862_v1  ;;  %v968_v33 = vsub.s32 1, %v4159_v3  ;;  %v1097_v40 = vand.u32 127, %v276_v2 }
 0x424   :  { %v945_v12 = vpack.c.bf16 %v869_v8, %v869_v8  ;;  %v883_v52 = vmax.f32 %v881_v5, %v882_v6  ;;  %v965_v34 = vrot.slane %v960_v32, %v964_v58  ;;  %v3826_v43 = vmov 1966171168  }
 0x425   :  { %v946_v59 = vpack.c.bf16 %v876_v10, %v876_v10  ;;  %v992_v13 = vunpack.c.l.b16 %v944_v11  ;;  %v969_v35 = vrot.slane %v960_v32, %v968_v33  ;;  %v1150_v0 = vunpack.c.l.s4 %v3826_v43  ;;  %v2614_v11 = vld [vmem:[#allocation24 + $0x10] sm:$0xff] }
 0x426   :  { %v993_v15 = vunpack.c.l.b16 %v945_v12  ;;  %v947_v17 = vpack.c.bf16 %v883_v52, %v883_v52  ;;  %v1098_v46 = vadd.s32 128, %v1097_v40  ;;  %v1103_v48 = vand.u32 63, %v1097_v40 }
 0x427   :  { %v994_v44 = vunpack.c.l.b16 %v946_v59  ;;  %v1011_v50 = vsel %vm1010_vm1, %v992_v13, %v1009_v49  ;;  %v1151_v47 = vunpack.c.0.s8 %v1150_v0  ;;  %vm1342_vm1 = vcmask 253952  }
 0x428   :  { %v1013_v18 = vsel %vm1012_vm2, %v993_v15, %v1011_v50  ;;  %v995_v19 = vunpack.c.l.b16 %v947_v17  ;;  %v1110_v51 = vand.u32 63, %v1098_v46  ;;  %vm4368_vm5 = vcmp.lt.s32.totalorder %v1103_v48, 32 }
 0x429   :  { %v1015_v20 = vsel %vm1014_vm3, %v994_v44, %v1013_v18  ;;  %v4364_v55 = vsub.s32 %v1151_v47, %v4159_v3  ;;  %vm1345_vm2 = vcmask 516352  }
 0x42a   :  { %v1017_v21 = vsel %vm1016_vm4, %v995_v19, %v1015_v20  ;;  %vm4372_vm6 = vcmp.lt.s32.totalorder %v1110_v51, 32 }
 0x42b   :  { %v1025_v31 = vpack.c.b16 %v1024_v9, %v1017_v21 }
 0x42d   :  { %3010 = vmatmul.mubr.msk.bf16.vlgmr.msra.gmra.mrb[4].mxu0 %vm577_vm10, %v1025_v31 }
 0x42e   :  { %1246 = vmatpush1.bf16.msra.mxu0 %v4261_v24  ;;  %1277 = vmatprep.mubr.bf16.mxu0 %v3824_v22 }
 0x42f   :  { %1247 = vmatprep.subr.bf16.mxu0 %v4264_v25 }
 0x432   :  { %1248 = vmatpush1.bf16.msra.mxu0 %v4269_v26 }
 0x433   :  { %1249 = vmatprep.subr.bf16.mxu0 %v4271_v27 }
 0x436   :  { %1250 = vmatpush1.bf16.msra.mxu0 %v4275_v28 }
 0x437   :  { %1251 = vmatprep.subr.bf16.mxu0 %v4277_v29 }
 0x43a   :  { %1252 = vmatpush1.bf16.msra.mxu0 %v4281_v30 }
 0x43b   :  { %1608 = vmatprep.subr.bf16.mxu0 %v4259_v23 }
 0x43d   :  { %1278 = vmatmul.mubr.bf16.vlgmr.msra.gmra.mrb[8].mxu0 %v3824_v22 }
 0x43e   :  { %1609 = vmatpush1.bf16.msra.mxu0 %v4261_v24  ;;  %1640 = vmatprep.mubr.bf16.mxu0 %v3824_v22 }
 0x43f   :  { %1610 = vmatprep.subr.bf16.mxu0 %v4264_v25 }
 0x442   :  { %1611 = vmatpush1.bf16.msra.mxu0 %v4269_v26 }
 0x443   :  { %1612 = vmatprep.subr.bf16.mxu0 %v4271_v27 }
 0x446   :  { %1613 = vmatpush1.bf16.msra.mxu0 %v4275_v28 }
 0x447   :  { %1614 = vmatprep.subr.bf16.mxu0 %v4277_v29 }
 0x44a   :  { %1615 = vmatpush1.bf16.msra.mxu0 %v4281_v30 }
 0x44b   :  { %1972 = vmatprep.subr.bf16.mxu0 %v4259_v23 }
 0x500   :  { %v1083_v36 = vpop.f32.mrb[4].mxu0 }
 0x501   :  { %v1084_v37 = vadd.f32 %v1083_v36, %v965_v34  ;;  %v1085_v38 = vpop.f32.mrb[5].mxu0 }
 0x502   :  { %v1086_v39 = vadd.f32 %v1085_v38, %v969_v35  ;;  %v1087_v14 = vpop.f32.mrb[6].mxu0 }
 0x503   :  { %1092 = vst [vmem:[#allocation2] sm:$0xff] %v1084_v37  ;;  %v1088_v41 = vadd.f32 %v1087_v14, %v965_v34  ;;  %v1089_v42 = vpop.f32.mrb[7].mxu0 }
 0x504   :  { %1093 = vst [vmem:[#allocation2 + $0x8] sm:$0xff] %v1086_v39  ;;  %v1090_v45 = vadd.f32 %v1089_v42, %v969_v35 }
 0x505   :  { %1094 = vst [vmem:[#allocation2 + $0x10] sm:$0xff] %v1088_v41 }
 0x506   :  { %1095 = vst [vmem:[#allocation2 + $0x18] sm:$0xff] %v1090_v45 }
 0x50b   :  { %v1135_v53 = vld [vmem:[#allocation2] ss:$8 sm:$0x3]  ;;  %v1139_v54 = vld [vmem:[#allocation2 + $0x7] ss:$8 sm:$0x3] }
 0x50c   :  { %v1349_v56 = vld [vmem:[#allocation2 + $0x1] ss:$8 sm:$0x3]  ;;  %v1353_v2 = vld [vmem:[#allocation2 + $0x6] ss:$8 sm:$0x3] }
 0x50d   :  { %v1137_v57 = vld [vmem:[#allocation2 + $0x10] ss:$8 sm:$0x3]  ;;  %v1141_v16 = vld [vmem:[#allocation2 + $0x17] ss:$8 sm:$0x3] }
 0x50e   :  { %v1148_v60 = vcombine.low %v1135_v53, %v1137_v57  ;;  %v1175_v61 = vcombine.low %v1139_v54, %v1141_v16  ;;  %v1351_v62 = vld [vmem:[#allocation2 + $0x11] ss:$8 sm:$0x3]  ;;  %v1355_v63 = vld [vmem:[#allocation2 + $0x16] ss:$8 sm:$0x3] }
 0x50f   :  { %v1358_v1 = vcombine.low %v1349_v56, %v1351_v62  ;;  %v1385_v4 = vcombine.low %v1353_v2, %v1355_v63  ;;  %v1533_v5 = vld [vmem:[#allocation2 + $0x2] ss:$8 sm:$0x3]  ;;  %v1535_v7 = vld [vmem:[#allocation2 + $0x12] ss:$8 sm:$0x3] }
 0x510   :  { %v1155_v8 = vrot.slane %v1148_v60, %v4364_v55  ;;  %v1182_v9 = vrot.slane %v1175_v61, %v4364_v55  ;;  %v1279_v10 = vpop.f32.mrb[8].mxu0  ;;  %v1542_v6 = vcombine.low %v1533_v5, %v1535_v7  ;;  %v1537_v31 = vld [vmem:[#allocation2 + $0x5] ss:$8 sm:$0x3] }
 0x511   :  { %v1281_v12 = vpop.f32.mrb[9].mxu0  ;;  %v1365_v49 = vrot.slane %v1358_v1, %v4364_v55  ;;  %v1392_v52 = vrot.slane %v1385_v4, %v4364_v55  ;;  %v1539_v58 = vld [vmem:[#allocation2 + $0x15] ss:$8 sm:$0x3] }
 0x512   :  { %v1163_v59 = vrot.slane %v1155_v8, %v4364_v55  ;;  %v1190_v13 = vrot.slane %v1182_v9, %v4364_v55  ;;  %v1156_v15 = vcombine.high %v1155_v8, %v1155_v8  ;;  %v1183_v44 = vcombine.high %v1182_v9, %v1182_v9  ;;  %v1283_v50 = vpop.f32.mrb[10].mxu0  ;;  %v1717_v36 = vld [vmem:[#allocation2 + $0x3] ss:$8 sm:$0x3] }
 0x513   :  { %v1284_v17 = vpop.f32.mrb[11].mxu0  ;;  %v1373_v18 = vrot.slane %v1365_v49, %v4364_v55  ;;  %v1400_v19 = vrot.slane %v1392_v52, %v4364_v55  ;;  %v1366_v20 = vcombine.high %v1365_v49, %v1365_v49  ;;  %v1393_v21 = vcombine.high %v1392_v52, %v1392_v52  ;;  %v1719_v37 = vld [vmem:[#allocation2 + $0x13] ss:$8 sm:$0x3] }
 0x514   :  { %v1200_v32 = vsel %vm4368_vm5, %v1163_v59, %v1190_v13  ;;  %v1170_v33 = vrot.slane %v1156_v15, %v4364_v55  ;;  %v1197_v34 = vrot.slane %v1183_v44, %v4364_v55  ;;  %v1549_v35 = vrot.slane %v1542_v6, %v4364_v55  ;;  %v1723_v41 = vld [vmem:[#allocation2 + $0x14] ss:$8 sm:$0x3]  ;;  %v1721_v46 = vld [vmem:[#allocation2 + $0x4] ss:$8 sm:$0x3] }
 0x515   :  { %v1286_v38 = vadd.f32 %v1279_v10, %v1200_v32  ;;  %v4389_v39 = vsel %vm4368_vm5, %v1373_v18, %v1400_v19  ;;  %v4392_v14 = vrot.slane %v1366_v20, %v4364_v55  ;;  %v4395_v40 = vrot.slane %v1393_v21, %v4364_v55  ;;  %v1901_v42 = vld [vmem:[#allocation2 + $0x14] ss:$8 sm:$0x3]  ;;  %v1903_v47 = vld [vmem:[#allocation2 + $0x13] ss:$8 sm:$0x3] }
 0x516   :  { %v1201_v43 = vsel %vm4372_vm6, %v1170_v33, %v1197_v34  ;;  %v1569_v0 = vcombine.low %v1537_v31, %v1539_v58  ;;  %v1550_v45 = vcombine.high %v1549_v35, %v1549_v35  ;;  %v1726_v54 = vcombine.low %v1717_v36, %v1719_v37  ;;  %v1900_v56 = vld [vmem:[#allocation2 + $0x4] ss:$8 sm:$0x3]  ;;  %v1902_v60 = vld [vmem:[#allocation2 + $0x3] ss:$8 sm:$0x3] }
 0x517   :  { %v3019_v48 = vmul.f32 -1.442695, %v1286_v38  ;;  %v4399_v51 = vadd.f32 %v1281_v12, %v1201_v43  ;;  %v1411_v53 = vsel %vm4372_vm6, %v4392_v14, %v4395_v40  ;;  %v1557_v2 = vrot.slane %v1549_v35, %v4364_v55  ;;  %v2081_v6 = vld [vmem:[#allocation2 + $0x15] ss:$8 sm:$0x3] }
 0x518   :  { %v1576_v57 = vrot.slane %v1569_v0, %v4364_v55  ;;  %v1753_v16 = vcombine.low %v1721_v46, %v1723_v41  ;;  %v1906_v61 = vcombine.low %v1900_v56, %v1901_v42  ;;  %v1733_v62 = vrot.slane %v1726_v54, %v4364_v55  ;;  %v2080_v13 = vld [vmem:[#allocation2 + $0x5] ss:$8 sm:$0x3]  ;;  %v2083_v15 = vld [vmem:[#allocation2 + $0x12] ss:$8 sm:$0x3] }
 0x519   :  { %3288 = vpow2.f32 %v3019_v48  ;;  %v1933_v63 = vcombine.low %v1902_v60, %v1903_v47  ;;  %v4410_v4 = vrot.slane %v1550_v45, %v4364_v55  ;;  %v2261_v19 = vld [vmem:[#allocation2 + $0x16] ss:$8 sm:$0x3]  ;;  %v2263_v20 = vld [vmem:[#allocation2 + $0x11] ss:$8 sm:$0x3]  ;;  %v2086_v33 = vcombine.low %v2080_v13, %v2081_v6 }
 0x51a   :  { %v1584_v1 = vrot.slane %v1576_v57, %v4364_v55  ;;  %v1577_v5 = vcombine.high %v1576_v57, %v1576_v57  ;;  %v1760_v7 = vrot.slane %v1753_v16, %v4364_v55  ;;  %3290 = vtanh.f32 %v4399_v51  ;;  %v2082_v32 = vld [vmem:[#allocation2 + $0x2] ss:$8 sm:$0x3]  ;;  %v2441_v34 = vld [vmem:[#allocation2 + $0x17] ss:$8 sm:$0x3] }
 0x51b   :  { %v1741_v8 = vrot.slane %v1733_v62, %v4364_v55  ;;  %v1734_v9 = vcombine.high %v1733_v62, %v1733_v62  ;;  %v1913_v10 = vrot.slane %v1906_v61, %v4364_v55  ;;  %v1940_v17 = vrot.slane %v1933_v63, %v4364_v55  ;;  %v2260_v41 = vld [vmem:[#allocation2 + $0x6] ss:$8 sm:$0x3]  ;;  %v2262_v42 = vld [vmem:[#allocation2 + $0x1] ss:$8 sm:$0x3] }
 0x51c   :  { %v4418_v12 = vsel %vm4368_vm5, %v1557_v2, %v1584_v1  ;;  %v4421_v49 = vrot.slane %v1577_v5, %v4364_v55  ;;  %v1768_v52 = vrot.slane %v1760_v7, %v4364_v55  ;;  %v1761_v59 = vcombine.high %v1760_v7, %v1760_v7  ;;  %v2440_v47 = vld [vmem:[#allocation2 + $0x7] ss:$8 sm:$0x3] }
 0x51d   :  { %v4425_v44 = vrot.slane %v1734_v9, %v4364_v55  ;;  %v1921_v50 = vrot.slane %v1913_v10, %v4364_v55  ;;  %v1914_v18 = vcombine.high %v1913_v10, %v1913_v10  ;;  %v1948_v35 = vrot.slane %v1940_v17, %v4364_v55 }
 0x51e   :  { %v1595_v21 = vsel %vm4372_vm6, %v4410_v4, %v4421_v49  ;;  %v4435_v31 = vsel %vm4368_vm5, %v1741_v8, %v1768_v52  ;;  %v4438_v58 = vrot.slane %v1761_v59, %v4364_v55  ;;  %v1941_v37 = vcombine.high %v1940_v17, %v1940_v17  ;;  %v2443_v52 = vld [vmem:[#allocation2 + $0x10] ss:$8 sm:$0x3] }
 0x51f   :  { %v4442_v36 = vrot.slane %v1914_v18, %v4364_v55  ;;  %v2113_v38 = vcombine.low %v2082_v32, %v2083_v15  ;;  %v2093_v0 = vrot.slane %v2086_v33, %v4364_v55  ;;  %v2266_v45 = vcombine.low %v2260_v41, %v2261_v19  ;;  %v2442_v19 = vld [vmem:[#allocation2] ss:$8 sm:$0x3] }
 0x520   :  { %v1779_v43 = vsel %vm4372_vm6, %v4425_v44, %v4438_v58  ;;  %v2293_v46 = vcombine.low %v2262_v42, %v2263_v20  ;;  %v4451_v48 = vsel %vm4368_vm5, %v1921_v50, %v1948_v35  ;;  %v4454_v54 = vrot.slane %v1941_v37, %v4364_v55 }
 0x521   :  { %v2120_v56 = vrot.slane %v2113_v38, %v4364_v55  ;;  %v2446_v2 = vcombine.low %v2440_v47, %v2441_v34  ;;  %v2101_v57 = vrot.slane %v2093_v0, %v4364_v55  ;;  %v2094_v16 = vcombine.high %v2093_v0, %v2093_v0 }
 0x522   :  { %v2273_v60 = vrot.slane %v2266_v45, %v4364_v55  ;;  %v2300_v61 = vrot.slane %v2293_v46, %v4364_v55  ;;  %v1959_v63 = vsel %vm4372_vm6, %v4442_v36, %v4454_v54  ;;  %v2473_v34 = vcombine.low %v2442_v19, %v2443_v52 }
 0x523   :  { %v3289_v62 = vpop.eup %3288  ;;  %v2128_v1 = vrot.slane %v2120_v56, %v4364_v55  ;;  %v2121_v5 = vcombine.high %v2120_v56, %v2120_v56  ;;  %v2453_v7 = vrot.slane %v2446_v2, %v4364_v55  ;;  %v4467_v9 = vrot.slane %v2094_v16, %v4364_v55 }
 0x524   :  { %v1291_v8 = vadd.f32 1.0, %v3289_v62  ;;  %v2281_v10 = vrot.slane %v2273_v60, %v4364_v55  ;;  %v2308_v6 = vrot.slane %v2300_v61, %v4364_v55  ;;  %v3291_v59 = vpop.eup %3290  ;;  %v2274_v50 = vcombine.high %v2273_v60, %v2273_v60 }
 0x525   :  { %v4473_v13 = vsel %vm4368_vm5, %v2101_v57, %v2128_v1  ;;  %v4476_v15 = vrot.slane %v2121_v5, %v4364_v55  ;;  %v2301_v17 = vcombine.high %v2300_v61, %v2300_v61  ;;  %v2454_v35 = vcombine.high %v2453_v7, %v2453_v7 }
 0x526   :  { %3292 = vrcp.f32 %v1291_v8  ;;  %v4480_v18 = vsel %vm4368_vm5, %v2281_v10, %v2308_v6  ;;  %v4487_v32 = vrot.slane %v2274_v50, %v4364_v55  ;;  %v2461_v38 = vrot.slane %v2453_v7, %v4364_v55  ;;  %v4521_v6 = vld [vmem:[#allocation9 + $0x2] sm:$0x3] }
 0x527   :  { %v2139_v20 = vsel %vm4372_vm6, %v4467_v9, %v4476_v15  ;;  %v4490_v33 = vrot.slane %v2301_v17, %v4364_v55  ;;  %v2480_v41 = vrot.slane %v2473_v34, %v4364_v55  ;;  %v4500_v0 = vrot.slane %v2454_v35, %v4364_v55 }
 0x528   :  { %v3020_v16 = vmul.f32 -1.442695, %v4399_v51  ;;  %v4519_v51 = vld [vmem:[#allocation9] sm:$0x3]  ;;  %vm1313_vm8 = vcmp.gt.s32.totalorder %v4521_v6, 0  ;;  %vm1311_vm13 = vcmp.le.s32.totalorder %v4521_v6, 0 }
 0x529   :  { %v2319_v37 = vsel %vm4372_vm6, %v4487_v32, %v4490_v33  ;;  %v2488_v42 = vrot.slane %v2480_v41, %v4364_v55  ;;  %v2481_v45 = vcombine.high %v2480_v41, %v2480_v41  ;;  %vm1312_vm7 = vcmp.gt.s32.totalorder %v4519_v51, 0 }
 0x52a   :  { %3294 = vpow2.f32 %v3020_v16  ;;  %v1314_v52 = vsel %vm1312_vm7, 1, %v3824_v22  ;;  %vm1310_vm9 = vcmp.le.s32.totalorder %v4519_v51, 0  ;;  %vm1498_vm4 = vcmp.gt.s32.totalorder %v4519_v51, 1 }
 0x52b   :  { %v4504_v46 = vsel %vm4368_vm5, %v2461_v38, %v2488_v42  ;;  %v4507_v47 = vrot.slane %v2481_v45, %v4364_v55  ;;  %v1316_v50 = vrot.slane %v1314_v52, 1  ;;  %vm1499_vm5 = vcmp.gt.s32.totalorder %v4521_v6, 1 }
 0x52c   :  { %vm1496_vm7 = vcmp.le.s32.totalorder %v4519_v51, 1 }
 0x52d   :  { %v2499_v56 = vsel %vm4372_vm6, %v4500_v0, %v4507_v47  ;;  %vm1318_vm12 = vcmp.ne.s32.totalorder %v1316_v50, 0 }
 0x52e   :  { %vm4529_vm0 = vmand %vm1310_vm9, %vm1318_vm12  ;;  %vm1497_vm9 = vcmp.le.s32.totalorder %v4521_v6, 1 }
 0x530   :  { %v3293_v2 = vpop.eup %3292 }
 0x531   :  { %v1302_v57 = vmul.f32 %v3293_v2, %v3291_v59  ;;  %v1301_v3 = vmul.f32 0.0, %v3293_v2  ;;  %v1315_v59 = vsel %vm1313_vm8, 1, %v3824_v22 }
 0x532   :  { %v1317_v17 = vrot.slane %v1315_v59, 1 }
 0x533   :  { %1304 = vrot.lane.b32.xlu0 %v1302_v57, %s3806_s30 }
 0x534   :  { %v3295_v60 = vpop.eup %3294  ;;  %vm1319_vm15 = vcmp.ne.s32.totalorder %v1317_v17, 0 }
 0x535   :  { %v1298_v61 = vadd.f32 1.0, %v3295_v60  ;;  %vm4533_vm3 = vmand %vm1311_vm13, %vm1319_vm15 }
 0x537   :  { %3296 = vrcp.f32 %v1298_v61 }
 0x541   :  { %v3297_v55 = vpop.eup %3296 }
 0x5a5   :  { %v1305_v62 = vpop.permute.xlu0 %1304 }
 0x5a6   :  { %v1307_v1 = vadd.f32 %v1305_v62, %v1301_v3 }
 0x5a8   :  { %3298 = vtanh.f32 %v1307_v1  ;;  %v1323_v10 = vrot.slane %v1307_v1, 1 }
 0x5b2   :  { %v3299_v5 = vpop.eup %3298 }
 0x5b3   :  { %v1309_v7 = vmul.f32 %v3299_v5, %v3297_v55 }
 0x5b5   :  { %1334 = vrot.lane.b32.xlu0 %v1309_v7, %s3806_s30  ;;  %v1333_v8 = vrot.slane %v1309_v7, 1 }
 0x5b7   :  { %1336 = vrot.lane.b32.xlu1 %v1333_v8, %s3806_s30 }
 0x5b9   :  { %1324 = vrot.lane.b32.xlu0 %v1307_v1, %s3806_s30 }
 0x5bb   :  { %1326 = vrot.lane.b32.xlu1 %v1323_v10, %s3806_s30 }
 0x627   :  { %v1335_v34 = vpop.permute.xlu0 %1334 }
 0x628   :  { %v1340_v38 = vsel %vm4529_vm0, %v1335_v34, 0.0 }
 0x629   :  { %1343 = vst.msk [vmem:[#allocation3] sm:$0x1] %vm1342_vm1, %v1340_v38  ;;  %v1337_v41 = vpop.permute.xlu1 %1336  ;;  %v1412_v45 = vpack.c.bf16 %v1340_v38, %v1340_v38 }
 0x62a   :  { %1346 = vst.msk [vmem:[#allocation3 + $0x7] sm:$0x1] %vm1345_vm2, %v1340_v38  ;;  %v1341_v42 = vsel %vm4533_vm3, %v1337_v41, 0.0 }
 0x62b   :  { %1344 = vst.msk [vmem:[#allocation3 + $0x8] sm:$0x1] %vm1342_vm1, %v1341_v42  ;;  %v1413_v2 = vpack.c.bf16 %v1341_v42, %v1341_v42  ;;  %v1325_v16 = vpop.permute.xlu0 %1324  ;;  %v1416_v3 = vunpack.c.l.b16 %v1412_v45 }
 0x62c   :  { %1347 = vst.msk [vmem:[#allocation3 + $0xf] sm:$0x1] %vm1345_vm2, %v1341_v42  ;;  %v1330_v55 = vsel %vm4529_vm0, %v1325_v16, 0.0  ;;  %vm1682_vm0 = vcmp.gt.s32.totalorder %v4519_v51, 2 }
 0x62d   :  { %v1417_v57 = vunpack.c.l.b16 %v1413_v2  ;;  %v1327_v60 = vpop.permute.xlu1 %1326  ;;  %v1500_v2 = vsel %vm1498_vm4, 1, %v3824_v22  ;;  %vm1680_vm4 = vcmp.le.s32.totalorder %v4519_v51, 2 }
 0x62e   :  { %v1331_v61 = vsel %vm4533_vm3, %v1327_v60, 0.0  ;;  %v1502_v16 = vrot.slane %v1500_v2, 1  ;;  %vm1683_vm3 = vcmp.gt.s32.totalorder %v4521_v6, 2 }
 0x62f   :  { %v1418_v62 = vrot.slane %v1417_v57, 7  ;;  %v1482_v1 = vrot.slane %v1331_v61, 7  ;;  %v1501_v57 = vsel %vm1499_vm5, 1, %v3824_v22 }
 0x630   :  { %v1503_v60 = vrot.slane %v1501_v57, 1  ;;  %vm1504_vm8 = vcmp.ne.s32.totalorder %v1502_v16, 0 }
 0x631   :  { %v1419_v5 = vsel %vm1004_vm14, %v1418_v62, %v1416_v3  ;;  %v1483_v7 = vsel %vm1004_vm14, %v1482_v1, %v1330_v55  ;;  %vm4579_vm13 = vmand %vm1496_vm7, %vm1504_vm8  ;;  %vm1681_vm7 = vcmp.le.s32.totalorder %v4521_v6, 2 }
 0x632   :  { %v1420_v8 = vpack.c.b16 %v1419_v5, %v1419_v5  ;;  %1484 = vrot.lane.b32.xlu1 %v1483_v7, %s3806_s30  ;;  %vm1505_vm12 = vcmp.ne.s32.totalorder %v1503_v60, 0 }
 0x633   :  { %vm4583_vm15 = vmand %vm1497_vm9, %vm1505_vm12 }
 0x634   :  { %3021 = vmatmul.mubr.msk.bf16.vlgmr.msra.gmra.mrb[4].mxu1 %vm582_vm11, %v1420_v8 }
 0x635   :  { %1793 = vmatpush1.bf16.msra.mxu1 %v4261_v24  ;;  %1824 = vmatprep.mubr.bf16.mxu1 %v3824_v22 }
 0x636   :  { %1794 = vmatprep.subr.bf16.mxu1 %v4264_v25 }
 0x639   :  { %1795 = vmatpush1.bf16.msra.mxu1 %v4269_v26 }
 0x63a   :  { %1796 = vmatprep.subr.bf16.mxu1 %v4271_v27 }
 0x63d   :  { %1797 = vmatpush1.bf16.msra.mxu1 %v4275_v28 }
 0x63e   :  { %1798 = vmatprep.subr.bf16.mxu1 %v4277_v29 }
 0x641   :  { %1799 = vmatpush1.bf16.msra.mxu1 %v4281_v30 }
 0x642   :  { %2152 = vmatprep.subr.bf16.mxu1 %v4259_v23 }
 0x6a4   :  { %v1485_v19 = vpop.permute.xlu1 %1484 }
 0x707   :  { %v1458_v10 = vpop.f32.mrb[4].mxu1 }
 0x708   :  { %v1465_v52 = vadd.f32 %v1458_v10, %v4389_v39  ;;  %v1460_v24 = vpop.f32.mrb[5].mxu1 }
 0x709   :  { %v1466_v25 = vadd.f32 %v1460_v24, %v1411_v53  ;;  %v1462_v26 = vpop.f32.mrb[6].mxu1 }
 0x70a   :  { %v3022_v27 = vmul.f32 -1.442695, %v1465_v52  ;;  %v1463_v59 = vpop.f32.mrb[7].mxu1 }
 0x70b   :  { %v3023_v39 = vmul.f32 -1.442695, %v1466_v25 }
 0x70c   :  { %3300 = vpow2.f32 %v3022_v27 }
 0x70d   :  { %3302 = vtanh.f32 %v1466_v25 }
 0x716   :  { %v3301_v28 = vpop.eup %3300 }
 0x717   :  { %v1470_v29 = vadd.f32 1.0, %v3301_v28  ;;  %v3303_v30 = vpop.eup %3302 }
 0x719   :  { %3304 = vrcp.f32 %v1470_v29 }
 0x71a   :  { %3306 = vpow2.f32 %v3023_v39  ;;  %v4607_v39 = vld [vmem:[#allocation23 + $0x14] ss:$8 sps:$4 sm:$0xff]  }
 0x723   :  { %v3305_v23 = vpop.eup %3304 }
 0x724   :  { %v1488_v50 = vmul.f32 %v3305_v23, %v3303_v30  ;;  %v3307_v17 = vpop.eup %3306  ;;  %v1487_v14 = vmul.f32 %v3305_v23, %v1485_v19  ;;  %v4613_v19 = vld [vmem:[#allocation23 + $0x24] ss:$8 sps:$4 sm:$0xff]  }
 0x725   :  { %v1477_v34 = vadd.f32 1.0, %v3307_v17  ;;  %v4610_v17 = vld [vmem:[#allocation23 + $0x10] ss:$8 sps:$4 sm:$0xff]  }
 0x726   :  { %1490 = vrot.lane.b32.xlu0 %v1488_v50, %s3806_s30  ;;  %v4603_v50 = vld [vmem:[#allocation23] ss:$8 sps:$4 sm:$0xff]  }
 0x727   :  { %3308 = vrcp.f32 %v1477_v34  ;;  %v4616_v34 = vld [vmem:[#allocation23 + $0x20] ss:$8 sps:$4 sm:$0xff]  }
 0x731   :  { %v3309_v35 = vpop.eup %3308 }
 0x798   :  { %v1491_v40 = vpop.permute.xlu0 %1490 }
 0x799   :  { %v1493_v53 = vadd.f32 %v1491_v40, %v1487_v14  ;;  %v4619_v14 = vld [vmem:[#allocation23 + $0x34] ss:$8 sps:$4 sm:$0xff]   ;;  %v4622_v40 = vld [vmem:[#allocation23 + $0x30] ss:$8 sps:$4 sm:$0xff]  }
 0x79b   :  { %3310 = vtanh.f32 %v1493_v53  ;;  %v1509_v45 = vrot.slane %v1493_v53, 1 }
 0x7a5   :  { %v3311_v38 = vpop.eup %3310 }
 0x7a6   :  { %v1495_v41 = vmul.f32 %v3311_v38, %v3309_v35 }
 0x7a8   :  { %1520 = vrot.lane.b32.xlu0 %v1495_v41, %s3806_s30  ;;  %v1519_v42 = vrot.slane %v1495_v41, 1 }
 0x7aa   :  { %1522 = vrot.lane.b32.xlu1 %v1519_v42, %s3806_s30 }
 0x7ac   :  { %1510 = vrot.lane.b32.xlu0 %v1493_v53, %s3806_s30  ;;  %v4625_v53 = vld [vmem:[#allocation23 + $0x4] ss:$8 sps:$4 sm:$0xff]  }
 0x7ae   :  { %1512 = vrot.lane.b32.xlu1 %v1509_v45, %s3806_s30 }
 0x81a   :  { %v1521_v3 = vpop.permute.xlu0 %1520 }
 0x81b   :  { %v1526_v1 = vsel %vm4579_vm13, %v1521_v3, 0.0 }
 0x81c   :  { %1528 = vst.msk [vmem:[#allocation3 + $0x1] sm:$0x1] %vm1342_vm1, %v1526_v1  ;;  %v1523_v55 = vpop.permute.xlu1 %1522  ;;  %v1596_v7 = vpack.c.bf16 %v1526_v1, %v1526_v1 }
 0x81d   :  { %1530 = vst.msk [vmem:[#allocation3 + $0x6] sm:$0x1] %vm1345_vm2, %v1526_v1  ;;  %v1527_v5 = vsel %vm4583_vm15, %v1523_v55, 0.0 }
 0x81e   :  { %1529 = vst.msk [vmem:[#allocation3 + $0x9] sm:$0x1] %vm1342_vm1, %v1527_v5  ;;  %v1597_v8 = vpack.c.bf16 %v1527_v5, %v1527_v5  ;;  %v1511_v52 = vpop.permute.xlu0 %1510  ;;  %v1600_v26 = vunpack.c.l.b16 %v1596_v7 }
 0x81f   :  { %1531 = vst.msk [vmem:[#allocation3 + $0xe] sm:$0x1] %vm1345_vm2, %v1527_v5  ;;  %v1516_v28 = vsel %vm4579_vm13, %v1511_v52, 0.0  ;;  %vm1866_vm13 = vcmp.gt.s32.totalorder %v4519_v51, 3 }
 0x820   :  { %v1601_v10 = vunpack.c.l.b16 %v1597_v8  ;;  %v1513_v24 = vpop.permute.xlu1 %1512 }
 0x821   :  { %v1517_v25 = vsel %vm4583_vm15, %v1513_v24, 0.0  ;;  %vm1867_vm15 = vcmp.gt.s32.totalorder %v4521_v6, 3 }
 0x822   :  { %v1602_v27 = vrot.slane %v1601_v10, 7  ;;  %v1666_v59 = vrot.slane %v1517_v25, 7  ;;  %v1684_v25 = vsel %vm1682_vm0, 1, %v3824_v22  ;;  %vm1864_vm0 = vcmp.le.s32.totalorder %v4519_v51, 3 }
 0x824   :  { %v1603_v29 = vsel %vm1004_vm14, %v1602_v27, %v1600_v26  ;;  %v1667_v30 = vsel %vm1004_vm14, %v1666_v59, %v1516_v28  ;;  %v1685_v26 = vsel %vm1683_vm3, 1, %v3824_v22  ;;  %v1686_v27 = vrot.slane %v1684_v25, 1 }
 0x825   :  { %v1604_v23 = vpack.c.b16 %v1603_v29, %v1603_v29  ;;  %1668 = vrot.lane.b32.xlu1 %v1667_v30, %s3806_s30  ;;  %v1687_v59 = vrot.slane %v1685_v26, 1 }
 0x826   :  { %vm1688_vm5 = vcmp.ne.s32.totalorder %v1686_v27, 0 }
 0x827   :  { %3024 = vmatmul.mubr.msk.bf16.vlgmr.msra.gmra.mrb[12].mxu0 %vm582_vm11, %v1604_v23  ;;  %vm1689_vm8 = vcmp.ne.s32.totalorder %v1687_v59, 0  ;;  %vm4645_vm9 = vmand %vm1680_vm4, %vm1688_vm5  ;;  %vm1865_vm4 = vcmp.le.s32.totalorder %v4521_v6, 3 }
 0x828   :  { %1973 = vmatpush1.bf16.msra.mxu0 %v4603_v50  ;;  %2004 = vmatprep.mubr.bf16.mxu0 %v3824_v22  ;;  %vm4649_vm12 = vmand %vm1681_vm7, %vm1689_vm8 }
 0x829   :  { %1974 = vmatprep.subr.bf16.mxu0 %v4607_v39 }
 0x82c   :  { %1975 = vmatpush1.bf16.msra.mxu0 %v4610_v17 }
 0x82d   :  { %1976 = vmatprep.subr.bf16.mxu0 %v4613_v19 }
 0x830   :  { %1977 = vmatpush1.bf16.msra.mxu0 %v4616_v34 }
 0x831   :  { %1978 = vmatprep.subr.bf16.mxu0 %v4619_v14 }
 0x834   :  { %1979 = vmatpush1.bf16.msra.mxu0 %v4622_v40 }
 0x835   :  { %2332 = vmatprep.subr.bf16.mxu0 %v4625_v53 }
 0x897   :  { %v1669_v55 = vpop.permute.xlu1 %1668 }
 0x8fa   :  { %v1642_v35 = vpop.f32.mrb[12].mxu0 }
 0x8fb   :  { %v1649_v38 = vadd.f32 %v1642_v35, %v4418_v12  ;;  %v1644_v41 = vpop.f32.mrb[13].mxu0 }
 0x8fc   :  { %v1650_v42 = vadd.f32 %v1644_v41, %v1595_v21  ;;  %v1646_v45 = vpop.f32.mrb[14].mxu0 }
 0x8fd   :  { %v3025_v2 = vmul.f32 -1.442695, %v1649_v38  ;;  %v1647_v57 = vpop.f32.mrb[15].mxu0 }
 0x8fe   :  { %v3026_v12 = vmul.f32 -1.442695, %v1650_v42 }
 0x8ff   :  { %3312 = vpow2.f32 %v3025_v2 }
 0x900   :  { %3314 = vtanh.f32 %v1650_v42 }
 0x909   :  { %v3313_v16 = vpop.eup %3312 }
 0x90a   :  { %v1654_v60 = vadd.f32 1.0, %v3313_v16  ;;  %v3315_v61 = vpop.eup %3314 }
 0x90c   :  { %3316 = vrcp.f32 %v1654_v60 }
 0x90d   :  { %3318 = vpow2.f32 %v3026_v12 }
 0x916   :  { %v3317_v3 = vpop.eup %3316 }
 0x917   :  { %v1672_v62 = vmul.f32 %v3317_v3, %v3315_v61  ;;  %v3319_v1 = vpop.eup %3318  ;;  %v1671_v4 = vmul.f32 %v3317_v3, %v1669_v55 }
 0x918   :  { %v1661_v5 = vadd.f32 1.0, %v3319_v1 }
 0x919   :  { %1674 = vrot.lane.b32.xlu0 %v1672_v62, %s3806_s30 }
 0x91a   :  { %3320 = vrcp.f32 %v1661_v5 }
 0x924   :  { %v3321_v7 = vpop.eup %3320 }
 0x98b   :  { %v1675_v49 = vpop.permute.xlu0 %1674 }
 0x98c   :  { %v1677_v21 = vadd.f32 %v1675_v49, %v1671_v4 }
 0x98e   :  { %3322 = vtanh.f32 %v1677_v21  ;;  %v1693_v24 = vrot.slane %v1677_v21, 1 }
 0x998   :  { %v3323_v8 = vpop.eup %3322 }
 0x999   :  { %v1679_v10 = vmul.f32 %v3323_v8, %v3321_v7 }
 0x99b   :  { %1704 = vrot.lane.b32.xlu0 %v1679_v10, %s3806_s30  ;;  %v1703_v52 = vrot.slane %v1679_v10, 1 }
 0x99d   :  { %1706 = vrot.lane.b32.xlu1 %v1703_v52, %s3806_s30 }
 0x99f   :  { %1694 = vrot.lane.b32.xlu0 %v1677_v21, %s3806_s30 }
 0x9a1   :  { %1696 = vrot.lane.b32.xlu1 %v1693_v24, %s3806_s30 }
 0xa0d   :  { %v1705_v29 = vpop.permute.xlu0 %1704 }
 0xa0e   :  { %v1710_v23 = vsel %vm4645_vm9, %v1705_v29, 0.0 }
 0xa0f   :  { %1712 = vst.msk [vmem:[#allocation3 + $0x2] sm:$0x1] %vm1342_vm1, %v1710_v23  ;;  %v1707_v35 = vpop.permute.xlu1 %1706  ;;  %v1780_v41 = vpack.c.bf16 %v1710_v23, %v1710_v23 }
 0xa10   :  { %1714 = vst.msk [vmem:[#allocation3 + $0x5] sm:$0x1] %vm1345_vm2, %v1710_v23  ;;  %v1711_v38 = vsel %vm4649_vm12, %v1707_v35, 0.0 }
 0xa11   :  { %1713 = vst.msk [vmem:[#allocation3 + $0xa] sm:$0x1] %vm1342_vm1, %v1711_v38  ;;  %v1781_v42 = vpack.c.bf16 %v1711_v38, %v1711_v38  ;;  %v1695_v2 = vpop.permute.xlu0 %1694  ;;  %v1784_v60 = vunpack.c.l.b16 %v1780_v41  ;;  %v1868_v41 = vsel %vm1866_vm13, 1, %v3824_v22  ;;  %vm2044_vm13 = vcmp.le.s32.totalorder %v4519_v51, 4 }
 0xa12   :  { %1715 = vst.msk [vmem:[#allocation3 + $0xd] sm:$0x1] %vm1345_vm2, %v1711_v38  ;;  %v1700_v62 = vsel %vm4645_vm9, %v1695_v2, 0.0  ;;  %vm2046_vm9 = vcmp.gt.s32.totalorder %v4519_v51, 4 }
 0xa13   :  { %v1785_v45 = vunpack.c.l.b16 %v1781_v42  ;;  %v1697_v57 = vpop.permute.xlu1 %1696  ;;  %v1869_v42 = vsel %vm1867_vm15, 1, %v3824_v22 }
 0xa14   :  { %v1701_v16 = vsel %vm4649_vm12, %v1697_v57, 0.0  ;;  %v1871_v2 = vrot.slane %v1869_v42, 1  ;;  %vm2047_vm12 = vcmp.gt.s32.totalorder %v4521_v6, 4 }
 0xa15   :  { %v1786_v61 = vrot.slane %v1785_v45, 7  ;;  %v1850_v3 = vrot.slane %v1701_v16, 7  ;;  %v1870_v45 = vrot.slane %v1868_v41, 1 }
 0xa16   :  { %vm1873_vm5 = vcmp.ne.s32.totalorder %v1871_v2, 0 }
 0xa17   :  { %v1787_v12 = vsel %vm1004_vm14, %v1786_v61, %v1784_v60  ;;  %v1851_v1 = vsel %vm1004_vm14, %v1850_v3, %v1700_v62  ;;  %vm1872_vm3 = vcmp.ne.s32.totalorder %v1870_v45, 0  ;;  %vm4699_vm8 = vmand %vm1865_vm4, %vm1873_vm5  ;;  %v2048_v60 = vsel %vm2046_vm9, 1, %v3824_v22 }
 0xa18   :  { %v1788_v55 = vpack.c.b16 %v1787_v12, %v1787_v12  ;;  %1852 = vrot.lane.b32.xlu1 %v1851_v1, %s3806_s30  ;;  %vm4695_vm7 = vmand %vm1864_vm0, %vm1872_vm3  ;;  %vm2045_vm0 = vcmp.le.s32.totalorder %v4521_v6, 4  ;;  %vm2224_vm9 = vcmp.le.s32.totalorder %v4519_v51, 5 }
 0xa1a   :  { %3027 = vmatmul.mubr.msk.bf16.vlgmr.msra.gmra.mrb[8].mxu1 %vm582_vm11, %v1788_v55 }
 0xa1b   :  { %2153 = vmatpush1.bf16.msra.mxu1 %v4603_v50  ;;  %2184 = vmatprep.mubr.bf16.mxu1 %v3824_v22 }
 0xa1c   :  { %2154 = vmatprep.subr.bf16.mxu1 %v4607_v39 }
 0xa1f   :  { %2155 = vmatpush1.bf16.msra.mxu1 %v4610_v17 }
 0xa20   :  { %2156 = vmatprep.subr.bf16.mxu1 %v4613_v19 }
 0xa23   :  { %2157 = vmatpush1.bf16.msra.mxu1 %v4616_v34 }
 0xa24   :  { %2158 = vmatprep.subr.bf16.mxu1 %v4619_v14 }
 0xa27   :  { %2159 = vmatpush1.bf16.msra.mxu1 %v4622_v40 }
 0xa28   :  { %2512 = vmatprep.subr.bf16.mxu1 %v4625_v53 }
 0xa8a   :  { %v1853_v59 = vpop.permute.xlu1 %1852 }
 0xaed   :  { %v1826_v5 = vpop.f32.mrb[8].mxu1 }
 0xaee   :  { %v1833_v4 = vadd.f32 %v1826_v5, %v4435_v31  ;;  %v1828_v49 = vpop.f32.mrb[9].mxu1 }
 0xaef   :  { %v1834_v21 = vadd.f32 %v1828_v49, %v1779_v43  ;;  %v1830_v7 = vpop.f32.mrb[10].mxu1 }
 0xaf0   :  { %v3028_v8 = vmul.f32 -1.442695, %v1833_v4  ;;  %v1831_v10 = vpop.f32.mrb[11].mxu1 }
 0xaf1   :  { %v3029_v31 = vmul.f32 -1.442695, %v1834_v21 }
 0xaf2   :  { %3324 = vpow2.f32 %v3028_v8 }
 0xaf3   :  { %3326 = vtanh.f32 %v1834_v21 }
 0xafc   :  { %v3325_v52 = vpop.eup %3324 }
 0xafd   :  { %v1838_v24 = vadd.f32 1.0, %v3325_v52  ;;  %v3327_v25 = vpop.eup %3326 }
 0xaff   :  { %3328 = vrcp.f32 %v1838_v24 }
 0xb00   :  { %3330 = vpow2.f32 %v3029_v31 }
 0xb09   :  { %v3329_v53 = vpop.eup %3328 }
 0xb0a   :  { %v1856_v26 = vmul.f32 %v3329_v53, %v3327_v25  ;;  %v3331_v27 = vpop.eup %3330  ;;  %v1855_v44 = vmul.f32 %v3329_v53, %v1853_v59 }
 0xb0b   :  { %v1845_v28 = vadd.f32 1.0, %v3331_v27 }
 0xb0c   :  { %1858 = vrot.lane.b32.xlu0 %v1856_v26, %s3806_s30 }
 0xb0d   :  { %3332 = vrcp.f32 %v1845_v28 }
 0xb17   :  { %v3333_v29 = vpop.eup %3332 }
 0xb7e   :  { %v1859_v58 = vpop.permute.xlu0 %1858 }
 0xb7f   :  { %v1861_v43 = vadd.f32 %v1859_v58, %v1855_v44 }
 0xb81   :  { %3334 = vtanh.f32 %v1861_v43  ;;  %v1877_v38 = vrot.slane %v1861_v43, 1 }
 0xb8b   :  { %v3335_v30 = vpop.eup %3334 }
 0xb8c   :  { %v1863_v23 = vmul.f32 %v3335_v30, %v3333_v29 }
 0xb8e   :  { %1888 = vrot.lane.b32.xlu0 %v1863_v23, %s3806_s30  ;;  %v1887_v35 = vrot.slane %v1863_v23, 1 }
 0xb90   :  { %1890 = vrot.lane.b32.xlu1 %v1887_v35, %s3806_s30 }
 0xb92   :  { %1878 = vrot.lane.b32.xlu0 %v1861_v43, %s3806_s30 }
 0xb94   :  { %1880 = vrot.lane.b32.xlu1 %v1877_v38, %s3806_s30 }
 0xc00   :  { %v1889_v16 = vpop.permute.xlu0 %1888 }
 0xc01   :  { %v1894_v61 = vsel %vm4695_vm7, %v1889_v16, 0.0 }
 0xc02   :  { %1896 = vst.msk [vmem:[#allocation3 + $0x3] sm:$0x1] %vm1342_vm1, %v1894_v61  ;;  %v1891_v3 = vpop.permute.xlu1 %1890  ;;  %v1960_v12 = vpack.c.bf16 %v1894_v61, %v1894_v61 }
 0xc03   :  { %1898 = vst.msk [vmem:[#allocation3 + $0x4] sm:$0x1] %vm1345_vm2, %v1894_v61  ;;  %v1895_v62 = vsel %vm4699_vm8, %v1891_v3, 0.0  ;;  %v2049_v61 = vsel %vm2047_vm12, 1, %v3824_v22  ;;  %v2050_v3 = vrot.slane %v2048_v60, 1 }
 0xc04   :  { %1897 = vst.msk [vmem:[#allocation3 + $0xb] sm:$0x1] %vm1342_vm1, %v1895_v62  ;;  %v1961_v1 = vpack.c.bf16 %v1895_v62, %v1895_v62  ;;  %v1879_v5 = vpop.permute.xlu0 %1878  ;;  %v1964_v21 = vunpack.c.l.b16 %v1960_v12 }
 0xc05   :  { %1899 = vst.msk [vmem:[#allocation3 + $0xc] sm:$0x1] %vm1345_vm2, %v1895_v62  ;;  %v1884_v10 = vsel %vm4695_vm7, %v1879_v5, 0.0  ;;  %v2051_v62 = vrot.slane %v2049_v61, 1  ;;  %vm2052_vm15 = vcmp.ne.s32.totalorder %v2050_v3, 0  ;;  %vm2226_vm7 = vcmp.gt.s32.totalorder %v4519_v51, 5 }
 0xc06   :  { %v1965_v55 = vunpack.c.l.b16 %v1961_v1  ;;  %v1881_v4 = vpop.permute.xlu1 %1880  ;;  %vm4744_vm4 = vmand %vm2044_vm13, %vm2052_vm15  ;;  %vm2225_vm13 = vcmp.le.s32.totalorder %v4521_v6, 5 }
 0xc07   :  { %v1885_v49 = vsel %vm4699_vm8, %v1881_v4, 0.0  ;;  %vm2053_vm3 = vcmp.ne.s32.totalorder %v2051_v62, 0  ;;  %vm2227_vm8 = vcmp.gt.s32.totalorder %v4521_v6, 5 }
 0xc08   :  { %v1966_v7 = vrot.slane %v1965_v55, 7  ;;  %v2030_v8 = vrot.slane %v1885_v49, 7  ;;  %vm4748_vm5 = vmand %vm2045_vm0, %vm2053_vm3 }
 0xc0a   :  { %v1967_v52 = vsel %vm1004_vm14, %v1966_v7, %v1964_v21  ;;  %v2031_v24 = vsel %vm1004_vm14, %v2030_v8, %v1884_v10 }
 0xc0b   :  { %v1968_v25 = vpack.c.b16 %v1967_v52, %v1967_v52  ;;  %2032 = vrot.lane.b32.xlu1 %v2031_v24, %s3806_s30 }
 0xc0d   :  { %3030 = vmatmul.mubr.msk.bf16.vlgmr.msra.gmra.mrb[16].mxu0 %vm582_vm11, %v1968_v25 }
 0xc0e   :  { %2333 = vmatpush1.bf16.msra.mxu0 %v4603_v50  ;;  %2364 = vmatprep.mubr.bf16.mxu0 %v3824_v22 }
 0xc0f   :  { %2334 = vmatprep.subr.bf16.mxu0 %v4607_v39 }
 0xc12   :  { %2335 = vmatpush1.bf16.msra.mxu0 %v4610_v17 }
 0xc13   :  { %2336 = vmatprep.subr.bf16.mxu0 %v4613_v19 }
 0xc16   :  { %2337 = vmatpush1.bf16.msra.mxu0 %v4616_v34 }
 0xc17   :  { %2338 = vmatprep.subr.bf16.mxu0 %v4619_v14 }
 0xc1a   :  { %2339 = vmatpush1.bf16.msra.mxu0 %v4622_v40 }
 0xc7d   :  { %v2033_v38 = vpop.permute.xlu1 %2032 }
 0xce0   :  { %v2006_v53 = vpop.f32.mrb[16].mxu0 }
 0xce1   :  { %v2013_v26 = vadd.f32 %v2006_v53, %v4451_v48  ;;  %v2008_v31 = vpop.f32.mrb[17].mxu0 }
 0xce2   :  { %v2014_v27 = vadd.f32 %v2008_v31, %v1959_v63  ;;  %v2010_v59 = vpop.f32.mrb[18].mxu0 }
 0xce3   :  { %v3031_v28 = vmul.f32 -1.442695, %v2013_v26  ;;  %v2011_v44 = vpop.f32.mrb[19].mxu0 }
 0xce4   :  { %v3032_v48 = vmul.f32 -1.442695, %v2014_v27 }
 0xce5   :  { %3336 = vpow2.f32 %v3031_v28 }
 0xce6   :  { %3338 = vtanh.f32 %v2014_v27 }
 0xcef   :  { %v3337_v58 = vpop.eup %3336 }
 0xcf0   :  { %v2018_v43 = vadd.f32 1.0, %v3337_v58  ;;  %v3339_v29 = vpop.eup %3338 }
 0xcf2   :  { %3340 = vrcp.f32 %v2018_v43 }
 0xcf3   :  { %3342 = vpow2.f32 %v3032_v48 }
 0xcfc   :  { %v3341_v30 = vpop.eup %3340 }
 0xcfd   :  { %v2036_v23 = vmul.f32 %v3341_v30, %v3339_v29  ;;  %v3343_v35 = vpop.eup %3342  ;;  %v2035_v36 = vmul.f32 %v3341_v30, %v2033_v38 }
 0xcfe   :  { %v2025_v41 = vadd.f32 1.0, %v3343_v35 }
 0xcff   :  { %2038 = vrot.lane.b32.xlu0 %v2036_v23, %s3806_s30 }
 0xd00   :  { %3344 = vrcp.f32 %v2025_v41 }
 0xd0a   :  { %v3345_v42 = vpop.eup %3344 }
 0xd71   :  { %v2039_v54 = vpop.permute.xlu0 %2038 }
 0xd72   :  { %v2041_v63 = vadd.f32 %v2039_v54, %v2035_v36 }
 0xd74   :  { %3346 = vtanh.f32 %v2041_v63  ;;  %v2057_v16 = vrot.slane %v2041_v63, 1 }
 0xd7e   :  { %v3347_v45 = vpop.eup %3346 }
 0xd7f   :  { %v2043_v2 = vmul.f32 %v3347_v45, %v3345_v42  ;;  %v2228_v42 = vsel %vm2226_vm7, 1, %v3824_v22  ;;  %v2229_v45 = vsel %vm2227_vm8, 1, %v3824_v22  ;;  %vm2404_vm7 = vcmp.le.s32.totalorder %v4519_v51, 6 }
 0xd81   :  { %2068 = vrot.lane.b32.xlu0 %v2043_v2, %s3806_s30  ;;  %v2067_v57 = vrot.slane %v2043_v2, 1  ;;  %v2230_v2 = vrot.slane %v2228_v42, 1 }
 0xd83   :  { %2070 = vrot.lane.b32.xlu1 %v2067_v57, %s3806_s30  ;;  %v2231_v57 = vrot.slane %v2229_v45, 1  ;;  %vm2232_vm12 = vcmp.ne.s32.totalorder %v2230_v2, 0 }
 0xd84   :  { %vm4793_vm0 = vmand %vm2224_vm9, %vm2232_vm12  ;;  %vm2405_vm9 = vcmp.le.s32.totalorder %v4521_v6, 6 }
 0xd85   :  { %2058 = vrot.lane.b32.xlu0 %v2041_v63, %s3806_s30  ;;  %vm2233_vm15 = vcmp.ne.s32.totalorder %v2231_v57, 0 }
 0xd86   :  { %vm4797_vm3 = vmand %vm2225_vm13, %vm2233_vm15 }
 0xd87   :  { %2060 = vrot.lane.b32.xlu1 %v2057_v16, %s3806_s30 }
 0xdf3   :  { %v2069_v1 = vpop.permute.xlu0 %2068 }
 0xdf4   :  { %v2074_v5 = vsel %vm4744_vm4, %v2069_v1, 0.0 }
 0xdf5   :  { %2076 = vst.msk [vmem:[#allocation3 + $0x4] sm:$0x1] %vm1342_vm1, %v2074_v5  ;;  %v2071_v4 = vpop.permute.xlu1 %2070  ;;  %v2140_v21 = vpack.c.bf16 %v2074_v5, %v2074_v5 }
 0xdf6   :  { %2078 = vst.msk [vmem:[#allocation3 + $0x3] sm:$0x1] %vm1345_vm2, %v2074_v5  ;;  %v2075_v49 = vsel %vm4748_vm5, %v2071_v4, 0.0 }
 0xdf7   :  { %2077 = vst.msk [vmem:[#allocation3 + $0xc] sm:$0x1] %vm1342_vm1, %v2075_v49  ;;  %v2141_v7 = vpack.c.bf16 %v2075_v49, %v2075_v49  ;;  %v2059_v10 = vpop.permute.xlu0 %2058  ;;  %v2144_v25 = vunpack.c.l.b16 %v2140_v21 }
 0xdf8   :  { %2079 = vst.msk [vmem:[#allocation3 + $0xb] sm:$0x1] %vm1345_vm2, %v2075_v49  ;;  %v2064_v31 = vsel %vm4744_vm4, %v2059_v10, 0.0  ;;  %vm2406_vm4 = vcmp.gt.s32.totalorder %v4519_v51, 6 }
 0xdf9   :  { %v2145_v8 = vunpack.c.l.b16 %v2141_v7  ;;  %v2061_v52 = vpop.permute.xlu1 %2060 }
 0xdfa   :  { %v2065_v24 = vsel %vm4748_vm5, %v2061_v52, 0.0  ;;  %vm2407_vm5 = vcmp.gt.s32.totalorder %v4521_v6, 6 }
 0xdfb   :  { %v2146_v53 = vrot.slane %v2145_v8, 7  ;;  %v2210_v26 = vrot.slane %v2065_v24, 7 }
 0xdfd   :  { %v2147_v27 = vsel %vm1004_vm14, %v2146_v53, %v2144_v25  ;;  %v2211_v59 = vsel %vm1004_vm14, %v2210_v26, %v2064_v31 }
 0xdfe   :  { %v2148_v28 = vpack.c.b16 %v2147_v27, %v2147_v27  ;;  %2212 = vrot.lane.b32.xlu1 %v2211_v59, %s3806_s30 }
 0xe00   :  { %3033 = vmatmul.mubr.msk.bf16.vlgmr.msra.gmra.mrb[12].mxu1 %vm582_vm11, %v2148_v28 }
 0xe01   :  { %2513 = vmatpush1.bf16.msra.mxu1 %v4603_v50  ;;  %2544 = vmatprep.mubr.bf16.mxu1 %v3824_v22 }
 0xe02   :  { %2514 = vmatprep.subr.bf16.mxu1 %v4607_v39 }
 0xe05   :  { %2515 = vmatpush1.bf16.msra.mxu1 %v4610_v17 }
 0xe06   :  { %2516 = vmatprep.subr.bf16.mxu1 %v4613_v19 }
 0xe09   :  { %2517 = vmatpush1.bf16.msra.mxu1 %v4616_v34 }
 0xe0a   :  { %2518 = vmatprep.subr.bf16.mxu1 %v4619_v14 }
 0xe0d   :  { %2519 = vmatpush1.bf16.msra.mxu1 %v4622_v40 }
 0xe70   :  { %v2213_v48 = vpop.permute.xlu1 %2212 }
 0xed3   :  { %v2186_v44 = vpop.f32.mrb[12].mxu1 }
 0xed4   :  { %v2193_v58 = vadd.f32 %v2186_v44, %v4473_v13  ;;  %v2188_v43 = vpop.f32.mrb[13].mxu1 }
 0xed5   :  { %v2194_v50 = vadd.f32 %v2188_v43, %v2139_v20  ;;  %v2190_v39 = vpop.f32.mrb[14].mxu1 }
 0xed6   :  { %v3034_v17 = vmul.f32 -1.442695, %v2193_v58  ;;  %v2191_v29 = vpop.f32.mrb[15].mxu1 }
 0xed7   :  { %v3035_v13 = vmul.f32 -1.442695, %v2194_v50 }
 0xed8   :  { %3348 = vpow2.f32 %v3034_v17 }
 0xed9   :  { %3350 = vtanh.f32 %v2194_v50 }
 0xee2   :  { %v3349_v19 = vpop.eup %3348 }
 0xee3   :  { %v2198_v34 = vadd.f32 1.0, %v3349_v19  ;;  %v3351_v14 = vpop.eup %3350 }
 0xee5   :  { %3352 = vrcp.f32 %v2198_v34 }
 0xee6   :  { %3354 = vpow2.f32 %v3035_v13 }
 0xeef   :  { %v3353_v40 = vpop.eup %3352 }
 0xef0   :  { %v2216_v30 = vmul.f32 %v3353_v40, %v3351_v14  ;;  %v3355_v23 = vpop.eup %3354  ;;  %v2215_v9 = vmul.f32 %v3353_v40, %v2213_v48 }
 0xef1   :  { %v2205_v35 = vadd.f32 1.0, %v3355_v23 }
 0xef2   :  { %2218 = vrot.lane.b32.xlu0 %v2216_v30, %s3806_s30 }
 0xef3   :  { %3356 = vrcp.f32 %v2205_v35  ;;  %v2408_v35 = vsel %vm2406_vm4, 1, %v3824_v22 }
 0xefd   :  { %v3357_v38 = vpop.eup %3356 }
 0xf64   :  { %v2219_v15 = vpop.permute.xlu0 %2218 }
 0xf65   :  { %v2221_v20 = vadd.f32 %v2219_v15, %v2215_v9  ;;  %v2409_v9 = vsel %vm2407_vm5, 1, %v3824_v22  ;;  %v2410_v15 = vrot.slane %v2408_v35, 1 }
 0xf67   :  { %3358 = vtanh.f32 %v2221_v20  ;;  %v2237_v63 = vrot.slane %v2221_v20, 1  ;;  %vm2412_vm8 = vcmp.ne.s32.totalorder %v2410_v15, 0 }
 0xf68   :  { %vm4834_vm13 = vmand %vm2404_vm7, %vm2412_vm8 }
 0xf71   :  { %v3359_v41 = vpop.eup %3358 }
 0xf72   :  { %v2223_v36 = vmul.f32 %v3359_v41, %v3357_v38 }
 0xf74   :  { %2248 = vrot.lane.b32.xlu0 %v2223_v36, %s3806_s30  ;;  %v2247_v54 = vrot.slane %v2223_v36, 1  ;;  %v3044_v36 = vld [vmem:[#allocation4] ss:$0 sm:$0xff] }
 0xf76   :  { %2250 = vrot.lane.b32.xlu1 %v2247_v54, %s3806_s30 }
 0xf78   :  { %2238 = vrot.lane.b32.xlu0 %v2221_v20, %s3806_s30  ;;  %v2411_v20 = vrot.slane %v2409_v9, 1 }
 0xf7a   :  { %2240 = vrot.lane.b32.xlu1 %v2237_v63, %s3806_s30  ;;  %vm2413_vm12 = vcmp.ne.s32.totalorder %v2411_v20, 0 }
 0xf7b   :  { %vm4838_vm15 = vmand %vm2405_vm9, %vm2413_vm12  ;;  %vm2710_vm12 = vcmask 7168  }
 0xfe6   :  { %v2249_v60 = vpop.permute.xlu0 %2248 }
 0xfe7   :  { %v2254_v3 = vsel %vm4793_vm0, %v2249_v60, 0.0 }
 0xfe8   :  { %2256 = vst.msk [vmem:[#allocation3 + $0x5] sm:$0x1] %vm1342_vm1, %v2254_v3  ;;  %v2251_v62 = vpop.permute.xlu1 %2250  ;;  %v2320_v1 = vpack.c.bf16 %v2254_v3, %v2254_v3 }
 0xfe9   :  { %2258 = vst.msk [vmem:[#allocation3 + $0x2] sm:$0x1] %vm1345_vm2, %v2254_v3  ;;  %v2255_v12 = vsel %vm4797_vm3, %v2251_v62, 0.0 }
 0xfea   :  { %2257 = vst.msk [vmem:[#allocation3 + $0xd] sm:$0x1] %vm1342_vm1, %v2255_v12  ;;  %v2321_v55 = vpack.c.bf16 %v2255_v12, %v2255_v12  ;;  %v2239_v4 = vpop.permute.xlu0 %2238  ;;  %v2324_v7 = vunpack.c.l.b16 %v2320_v1 }
 0xfeb   :  { %2259 = vst.msk [vmem:[#allocation3 + $0xa] sm:$0x1] %vm1345_vm2, %v2255_v12  ;;  %v2244_v52 = vsel %vm4793_vm0, %v2239_v4, 0.0 }
 0xfec   :  { %v2325_v5 = vunpack.c.l.b16 %v2321_v55  ;;  %v2241_v49 = vpop.permute.xlu1 %2240 }
 0xfed   :  { %v2245_v21 = vsel %vm4797_vm3, %v2241_v49, 0.0 }
 0xfee   :  { %v2326_v8 = vrot.slane %v2325_v5, 7  ;;  %v2390_v10 = vrot.slane %v2245_v21, 7 }
 0xff0   :  { %v2327_v24 = vsel %vm1004_vm14, %v2326_v8, %v2324_v7  ;;  %v2391_v25 = vsel %vm1004_vm14, %v2390_v10, %v2244_v52 }
 0xff1   :  { %v2328_v53 = vpack.c.b16 %v2327_v24, %v2327_v24  ;;  %2392 = vrot.lane.b32.xlu1 %v2391_v25, %s3806_s30 }
 0xff3   :  { %3036 = vmatmul.mubr.msk.bf16.vlgmr.msra.gmra.mrb[20].mxu0 %vm582_vm11, %v2328_v53 }
0x1063   :  { %v2393_v34 = vpop.permute.xlu1 %2392 }
0x10c6   :  { %v2366_v26 = vpop.f32.mrb[20].mxu0 }
0x10c7   :  { %v2373_v31 = vadd.f32 %v2366_v26, %v4480_v18  ;;  %v2368_v27 = vpop.f32.mrb[21].mxu0 }
0x10c8   :  { %v2374_v59 = vadd.f32 %v2368_v27, %v2319_v37  ;;  %v2370_v28 = vpop.f32.mrb[22].mxu0 }
0x10c9   :  { %v3037_v44 = vmul.f32 -1.442695, %v2373_v31  ;;  %v2371_v58 = vpop.f32.mrb[23].mxu0  ;;  %v2613_v31 = vld [vmem:[#allocation24 + $0x8] sm:$0xff] }
0x10ca   :  { %v3038_v18 = vmul.f32 -1.442695, %v2374_v59 }
0x10cb   :  { %3360 = vpow2.f32 %v3037_v44 }
0x10cc   :  { %3362 = vtanh.f32 %v2374_v59  ;;  %v2615_v59 = vld [vmem:[#allocation24 + $0x18] sm:$0xff] }
0x10cd   :  { %v3166_v0 = vpack.c.bf16 %v2615_v59, %v2614_v11 }
0x10d5   :  { %v3361_v43 = vpop.eup %3360 }
0x10d6   :  { %v2378_v50 = vadd.f32 1.0, %v3361_v43  ;;  %v3363_v39 = vpop.eup %3362 }
0x10d8   :  { %3364 = vrcp.f32 %v2378_v50 }
0x10d9   :  { %3366 = vpow2.f32 %v3038_v18 }
0x10e2   :  { %v3365_v17 = vpop.eup %3364 }
0x10e3   :  { %v2396_v29 = vmul.f32 %v3365_v17, %v3363_v39  ;;  %v3367_v19 = vpop.eup %3366  ;;  %v2395_v32 = vmul.f32 %v3365_v17, %v2393_v34  ;;  %v2616_v39 = vld [vmem:[#allocation24 + $0x20] sm:$0xff]  ;;  %v2617_v17 = vld [vmem:[#allocation24 + $0x28] sm:$0xff] }
0x10e4   :  { %v2385_v14 = vadd.f32 1.0, %v3367_v19  ;;  %v3170_v18 = vpack.c.bf16 %v2617_v17, %v2616_v39  ;;  %v2619_v19 = vld [vmem:[#allocation24 + $0x38] sm:$0xff]  ;;  %v3284_v17 = vld [vmem:[#allocation26] sm:$0xff]  }
0x10e5   :  { %2398 = vrot.lane.b32.xlu0 %v2396_v29, %s3806_s30  ;;  %v2618_v29 = vld [vmem:[#allocation24 + $0x30] sm:$0xff] }
0x10e6   :  { %3368 = vrcp.f32 %v2385_v14  ;;  %v3174_v34 = vpack.c.bf16 %v2619_v19, %v2618_v29  ;;  %v3827_v29 = vmov 0.0   ;;  %v3286_v19 = vld [vmem:[#allocation26 + $0x10] sm:$0xff]  }
0x10e7   :  { %3139 = vmatprep.subr.bf16.mxu1 %v3827_v29 }
0x10f0   :  { %v3369_v40 = vpop.eup %3368 }
0x1157   :  { %v2399_v33 = vpop.permute.xlu0 %2398 }
0x1158   :  { %v2401_v37 = vadd.f32 %v2399_v33, %v2395_v32 }
0x115a   :  { %3370 = vtanh.f32 %v2401_v37  ;;  %v2417_v48 = vrot.slane %v2401_v37, 1 }
0x1164   :  { %v3371_v30 = vpop.eup %3370 }
0x1165   :  { %v2403_v13 = vmul.f32 %v3371_v30, %v3369_v40  ;;  %v3404_v40 = vld [vmem:[#allocation9] sm:$0x3]  ;;  %v3405_v30 = vld [vmem:[#allocation9 + $0x2] sm:$0x3] }
0x1166   :  { %vm2586_vm6 = vcmp.gt.s32.totalorder %v3404_v40, 7  ;;  %vm2587_vm0 = vcmp.gt.s32.totalorder %v3405_v30, 7  ;;  %vm2584_vm3 = vcmp.le.s32.totalorder %v3404_v40, 7  ;;  %vm2585_vm5 = vcmp.le.s32.totalorder %v3405_v30, 7 }
0x1167   :  { %2428 = vrot.lane.b32.xlu0 %v2403_v13, %s3806_s30  ;;  %v2427_v23 = vrot.slane %v2403_v13, 1  ;;  %v2588_v13 = vsel %vm2586_vm6, 1, %v3824_v22 }
0x1169   :  { %2430 = vrot.lane.b32.xlu1 %v2427_v23, %s3806_s30  ;;  %v2589_v23 = vsel %vm2587_vm0, 1, %v3824_v22 }
0x116a   :  { %v2591_v35 = vrot.slane %v2589_v23, 1 }
0x116b   :  { %2418 = vrot.lane.b32.xlu0 %v2401_v37, %s3806_s30 }
0x116c   :  { %vm2593_vm7 = vcmp.ne.s32.totalorder %v2591_v35, 0 }
0x116d   :  { %2420 = vrot.lane.b32.xlu1 %v2417_v48, %s3806_s30  ;;  %v2590_v48 = vrot.slane %v2588_v13, 1  ;;  %vm2595_vm9 = vmand %vm2585_vm5, %vm2593_vm7 }
0x116f   :  { %vm2592_vm4 = vcmp.ne.s32.totalorder %v2590_v48, 0 }
0x1170   :  { %vm2594_vm8 = vmand %vm2584_vm3, %vm2592_vm4 }
0x11d9   :  { %v2429_v41 = vpop.permute.xlu0 %2428 }
0x11da   :  { %v2434_v54 = vsel %vm4834_vm13, %v2429_v41, 0.0 }
0x11db   :  { %2436 = vst.msk [vmem:[#allocation3 + $0x6] sm:$0x1] %vm1342_vm1, %v2434_v54  ;;  %v2431_v51 = vpop.permute.xlu1 %2430  ;;  %v2500_v63 = vpack.c.bf16 %v2434_v54, %v2434_v54 }
0x11dc   :  { %2438 = vst.msk [vmem:[#allocation3 + $0x1] sm:$0x1] %vm1345_vm2, %v2434_v54  ;;  %v2435_v6 = vsel %vm4838_vm15, %v2431_v51, 0.0 }
0x11dd   :  { %2437 = vst.msk [vmem:[#allocation3 + $0xe] sm:$0x1] %vm1342_vm1, %v2435_v6  ;;  %v2501_v42 = vpack.c.bf16 %v2435_v6, %v2435_v6  ;;  %v2419_v2 = vpop.permute.xlu0 %2418  ;;  %v2504_v60 = vunpack.c.l.b16 %v2500_v63 }
0x11de   :  { %2439 = vst.msk [vmem:[#allocation3 + $0x9] sm:$0x1] %vm1345_vm2, %v2435_v6  ;;  %v2424_v62 = vsel %vm4834_vm13, %v2419_v2, 0.0 }
0x11df   :  { %v2505_v45 = vunpack.c.l.b16 %v2501_v42  ;;  %v2421_v57 = vpop.permute.xlu1 %2420 }
0x11e0   :  { %v2425_v16 = vsel %vm4838_vm15, %v2421_v57, 0.0 }
0x11e1   :  { %v2506_v61 = vrot.slane %v2505_v45, 7  ;;  %v2570_v3 = vrot.slane %v2425_v16, 7 }
0x11e3   :  { %v2507_v12 = vsel %vm1004_vm14, %v2506_v61, %v2504_v60  ;;  %v2571_v1 = vsel %vm1004_vm14, %v2570_v3, %v2424_v62 }
0x11e4   :  { %v2508_v55 = vpack.c.b16 %v2507_v12, %v2507_v12  ;;  %2572 = vrot.lane.b32.xlu1 %v2571_v1, %s3806_s30 }
0x11e6   :  { %3039 = vmatmul.mubr.msk.bf16.vlgmr.msra.gmra.mrb[16].mxu1 %vm582_vm11, %v2508_v55 }
0x11e7   :  { %3140 = vmatpush3.bf16.msra.mxu1 %v3284_v17 }
0x11e8   :  { %3141 = vmatprep.subr.bf16.mxu1 %v3827_v29 }
0x1256   :  { %v2573_v28 = vpop.permute.xlu1 %2572 }
0x12b9   :  { %v2546_v5 = vpop.f32.mrb[16].mxu1 }
0x12ba   :  { %v2553_v4 = vadd.f32 %v2546_v5, %v4504_v46  ;;  %v2548_v49 = vpop.f32.mrb[17].mxu1  ;;  %v2612_v46 = vld [vmem:[#allocation24] sm:$0xff] }
0x12bb   :  { %v2554_v21 = vadd.f32 %v2548_v49, %v2499_v56  ;;  %v2550_v7 = vpop.f32.mrb[18].mxu1  ;;  %v3162_v27 = vpack.c.bf16 %v2613_v31, %v2612_v46 }
0x12bc   :  { %v3040_v8 = vmul.f32 -1.442695, %v2553_v4  ;;  %v2551_v10 = vpop.f32.mrb[19].mxu1 }
0x12bd   :  { %3163 = vmatprep.subr.bf16.mxu0 %v3162_v27  ;;  %v3041_v47 = vmul.f32 -1.442695, %v2554_v21 }
0x12be   :  { %3372 = vpow2.f32 %v3040_v8  ;;  %3165 = vmatpush3.bf16.msra.mxu0 %v3162_v27 }
0x12bf   :  { %3374 = vtanh.f32 %v2554_v21  ;;  %3167 = vmatprep.subr.bf16.mxu0 %v3166_v0 }
0x12c2   :  { %3169 = vmatpush3.bf16.msra.mxu0 %v3166_v0 }
0x12c3   :  { %3171 = vmatprep.subr.bf16.mxu0 %v3170_v18 }
0x12c6   :  { %3173 = vmatpush3.bf16.msra.mxu0 %v3170_v18  ;;  %v3285_v18 = vld [vmem:[#allocation26 + $0x8] sm:$0xff]  }
0x12c7   :  { %3175 = vmatprep.subr.bf16.mxu0 %v3174_v34  ;;  %3142 = vmatpush3.bf16.msra.mxu1 %v3285_v18 }
0x12c8   :  { %v3373_v52 = vpop.eup %3372  ;;  %3143 = vmatprep.subr.bf16.mxu1 %v3827_v29 }
0x12c9   :  { %v2558_v24 = vadd.f32 1.0, %v3373_v52  ;;  %v3375_v25 = vpop.eup %3374 }
0x12ca   :  { %3177 = vmatpush3.bf16.msra.mxu0 %v3174_v34  ;;  %v3829_v34 = vmov 0.0|0.0  }
0x12cb   :  { %3376 = vrcp.f32 %v2558_v24  ;;  %3178 = vmatprep.subr.bf16.mxu0 %v3829_v34  ;;  %3144 = vmatpush3.bf16.msra.mxu1 %v3286_v19 }
0x12cc   :  { %3378 = vpow2.f32 %v3041_v47  ;;  %3145 = vmatprep.subr.bf16.mxu1 %v3827_v29 }
0x12d5   :  { %v3377_v53 = vpop.eup %3376 }
0x12d6   :  { %v2576_v26 = vmul.f32 %v3377_v53, %v3375_v25  ;;  %v3379_v56 = vpop.eup %3378  ;;  %v2575_v58 = vmul.f32 %v3377_v53, %v2573_v28 }
0x12d7   :  { %v2565_v44 = vadd.f32 1.0, %v3379_v56 }
0x12d8   :  { %2578 = vrot.lane.b32.xlu0 %v2576_v26, %s3806_s30 }
0x12d9   :  { %3380 = vrcp.f32 %v2565_v44 }
0x12e3   :  { %v3381_v14 = vpop.eup %3380 }
0x134a   :  { %v2579_v43 = vpop.permute.xlu0 %2578 }
0x134b   :  { %v2581_v50 = vadd.f32 %v2579_v43, %v2575_v58 }
0x134d   :  { %3382 = vtanh.f32 %v2581_v50 }
0x1357   :  { %v3383_v32 = vpop.eup %3382 }
0x1358   :  { %v2583_v33 = vmul.f32 %v3383_v32, %v3381_v14  ;;  %v3287_v14 = vld [vmem:[#allocation26 + $0x18] sm:$0xff]  }
0x1359   :  { %3146 = vmatpush3.bf16.msra.mxu1 %v3287_v14 }
0x135a   :  { %2598 = vrot.lane.b32.xlu1 %v2583_v33, %s3806_s30  ;;  %v2597_v37 = vrot.slane %v2583_v33, 1 }
0x135c   :  { %2600 = vrot.lane.b32.xlu0 %v2597_v37, %s3806_s30  ;;  %s3830_s30 = smov [#allocation32]  }
0x135d   :  { %s2973_s3 = sshll.u32 %s3830_s30, 4  ;;  %s2974_s3 = int_to_ptr.vmem [resolvable:$true] %s2973_s3 }
0x135e   :  { %s3758_s0 = scalar_lea.vmem %s2974_s3, 32  ;;  %p3763_p3 = scmp.lt.s32.totalorder %s2974_s3, %s2974_s3 }
0x135f   :  { %p3759_p2 = scmp.ne.s32.totalorder %s2974_s3, %s3758_s0  ;;  %p3764_p4 = scmp.lt.s32.totalorder %s3758_s0, %s3758_s0 }
0x1361   :  { %p3765_p5 = por %p3764_p4, %p3763_p3 }
0x1363   :  { %p3766_p6 = pnand %p3765_p5, %p3759_p2 }
0x13cc   :  { %v2599_v9 = vpop.permute.xlu1 %2598 }
0x13cd   :  { %v2604_v15 = vsel %vm2594_vm8, %v2599_v9, 0.0 }
0x13ce   :  { %2606 = vst.msk [vmem:[#allocation3 + $0x7] sm:$0x1] %vm1342_vm1, %v2604_v15  ;;  %v2601_v20 = vpop.permute.xlu0 %2600 }
0x13cf   :  { %2608 = vst.msk [vmem:[#allocation3] sm:$0x1] %vm1345_vm2, %v2604_v15  ;;  %v2605_v38 = vsel %vm2595_vm9, %v2601_v20, 0.0 }
0x13d0   :  { %2607 = vst.msk [vmem:[#allocation3 + $0xf] sm:$0x1] %vm1342_vm1, %v2605_v38  ;;  %vm3828_vm1 = vmmov 0  }
0x13d1   :  { %2609 = vst.msk [vmem:[#allocation3 + $0x8] sm:$0x1] %vm1345_vm2, %v2605_v38  ;;  %3147 = vmatprep.mubr.msk.bf16.mxu1 %vm3828_vm1, %v3827_v29 }
0x13d6   :  { %v4873_v22 = vld [vmem:[#allocation3] sm:$0xff] }
0x13d7   :  { %3136 = vmatprep.mubr.msk.f32.mxu0 %vm582_vm11, %v4873_v22 }
0x13d8   :  { %v4877_v41 = vld [vmem:[#allocation3 + $0x8] sm:$0xff] }
0x13d9   :  { %3137 = vmatmul.mubr.msk.f32.vlgmr.msra.gmra.mrb[24].mxu0 %vm582_vm11, %v4877_v41 }
0x13da   :  { %3159 = vmatprep.mubr.msk.f32.mxu0 %vm3828_vm1, %v3827_v29 }
0x14ac   :  { %v3138_v54 = vpop.f32.mrb[24].mxu0 }
0x14ad   :  { %v2709_v51 = vadd.f32 %v3138_v54, %v3044_v36  ;;  %v2692_v6 = vpop.f32.mrb[25].mxu0 }
0x14ae   :  { %v2708_v63 = vadd.f32 %v3044_v36, %v2692_v6 }
0x14af   :  { %v2718_v42 = vsel %vm2710_vm12, %v2709_v51, -inf }
0x14b0   :  { %v2719_v45 = vrot.slane %v2718_v42, 4  ;;  %v2711_v2 = vsel %vm2710_vm12, %v2708_v63, -inf }
0x14b1   :  { %v2712_v57 = vrot.slane %v2711_v2, 4 }
0x14b2   :  { %v2720_v16 = vmax.f32 %v2718_v42, %v2719_v45 }
0x14b3   :  { %v2713_v60 = vmax.f32 %v2711_v2, %v2712_v57 }
0x14b4   :  { %v2721_v61 = vrot.slane %v2720_v16, 2 }
0x14b5   :  { %v2714_v3 = vrot.slane %v2713_v60, 2 }
0x14b6   :  { %v2722_v62 = vmax.f32 %v2720_v16, %v2721_v61  ;;  %v2875_v16 = vld [vmem:[#allocation30] sm:$0xff]  ;;  %v2877_v61 = vld [vmem:[#allocation30 + $0x10] sm:$0xff] }
0x14b7   :  { %v2715_v12 = vmax.f32 %v2713_v60, %v2714_v3  ;;  %v2876_v60 = vld [vmem:[#allocation30 + $0x8] sm:$0xff] }
0x14b8   :  { %v2723_v1 = vrot.slane %v2722_v62, 1  ;;  %v3179_v3 = vpack.c.bf16 %v2876_v60, %v2875_v16 }
0x14b9   :  { %v2716_v55 = vrot.slane %v2715_v12, 1 }
0x14ba   :  { %v2724_v5 = vmax.f32 %v2722_v62, %v2723_v1  ;;  %v2878_v62 = vld [vmem:[#allocation30 + $0x18] sm:$0xff]  ;;  %3180 = vmatpush3.bf16.msra.mxu0 %v3179_v3 }
0x14bb   :  { %v2717_v4 = vmax.f32 %v2715_v12, %v2716_v55  ;;  %v3182_v12 = vpack.c.bf16 %v2878_v62, %v2877_v61  ;;  %3181 = vmatprep.subr.bf16.mxu0 %v3829_v34  ;;  %v3050_v1 = vld [vmem:[#allocation27] ss:$0 sm:$0xff] }
0x14bc   :  { %v2726_v49 = vsub.f32 %v2709_v51, %v2724_v5  ;;  %v3051_v5 = vld [vmem:[#allocation29] ss:$0 sm:$0xff] }
0x14bd   :  { %v2725_v21 = vsub.f32 %v2708_v63, %v2717_v4 }
0x14be   :  { %v2729_v7 = vmul.f32 1.442695, %v2726_v49  ;;  %3183 = vmatpush3.bf16.msra.mxu0 %v3182_v12 }
0x14bf   :  { %v2727_v8 = vmul.f32 1.442695, %v2725_v21 }
0x14c0   :  { %3384 = vpow2.f32 %v2729_v7 }
0x14c1   :  { %3386 = vpow2.f32 %v2727_v8 }
0x14ca   :  { %v3385_v10 = vpop.eup %3384 }
0x14cb   :  { %v3387_v52 = vpop.eup %3386  ;;  %v2738_v24 = vsel %vm2710_vm12, %v3385_v10, 0.0 }
0x14cc   :  { %v2739_v25 = vrot.slane %v2738_v24, 4  ;;  %v2731_v53 = vsel %vm2710_vm12, %v3387_v52, 0.0 }
0x14cd   :  { %v2732_v26 = vrot.slane %v2731_v53, 4 }
0x14ce   :  { %v2740_v46 = vadd.f32 %v2739_v25, %v2738_v24 }
0x14cf   :  { %v2733_v31 = vadd.f32 %v2732_v26, %v2731_v53 }
0x14d0   :  { %v2741_v11 = vrot.slane %v2740_v46, 2 }
0x14d1   :  { %v2734_v27 = vrot.slane %v2733_v31, 2 }
0x14d2   :  { %v2742_v59 = vadd.f32 %v2741_v11, %v2740_v46 }
0x14d3   :  { %v2735_v0 = vadd.f32 %v2734_v27, %v2733_v31 }
0x14d4   :  { %v2743_v47 = vrot.slane %v2742_v59, 1 }
0x14d5   :  { %v2736_v56 = vrot.slane %v2735_v0, 1 }
0x14d6   :  { %v2744_v28 = vadd.f32 %v2743_v47, %v2742_v59 }
0x14d7   :  { %v2737_v44 = vadd.f32 %v2736_v56, %v2735_v0 }
0x14d8   :  { %3388 = vrcp.f32 %v2744_v28 }
0x14d9   :  { %3390 = vrcp.f32 %v2737_v44 }
0x14e2   :  { %v3389_v58 = vpop.eup %3388 }
0x14e3   :  { %v3391_v43 = vpop.eup %3390  ;;  %v2748_v50 = vmul.f32 %v3389_v58, %v3385_v10 }
0x14e4   :  { %v2747_v39 = vmul.f32 %v3391_v43, %v3387_v52  ;;  %v3052_v52 = vld [vmem:[#allocation5] ss:$0 sm:$0xff] }
0x14e5   :  { %2756 = vperm.xlu0 %3257, %v2748_v50  }
0x14e6   :  { %2751 = vperm.xlu1 %3256, %v2747_v39  }
0x1564   :  { %v2757_v32 = vpop.permute.xlu0 %2756 }
0x1565   :  { %v2760_v33 = vmul.f32 %v2757_v32, %v4877_v41  ;;  %v2752_v37 = vpop.permute.xlu1 %2751 }
0x1566   :  { %v2759_v40 = vmul.f32 %v2752_v37, %v4873_v22 }
0x1567   :  { %v2768_v30 = vsel %vm582_vm11, %v2760_v33, 0.0 }
0x1568   :  { %v2769_v13 = vrot.slane %v2768_v30, 4  ;;  %v2761_v23 = vsel %vm582_vm11, %v2759_v40, 0.0 }
0x1569   :  { %v2762_v48 = vrot.slane %v2761_v23, 4 }
0x156a   :  { %v2770_v35 = vadd.f32 %v2769_v13, %v2768_v30 }
0x156b   :  { %v2763_v9 = vadd.f32 %v2762_v48, %v2761_v23 }
0x156c   :  { %v2771_v15 = vrot.slane %v2770_v35, 2 }
0x156d   :  { %v2764_v20 = vrot.slane %v2763_v9, 2 }
0x156e   :  { %v2772_v38 = vadd.f32 %v2771_v15, %v2770_v35 }
0x156f   :  { %v2765_v36 = vadd.f32 %v2764_v20, %v2763_v9 }
0x1570   :  { %v2773_v54 = vrot.slane %v2772_v38, 1 }
0x1571   :  { %v2766_v51 = vrot.slane %v2765_v36, 1 }
0x1572   :  { %v2774_v6 = vadd.f32 %v2773_v54, %v2772_v38 }
0x1573   :  { %v2767_v63 = vadd.f32 %v2766_v51, %v2765_v36 }
0x1574   :  { %v2776_v41 = vpack.c.bf16 %v2774_v6, %v2774_v6 }
0x1575   :  { %v2775_v42 = vpack.c.bf16 %v2767_v63, %v2767_v63 }
0x1576   :  { %v2788_v45 = vunpack.c.l.b16 %v2776_v41 }
0x1577   :  { %v2787_v22 = vunpack.c.l.b16 %v2775_v42 }
0x1579   :  { %v2789_v2 = vsel %vm1004_vm14, %v2788_v45, %v2787_v22 }
0x157a   :  { %v2790_v57 = vpack.c.b16 %v2789_v2, %v2789_v2 }
0x157c   :  { %3148 = vmatmul.mubr.msk.bf16.vlgmr.msra.gmra.mrb[20].mxu1 %vm582_vm11, %v2790_v57  ;;  %vm2965_vm11 = vcmask 1024  }
0x164f   :  { %v2852_v55 = vpop.f32.mrb[20].mxu1 }
0x1650   :  { %v2865_v4 = vmul.f32 %v3050_v1, %v2852_v55  ;;  %v3149_v49 = vpop.f32.mrb[21].mxu1 }
0x1651   :  { %v2855_v21 = vpop.f32.mrb[22].mxu1 }
0x1652   :  { %v2873_v7 = vadd.f32 %v3051_v5, %v2865_v4  ;;  %v3150_v8 = vpop.f32.mrb[23].mxu1 }
0x1654   :  { %v2874_v10 = vmax.f32 %v2873_v7, 0.0 }
0x1656   :  { %3160 = vmatmul.mubr.msk.f32.vlgmr.msra.gmra.mrb[26].mxu0 %vm577_vm10, %v2874_v10 }
0x1729   :  { %v2955_v24 = vpop.f32.mrb[26].mxu0 }
0x172a   :  { %v2956_v25 = vadd.f32 %v3052_v52, %v2955_v24  ;;  %v3161_v53 = vpop.f32.mrb[27].mxu0 }
0x172c   :  { %v3054_v26 = vmul.f32 -1.442695, %v2956_v25 }
0x172e   :  { %3392 = vpow2.f32 %v3054_v26 }
0x1738   :  { %v3393_v46 = vpop.eup %3392 }
0x1739   :  { %v2962_v31 = vadd.f32 1.0, %v3393_v46 }
0x173b   :  { %3394 = vrcp.f32 %v2962_v31 }
0x1745   :  { %v3395_v11 = vpop.eup %3394 }
0x1746   :  { %2966 = vst.msk [vmem:[#allocation32] sm:$0x3] %vm2965_vm11, %v3395_v11 }
0x1747   :  { %3769 = shalt.err (!%p3766_p6)
}
0x1748   :  { %s3770_s24 = scalar_lea.hbm %s4921_s18, 32 }
0x1749   :  { %p3771_p7 = scmp.ne.s32.totalorder %s4921_s18, %s3770_s24  ;;  %p3774_p8 = scmp.lt.u32.totalorder %s3770_s24, %s4921_s18 }
0x174b   :  { %p3776_p9 = pnand %p3774_p8, %p3771_p7 }
0x174d   :  { %3779 = shalt.err (!%p3776_p9)
}
0x174e   :  { %2976 = dma.vmem_to_hbm [thread:$0]  %s2974_s3, 32, %s4921_s18, [#allocation8]  }
0x174f   :  { %3798 = dma.done.wait [#allocation8], 32  }
0x1750   :  { %3799 = vsyncadd [#allocation8], 4294967264 }
0x1751   :  { %2980 = vsyncpa [#allocation7], 1 }
0x1752   :  { %2981 = vsyncpa [#allocation10], 1 }
0x1753   :  { %2982 = vsyncpa [#allocation13], 1 }
0x1754   :  { %2983 = vsyncpa [#allocation16], 1 }
0x1755   :  { %2984 = vsyncpa [#allocation19], 1 }
0x1756   :  { %2985 = vsyncpa [#allocation22], 1 }
0x1757   :  { %2986 = vsyncpa [#allocation25], 1 }
0x1758   :  { %2987 = vsyncpa [#allocation28], 1 }
0x1759   :  { %2988 = vsyncpa [#allocation31], 1 }
0x175a   :  { %2989 = vsyncpa [#allocation8], 1 }

</bundles_post_ra>
